<compile_context>
chip_gen: v6e
topology: v6e:2x2x1
jax: 0.10.0
libtpu: 0.0.40
codegen_flags: <defaults>
</compile_context>

<pallas_src>
import math

import jax
import jax.numpy as jnp
from jax.experimental import pallas as pl
from jax.experimental.pallas import tpu as pltpu

LANE = 128  # lane-dense padded output-channel count


# ----------------------------------------------------------------------------
# Fused Pallas kernel: both branches, im2col + single MXU dot + BN + ReLU each
# ----------------------------------------------------------------------------
def _make_kernel(KH, KW):
    def kernel(xh_ref, xl_ref, wh_ref, wl_ref,
               sh_ref, bh_ref, sl_ref, bl_ref,
               oh_ref, ol_ref):
        def branch(xp_ref, w_ref, s_ref, b_ref, o_ref):
            # xp_ref: (1, Hp, Wp, Cin) pre-padded NHWC tile for this batch element
            # w_ref : (KH*KW*Cin, 128) flattened HWIO weights, zero-padded channels
            # s_ref/b_ref: (1, 128) folded BN scale / shift (zero on pad channels)
            # o_ref : (1, Ho*Wo, 128) lane-dense output slab
            _, Hp, Wp, Cin = xp_ref.shape
            Ho = Hp - (KH - 1)
            Wo = Wp - (KW - 1)

            xp = xp_ref[0]                                   # (Hp, Wp, Cin)
            # Fused im2col: one (Ho*Wo, KH*KW*Cin) patch matrix, one MXU dot.
            taps = [xp[kh:kh + Ho, kw:kw + Wo, :]
                    for kh in range(KH) for kw in range(KW)]
            patch = jnp.concatenate(taps, axis=-1)           # (Ho, Wo, KH*KW*Cin)
            patch = patch.reshape(Ho * Wo, KH * KW * Cin)

            acc = jnp.dot(patch, w_ref[...],
                          preferred_element_type=jnp.float32)  # (Ho*Wo, 128)
            y = acc * s_ref[...] + b_ref[...]                # folded BN (eval mode)
            o_ref[0] = jnp.maximum(y, 0.0)                   # ReLU, lane-dense store

        branch(xh_ref, wh_ref, sh_ref, bh_ref, oh_ref)       # high-freq branch
        branch(xl_ref, wl_ref, sl_ref, bl_ref, ol_ref)       # low-freq branch

    return kernel


def first_octave_fused(x_h_nhwc, x_l_nhwc, w_h, w_l,
                       scale_h, shift_h, scale_l, shift_l, padding=1):
    """Runs both conv+BN+ReLU branches in a single pallas_call. NHWC in/out."""
    N, H, W, Cin = x_h_nhwc.shape
    _, HL, WL, _ = x_l_nhwc.shape
    KH, KW, _, Ch = w_h.shape
    Cl = w_l.shape[-1]
    Kf = KH * KW * Cin

    def pad_params(w, s, b, c):
        wf = jnp.pad(w.reshape(Kf, c), ((0, 0), (0, LANE - c)))
        sp = jnp.pad(s.reshape(1, c), ((0, 0), (0, LANE - c)))
        bp = jnp.pad(b.reshape(1, c), ((0, 0), (0, LANE - c)))
        return wf.astype(jnp.float32), sp.astype(jnp.float32), bp.astype(jnp.float32)

    whf, shp, bhp = pad_params(w_h, scale_h, shift_h, Ch)
    wlf, slp, blp = pad_params(w_l, scale_l, shift_l, Cl)

    p = padding
    xph = jnp.pad(x_h_nhwc, ((0, 0), (p, p), (p, p), (0, 0)))
    xpl = jnp.pad(x_l_nhwc, ((0, 0), (p, p), (p, p), (0, 0)))
    Hp, Wp = H + 2 * p, W + 2 * p
    HLp, WLp = HL + 2 * p, WL + 2 * p
    Ho, Wo = Hp - (KH - 1), Wp - (KW - 1)
    HLo, WLo = HLp - (KH - 1), WLp - (KW - 1)

    oh, ol = pl.pallas_call(
        _make_kernel(KH, KW),
        out_shape=(jax.ShapeDtypeStruct((N, Ho * Wo, LANE), jnp.float32),
                   jax.ShapeDtypeStruct((N, HLo * WLo, LANE), jnp.float32)),
        grid=(N,),
        in_specs=[
            pl.BlockSpec((1, Hp, Wp, Cin), lambda n: (n, 0, 0, 0)),
            pl.BlockSpec((1, HLp, WLp, Cin), lambda n: (n, 0, 0, 0)),
            pl.BlockSpec((Kf, LANE), lambda n: (0, 0)),
            pl.BlockSpec((Kf, LANE), lambda n: (0, 0)),
            pl.BlockSpec((1, LANE), lambda n: (0, 0)),
            pl.BlockSpec((1, LANE), lambda n: (0, 0)),
            pl.BlockSpec((1, LANE), lambda n: (0, 0)),
            pl.BlockSpec((1, LANE), lambda n: (0, 0)),
        ],
        out_specs=(pl.BlockSpec((1, Ho * Wo, LANE), lambda n: (n, 0, 0)),
                   pl.BlockSpec((1, HLo * WLo, LANE), lambda n: (n, 0, 0))),
        compiler_params=pltpu.CompilerParams(
            dimension_semantics=("parallel",),
            vmem_limit_bytes=32 * 1024 * 1024),
    )(xph, xpl, whf, wlf, shp, bhp, slp, blp)

    x_h_out = oh[:, :, :Ch].reshape(N, Ho, Wo, Ch)
    x_l_out = ol[:, :, :Cl].reshape(N, HLo, WLo, Cl)
    return x_h_out, x_l_out


# ----------------------------------------------------------------------------
# Plain-JAX glue
# ----------------------------------------------------------------------------
def avg_pool_2x2(x_nhwc):
    """nn.AvgPool2d(kernel_size=(2,2), stride=2) on NHWC (even H, W)."""
    N, H, W, C = x_nhwc.shape
    return x_nhwc.reshape(N, H // 2, 2, W // 2, 2, C).mean(axis=(2, 4))


def fold_bn(gamma, beta, mean, var, eps=1e-5):
    scale = gamma / jnp.sqrt(var + eps)
    shift = beta - mean * scale
    return scale.astype(jnp.float32), shift.astype(jnp.float32)


class FirstOctaveConvPallas:
    """JAX/Pallas equivalent of the PyTorch FirstOctaveConv module."""

    def __init__(self, in_channels, out_channels, kernel_size, alpha=0.8,
                 stride=1, padding=1, *, key):
        ksize = kernel_size[0]
        self.stride = stride
        self.padding = padding
        self.ch_l = math.floor(alpha * out_channels)                  # h2l out channels
        self.ch_h = out_channels - int(alpha * out_channels)          # h2h out channels
        assert math.ceil(out_channels * (1 - alpha)) == self.ch_h
        assert math.floor(out_channels * alpha) == self.ch_l

        keys = jax.random.split(key, 10)
        fan_in = in_channels * ksize * ksize
        bound = 1.0 / math.sqrt(fan_in)
        # Conv weights in HWIO (deterministic synthetic init, PyTorch-like uniform).
        self.w_h2h = jax.random.uniform(
            keys[0], (ksize, ksize, in_channels, self.ch_h), jnp.float32, -bound, bound)
        self.w_h2l = jax.random.uniform(
            keys[1], (ksize, ksize, in_channels, self.ch_l), jnp.float32, -bound, bound)

        # BatchNorm (inference mode) parameters, folded to per-channel scale/shift.
        gamma_h = 1.0 + 0.1 * jax.random.normal(keys[2], (self.ch_h,))
        beta_h = 0.1 * jax.random.normal(keys[3], (self.ch_h,))
        mean_h = 0.1 * jax.random.normal(keys[4], (self.ch_h,))
        var_h = jax.random.uniform(keys[5], (self.ch_h,), minval=0.5, maxval=1.5)
        self.scale_h, self.shift_h = fold_bn(gamma_h, beta_h, mean_h, var_h)

        gamma_l = 1.0 + 0.1 * jax.random.normal(keys[6], (self.ch_l,))
        beta_l = 0.1 * jax.random.normal(keys[7], (self.ch_l,))
        mean_l = 0.1 * jax.random.normal(keys[8], (self.ch_l,))
        var_l = jax.random.uniform(keys[9], (self.ch_l,), minval=0.5, maxval=1.5)
        self.scale_l, self.shift_l = fold_bn(gamma_l, beta_l, mean_l, var_l)

    def __call__(self, x_nchw):
        x = jnp.transpose(x_nchw, (0, 2, 3, 1))          # NCHW -> NHWC
        if self.stride == 2:
            x = avg_pool_2x2(x)
        x_h2l = avg_pool_2x2(x)                          # low-frequency branch input

        x_h, x_l = first_octave_fused(
            x, x_h2l, self.w_h2h, self.w_h2l,
            self.scale_h, self.shift_h, self.scale_l, self.shift_l,
            padding=self.padding)

        # Back to PyTorch NCHW convention.
        return (jnp.transpose(x_h, (0, 3, 1, 2)), jnp.transpose(x_l, (0, 3, 1, 2)))


if __name__ == "__main__":
    key = jax.random.PRNGKey(0)
    k_x, k_params = jax.random.split(key)

    N, Cin, H, W = 2, 4, 16, 16
    Cout, alpha = 10, 0.8
    x = jax.random.normal(k_x, (N, Cin, H, W), jnp.float32)

    module = FirstOctaveConvPallas(Cin, Cout, kernel_size=(3, 3), alpha=alpha,
                                   stride=1, padding=1, key=k_params)
    x_h, x_l = module(x)
    x_h = jax.block_until_ready(x_h)
    x_l = jax.block_until_ready(x_l)

    assert x_h.shape == (N, Cout - int(alpha * Cout), H, W), x_h.shape           # (2, 2, 16, 16)
    assert x_l.shape == (N, math.floor(alpha * Cout), H // 2, W // 2), x_l.shape  # (2, 8, 8, 8)
    assert bool(jnp.all(x_h >= 0.0)) and bool(jnp.all(x_l >= 0.0))               # ReLU outputs
    assert bool(jnp.isfinite(x_h).all()) and bool(jnp.isfinite(x_l).all())
    print("KERNEL_OK")
</pallas_src>

<mosaic_0001>
module attributes {stable_mosaic.version = 11 : i64} {
  func.func @kernel(%arg0: i32, %arg1: memref<1x18x18x4xf32, #tpu.memory_space<vmem>>, %arg2: memref<1x10x10x4xf32, #tpu.memory_space<vmem>>, %arg3: memref<36x128xf32, #tpu.memory_space<vmem>>, %arg4: memref<36x128xf32, #tpu.memory_space<vmem>>, %arg5: memref<1x128xf32, #tpu.memory_space<vmem>>, %arg6: memref<1x128xf32, #tpu.memory_space<vmem>>, %arg7: memref<1x128xf32, #tpu.memory_space<vmem>>, %arg8: memref<1x128xf32, #tpu.memory_space<vmem>>, %arg9: memref<1x256x128xf32, #tpu.memory_space<vmem>>, %arg10: memref<1x64x128xf32, #tpu.memory_space<vmem>>) attributes {dimension_semantics = [#tpu.dimension_semantics<parallel>], iteration_bounds = array<i64: 2>, scalar_prefetch = 0 : i64, scratch_operands = 0 : i64, tpu.core_type = #tpu.core_type<tc>, window_params = [{transform_indices = @transform_0, window_bounds = array<i64: 1, 18, 18, 4>}, {transform_indices = @transform_1, window_bounds = array<i64: 1, 10, 10, 4>}, {pipeline_mode = #tpu.pipeline_mode<synchronous>, transform_indices = @transform_2, window_bounds = array<i64: 36, 128>}, {pipeline_mode = #tpu.pipeline_mode<synchronous>, transform_indices = @transform_3, window_bounds = array<i64: 36, 128>}, {pipeline_mode = #tpu.pipeline_mode<synchronous>, transform_indices = @transform_4, window_bounds = array<i64: 1, 128>}, {pipeline_mode = #tpu.pipeline_mode<synchronous>, transform_indices = @transform_5, window_bounds = array<i64: 1, 128>}, {pipeline_mode = #tpu.pipeline_mode<synchronous>, transform_indices = @transform_6, window_bounds = array<i64: 1, 128>}, {pipeline_mode = #tpu.pipeline_mode<synchronous>, transform_indices = @transform_7, window_bounds = array<i64: 1, 128>}, {transform_indices = @transform_8, window_bounds = array<i64: 1, 256, 128>}, {transform_indices = @transform_9, window_bounds = array<i64: 1, 64, 128>}]} {
    %c0 = arith.constant 0 : index
    %c0_0 = arith.constant 0 : index
    %c0_1 = arith.constant 0 : index
    %c0_2 = arith.constant 0 : index
    %0 = vector.load %arg1[%c0, %c0_0, %c0_1, %c0_2] : memref<1x18x18x4xf32, #tpu.memory_space<vmem>>, vector<1x18x18x4xf32>
    %1 = vector.shape_cast %0 : vector<1x18x18x4xf32> to vector<18x18x4xf32>
    %2 = vector.extract_strided_slice %1 {offsets = [0, 0, 0], sizes = [16, 16, 4], strides = [1, 1, 1]} : vector<18x18x4xf32> to vector<16x16x4xf32>
    %3 = vector.extract_strided_slice %1 {offsets = [0, 1, 0], sizes = [16, 16, 4], strides = [1, 1, 1]} : vector<18x18x4xf32> to vector<16x16x4xf32>
    %4 = vector.extract_strided_slice %1 {offsets = [0, 2, 0], sizes = [16, 16, 4], strides = [1, 1, 1]} : vector<18x18x4xf32> to vector<16x16x4xf32>
    %5 = vector.extract_strided_slice %1 {offsets = [1, 0, 0], sizes = [16, 16, 4], strides = [1, 1, 1]} : vector<18x18x4xf32> to vector<16x16x4xf32>
    %6 = vector.extract_strided_slice %1 {offsets = [1, 1, 0], sizes = [16, 16, 4], strides = [1, 1, 1]} : vector<18x18x4xf32> to vector<16x16x4xf32>
    %7 = vector.extract_strided_slice %1 {offsets = [1, 2, 0], sizes = [16, 16, 4], strides = [1, 1, 1]} : vector<18x18x4xf32> to vector<16x16x4xf32>
    %8 = vector.extract_strided_slice %1 {offsets = [2, 0, 0], sizes = [16, 16, 4], strides = [1, 1, 1]} : vector<18x18x4xf32> to vector<16x16x4xf32>
    %9 = vector.extract_strided_slice %1 {offsets = [2, 1, 0], sizes = [16, 16, 4], strides = [1, 1, 1]} : vector<18x18x4xf32> to vector<16x16x4xf32>
    %10 = vector.extract_strided_slice %1 {offsets = [2, 2, 0], sizes = [16, 16, 4], strides = [1, 1, 1]} : vector<18x18x4xf32> to vector<16x16x4xf32>
    %11 = tpu.concatenate %2, %3, %4, %5, %6, %7, %8, %9, %10 in 2 : vector<16x16x4xf32>, vector<16x16x4xf32>, vector<16x16x4xf32>, vector<16x16x4xf32>, vector<16x16x4xf32>, vector<16x16x4xf32>, vector<16x16x4xf32>, vector<16x16x4xf32>, vector<16x16x4xf32> -> vector<16x16x36xf32>
    %12 = vector.shape_cast %11 : vector<16x16x36xf32> to vector<256x36xf32>
    %c0_3 = arith.constant 0 : index
    %c0_4 = arith.constant 0 : index
    %13 = vector.load %arg3[%c0_3, %c0_4] : memref<36x128xf32, #tpu.memory_space<vmem>>, vector<36x128xf32>
    %cst = arith.constant dense<0.000000e+00> : vector<256x128xf32>
    %14 = tpu.matmul %12, %13, %cst {dimension_numbers = #tpu.dot_dimension_numbers<[1], [0], [0], [1], [0, 0, 1, 1], [], []>} : vector<256x36xf32>, vector<36x128xf32>, vector<256x128xf32> -> vector<256x128xf32>
    %c0_5 = arith.constant 0 : index
    %c0_6 = arith.constant 0 : index
    %15 = vector.load %arg5[%c0_5, %c0_6] : memref<1x128xf32, #tpu.memory_space<vmem>>, vector<1x128xf32>
    %16 = vector.broadcast %15 : vector<1x128xf32> to vector<256x128xf32>
    %17 = arith.mulf %14, %16 : vector<256x128xf32>
    %c0_7 = arith.constant 0 : index
    %c0_8 = arith.constant 0 : index
    %18 = vector.load %arg6[%c0_7, %c0_8] : memref<1x128xf32, #tpu.memory_space<vmem>>, vector<1x128xf32>
    %19 = vector.broadcast %18 : vector<1x128xf32> to vector<256x128xf32>
    %20 = arith.addf %17, %19 : vector<256x128xf32>
    %cst_9 = arith.constant 0.000000e+00 : f32
    %21 = vector.broadcast %cst_9 : f32 to vector<256x128xf32>
    %22 = arith.maximumf %20, %21 : vector<256x128xf32>
    %c0_10 = arith.constant 0 : index
    %c0_11 = arith.constant 0 : index
    %c0_12 = arith.constant 0 : index
    %23 = vector.load %arg9[%c0_10, %c0_11, %c0_12] : memref<1x256x128xf32, #tpu.memory_space<vmem>>, vector<1x256x128xf32>
    %24 = vector.shape_cast %23 : vector<1x256x128xf32> to vector<256x128xf32>
    %25 = vector.shape_cast %22 : vector<256x128xf32> to vector<1x256x128xf32>
    tpu.vector_store %arg9[%c0_10, %c0_11, %c0_12], %25 {strides = array<i32>} : memref<1x256x128xf32, #tpu.memory_space<vmem>>, vector<1x256x128xf32>,
    %c0_13 = arith.constant 0 : index
    %c0_14 = arith.constant 0 : index
    %c0_15 = arith.constant 0 : index
    %c0_16 = arith.constant 0 : index
    %26 = vector.load %arg2[%c0_13, %c0_14, %c0_15, %c0_16] : memref<1x10x10x4xf32, #tpu.memory_space<vmem>>, vector<1x10x10x4xf32>
    %27 = vector.shape_cast %26 : vector<1x10x10x4xf32> to vector<10x10x4xf32>
    %28 = vector.extract_strided_slice %27 {offsets = [0, 0, 0], sizes = [8, 8, 4], strides = [1, 1, 1]} : vector<10x10x4xf32> to vector<8x8x4xf32>
    %29 = vector.extract_strided_slice %27 {offsets = [0, 1, 0], sizes = [8, 8, 4], strides = [1, 1, 1]} : vector<10x10x4xf32> to vector<8x8x4xf32>
    %30 = vector.extract_strided_slice %27 {offsets = [0, 2, 0], sizes = [8, 8, 4], strides = [1, 1, 1]} : vector<10x10x4xf32> to vector<8x8x4xf32>
    %31 = vector.extract_strided_slice %27 {offsets = [1, 0, 0], sizes = [8, 8, 4], strides = [1, 1, 1]} : vector<10x10x4xf32> to vector<8x8x4xf32>
    %32 = vector.extract_strided_slice %27 {offsets = [1, 1, 0], sizes = [8, 8, 4], strides = [1, 1, 1]} : vector<10x10x4xf32> to vector<8x8x4xf32>
    %33 = vector.extract_strided_slice %27 {offsets = [1, 2, 0], sizes = [8, 8, 4], strides = [1, 1, 1]} : vector<10x10x4xf32> to vector<8x8x4xf32>
    %34 = vector.extract_strided_slice %27 {offsets = [2, 0, 0], sizes = [8, 8, 4], strides = [1, 1, 1]} : vector<10x10x4xf32> to vector<8x8x4xf32>
    %35 = vector.extract_strided_slice %27 {offsets = [2, 1, 0], sizes = [8, 8, 4], strides = [1, 1, 1]} : vector<10x10x4xf32> to vector<8x8x4xf32>
    %36 = vector.extract_strided_slice %27 {offsets = [2, 2, 0], sizes = [8, 8, 4], strides = [1, 1, 1]} : vector<10x10x4xf32> to vector<8x8x4xf32>
    %37 = tpu.concatenate %28, %29, %30, %31, %32, %33, %34, %35, %36 in 2 : vector<8x8x4xf32>, vector<8x8x4xf32>, vector<8x8x4xf32>, vector<8x8x4xf32>, vector<8x8x4xf32>, vector<8x8x4xf32>, vector<8x8x4xf32>, vector<8x8x4xf32>, vector<8x8x4xf32> -> vector<8x8x36xf32>
    %38 = vector.shape_cast %37 : vector<8x8x36xf32> to vector<64x36xf32>
    %c0_17 = arith.constant 0 : index
    %c0_18 = arith.constant 0 : index
    %39 = vector.load %arg4[%c0_17, %c0_18] : memref<36x128xf32, #tpu.memory_space<vmem>>, vector<36x128xf32>
    %cst_19 = arith.constant dense<0.000000e+00> : vector<64x128xf32>
    %40 = tpu.matmul %38, %39, %cst_19 {dimension_numbers = #tpu.dot_dimension_numbers<[1], [0], [0], [1], [0, 0, 1, 1], [], []>} : vector<64x36xf32>, vector<36x128xf32>, vector<64x128xf32> -> vector<64x128xf32>
    %c0_20 = arith.constant 0 : index
    %c0_21 = arith.constant 0 : index
    %41 = vector.load %arg7[%c0_20, %c0_21] : memref<1x128xf32, #tpu.memory_space<vmem>>, vector<1x128xf32>
    %42 = vector.broadcast %41 : vector<1x128xf32> to vector<64x128xf32>
    %43 = arith.mulf %40, %42 : vector<64x128xf32>
    %c0_22 = arith.constant 0 : index
    %c0_23 = arith.constant 0 : index
    %44 = vector.load %arg8[%c0_22, %c0_23] : memref<1x128xf32, #tpu.memory_space<vmem>>, vector<1x128xf32>
    %45 = vector.broadcast %44 : vector<1x128xf32> to vector<64x128xf32>
    %46 = arith.addf %43, %45 : vector<64x128xf32>
    %cst_24 = arith.constant 0.000000e+00 : f32
    %47 = vector.broadcast %cst_24 : f32 to vector<64x128xf32>
    %48 = arith.maximumf %46, %47 : vector<64x128xf32>
    %c0_25 = arith.constant 0 : index
    %c0_26 = arith.constant 0 : index
    %c0_27 = arith.constant 0 : index
    %49 = vector.load %arg10[%c0_25, %c0_26, %c0_27] : memref<1x64x128xf32, #tpu.memory_space<vmem>>, vector<1x64x128xf32>
    %50 = vector.shape_cast %49 : vector<1x64x128xf32> to vector<64x128xf32>
    %51 = vector.shape_cast %48 : vector<64x128xf32> to vector<1x64x128xf32>
    tpu.vector_store %arg10[%c0_25, %c0_26, %c0_27], %51 {strides = array<i32>} : memref<1x64x128xf32, #tpu.memory_space<vmem>>, vector<1x64x128xf32>,
    return
  }
  func.func @transform_0(%arg0: i32) -> (i32, i32, i32, i32) {
    %c0_i32 = arith.constant 0 : i32
    %c0_i32_0 = arith.constant 0 : i32
    %c0_i32_1 = arith.constant 0 : i32
    %c0_i32_2 = arith.constant 0 : i32
    return %arg0, %c0_i32, %c0_i32_0, %c0_i32_1 : i32, i32, i32, i32
  }
  func.func @transform_1(%arg0: i32) -> (i32, i32, i32, i32) {
    %c0_i32 = arith.constant 0 : i32
    %c0_i32_0 = arith.constant 0 : i32
    %c0_i32_1 = arith.constant 0 : i32
    %c0_i32_2 = arith.constant 0 : i32
    return %arg0, %c0_i32, %c0_i32_0, %c0_i32_1 : i32, i32, i32, i32
  }
  func.func @transform_2(%arg0: i32) -> (i32, i32) {
    %c0_i32 = arith.constant 0 : i32
    %c0_i32_0 = arith.constant 0 : i32
    %c0_i32_1 = arith.constant 0 : i32
    return %c0_i32, %c0_i32_0 : i32, i32
  }
  func.func @transform_3(%arg0: i32) -> (i32, i32) {
    %c0_i32 = arith.constant 0 : i32
    %c0_i32_0 = arith.constant 0 : i32
    %c0_i32_1 = arith.constant 0 : i32
    return %c0_i32, %c0_i32_0 : i32, i32
  }
  func.func @transform_4(%arg0: i32) -> (i32, i32) {
    %c0_i32 = arith.constant 0 : i32
    %c0_i32_0 = arith.constant 0 : i32
    %c0_i32_1 = arith.constant 0 : i32
    return %c0_i32, %c0_i32_0 : i32, i32
  }
  func.func @transform_5(%arg0: i32) -> (i32, i32) {
    %c0_i32 = arith.constant 0 : i32
    %c0_i32_0 = arith.constant 0 : i32
    %c0_i32_1 = arith.constant 0 : i32
    return %c0_i32, %c0_i32_0 : i32, i32
  }
  func.func @transform_6(%arg0: i32) -> (i32, i32) {
    %c0_i32 = arith.constant 0 : i32
    %c0_i32_0 = arith.constant 0 : i32
    %c0_i32_1 = arith.constant 0 : i32
    return %c0_i32, %c0_i32_0 : i32, i32
  }
  func.func @transform_7(%arg0: i32) -> (i32, i32) {
    %c0_i32 = arith.constant 0 : i32
    %c0_i32_0 = arith.constant 0 : i32
    %c0_i32_1 = arith.constant 0 : i32
    return %c0_i32, %c0_i32_0 : i32, i32
  }
  func.func @transform_8(%arg0: i32) -> (i32, i32, i32) {
    %c0_i32 = arith.constant 0 : i32
    %c0_i32_0 = arith.constant 0 : i32
    %c0_i32_1 = arith.constant 0 : i32
    return %arg0, %c0_i32, %c0_i32_0 : i32, i32, i32
  }
  func.func @transform_9(%arg0: i32) -> (i32, i32, i32) {
    %c0_i32 = arith.constant 0 : i32
    %c0_i32_0 = arith.constant 0 : i32
    %c0_i32_1 = arith.constant 0 : i32
    return %arg0, %c0_i32, %c0_i32_0 : i32, i32, i32
  }
}

</mosaic_0001>

<bundles_post_ra>
// kernel: tpu_custom_call.1
= control target key start
LH: loop header
LB: loop body
LE: loop exit
PB: predicated region body
PF: predicated region fallthrough
CT: control target
= control target key end

     0   :  { %s5864_s0 = inlined_call_operand.vmem [shape: f32[2,18,18,4], index: 0, kind: input, shape index: {}]   ;;  %s5865_s1 = inlined_call_operand.vmem [shape: f32[2,10,10,4], index: 1, kind: input, shape index: {}]   ;;  %s5866_s2 = inlined_call_operand.vmem [shape: f32[36,128], index: 2, kind: input, shape index: {}]   ;;  %s5867_s3 = inlined_call_operand.vmem [shape: f32[36,128], index: 3, kind: input, shape index: {}]   ;;  %s5868_s4 = inlined_call_operand.vmem [shape: f32[1,128], index: 4, kind: input, shape index: {}]   ;;  %s5869_s5 = inlined_call_operand.vmem [shape: f32[1,128], index: 5, kind: input, shape index: {}]   ;;  %s5870_s6 = inlined_call_operand.vmem [shape: f32[1,128], index: 6, kind: input, shape index: {}]   ;;  %s5871_s7 = inlined_call_operand.vmem [shape: f32[1,128], index: 7, kind: input, shape index: {}]   ;;  %s5872_s8 = inlined_call_operand.hbm [shape: f32[2,256,128], index: 8, kind: output, shape index: {0}]   ;;  %s5873_s9 = inlined_call_operand.hbm [shape: f32[2,64,128], index: 9, kind: output, shape index: {1}]  }
   0x1   :  { %5956 = sst [smem:[#allocation160_spill]] %s5864_s0 }
   0x2   :  { %5957 = sst [smem:[#allocation161_spill]] %s5865_s1 }
   0x3   :  { %15 = vsyncpa [#allocation3], 0 }
   0x4   :  { %17 = vsyncpa [#allocation3 + $0x1], 0 }
   0x5   :  { %18 = vsyncpa [#allocation5], 0 }
   0x6   :  { %20 = vsyncpa [#allocation5 + $0x1], 0  ;;  %s3287_s30 = smov 0   ;;  %s3289_s10 = smov 0  }
   0x7   :  { %s3291_s11 = smov 0   ;;  %s3293_s12 = smov 0  }
   0x8 LB: > { %s3308_s13 = sadd.s32 4294967295, %s3224_s12   ;;  %s2837_s14 = sadd.s32 4294967294, %s3224_s12   ;;  %s3224_s12 = sphi %s3293_s12, %s6334_s12   ;;  %s3220_s11 = sphi %s3291_s11, %s6333_s11   ;;  %s3216_s10 = sphi %s3289_s10, %s6332_s10   ;;  %s3212_s30 = sphi %s3287_s30, %s6331_s30  }
   0x9   : > { %s3312_s15 = sadd.s32 1, %s3224_s12   ;;  %s211_s16 = sadd.s32 1, %s3220_s11 }
   0xa   : > { %s208_s17 = ssub.s32 %s3224_s12, %s3312_s15  ;;  %p221_p0 = scmp.ne.s32.totalorder %s3220_s11, %s3216_s10 }
   0xb   : > { %p209_p1 = scmp.eq.s32.totalorder %s208_s17, 0  ;;  %p222_p2 = scmp.eq.s32.totalorder %s3308_s13, 1 }
   0xc   : > { %p227_p3 = scmp.ne.s32.totalorder %s3216_s10, %s3212_s30  ;;  %p228_p4 = scmp.eq.s32.totalorder %s2837_s14, 1 }
   0xd   : > { %s3323_s18 = scalar_select %p209_p1, %s3220_s11, %s211_s16  }
   0xe   : > { %p3325_p5 = por %p222_p2, %p221_p0  ;;  %p3329_p6 = por %p228_p4, %p227_p3 }
   0xf   : > { %p2840_p7 = scmp.ge.s32.totalorder %s3224_s12, 1  ;;  %p306_p8 = scmp.lt.s32.totalorder %s3224_s12, 3 }
  0x11   : > { %p307_p9 = pnand %p2840_p7, %p306_p8 }
  0x13   : > { %310 = sbr.rel (%p307_p9) target bundleno = 1025 (0x401), region = 52 }
  0x18   : > { %p352_p10 = scmp.lt.s32.totalorder %s3308_s13, 1  ;;  %s5960_s0 = sld [smem:[#allocation160_spill]]  ;;  %vm464_vm0 = vcmask 1046528   ;;  %vm641_vm1 = vcmask 1045504   ;;  %vm1786_vm2 = vcmask 1043456   ;;  %vm1420_vm3 = vcmask 31744  }
  0x19   : > { %s3226_s26 = smov 4   ;;  %s5954_s27 = smov 8   ;;  %vm1453_vm4 = vcmask 64512   ;;  %vm1486_vm5 = vcmask 97280   ;;  %vm1519_vm6 = vcmask 130048   ;;  %vm1552_vm7 = vcmask 162816  }
  0x1a   : > { %s3337_s21 = scalar_select %p352_p10, %s3308_s13, 1  ;;  %vm1585_vm8 = vcmask 195584   ;;  %vm1618_vm9 = vcmask 228352   ;;  %vm1651_vm10 = vcmask 261120   ;;  %vm1689_vm11 = vcmask 293888  }
  0x1b   : > { %s3228_s28 = smov 12   ;;  %s5950_s29 = smov 16  }
  0x1c   : > { %s3041_s22 = smul.u32 432, %s3337_s21  ;;  %s5948_s14 = smov 20  }
  0x1d   : > { %s3231_s16 = smov 24   ;;  %s3042_s17 = smul.u32 160, %s3337_s21 }
  0x1e   : > { %s3343_s25 = scalar_lea.vmem %s5960_s0, %s3041_s22  ;;  %s6165_s1 = sld [smem:[#allocation161_spill]] }
  0x1f   : > { %v3346_v0 = vld [vmem:[%s3343_s25 + $0x18] sm:$0xff]  ;;  %v3349_v1 = vld [vmem:[%s3343_s25 + $0x20] sm:$0xff]  ;;  %v3357_v5 = vld [vmem:[%s3343_s25 + $0x8] sm:$0xff]  ;;  %s6191_s21 = smov 16  }
  0x20   : > { %v3352_v2 = vld [vmem:[%s3343_s25] sm:$0xff]  ;;  %v470_v3 = vrot.slane %v3346_v0, 1  ;;  %v471_v4 = vrot.slane %v3349_v1, 1  ;;  %v3361_v7 = vld [vmem:[%s3343_s25 + $0x28] sm:$0x3]  ;;  %v466_v8 = vrot.slane %v3357_v5, 1 }
  0x21   : > { %v465_v6 = vrot.slane %v3352_v2, 1  ;;  %v473_v9 = vrot.slane %v3361_v7, 1  ;;  %v3366_v10 = vld [vmem:[%s3343_s25 + $0x10] sm:$0x3]  ;;  %v3369_v11 = vld [vmem:[%s3343_s25 + $0x38] sm:$0xff]  ;;  %v3399_v24 = vld [vmem:[%s3343_s25 + $0x48] sm:$0xff] }
  0x22   : > { %v3372_v12 = vsel %vm464_vm0, %v470_v3, %v471_v4  ;;  %v468_v13 = vrot.slane %v3366_v10, 1  ;;  %v3376_v14 = vld [vmem:[%s3343_s25 + $0x40] sm:$0x3]  ;;  %v3379_v15 = vld [vmem:[%s3343_s25 + $0x30] sm:$0xff]  ;;  %v476_v18 = vrot.slane %v3369_v11, 1  ;;  %v480_v29 = vrot.slane %v3399_v24, 1 }
  0x23   : > { %549 = vrot.lane.b32.xlu1 %v3372_v12, %s3226_s26  ;;  %v467_v16 = vsel %vm464_vm0, %v465_v6, %v466_v8  ;;  %v3386_v17 = vsel %vm464_vm0, %v471_v4, %v473_v9  ;;  %v478_v19 = vrot.slane %v3376_v14, 1  ;;  %v475_v21 = vrot.slane %v3379_v15, 1  ;;  %v3393_v22 = vld [vmem:[%s3343_s25 + $0x50] sm:$0xff]  ;;  %v3396_v23 = vld [vmem:[%s3343_s25 + $0x58] sm:$0x3]  ;;  %v3414_v30 = vld [vmem:[%s3343_s25 + $0x68] sm:$0xff] }
  0x24   : > { %545 = vrot.lane.b32.xlu0 %v467_v16, %s3226_s26  ;;  %v469_v20 = vsel %vm464_vm0, %v466_v8, %v468_v13  ;;  %v481_v26 = vrot.slane %v3393_v22, 1  ;;  %v483_v27 = vrot.slane %v3396_v23, 1  ;;  %v3417_v31 = vld [vmem:[%s3343_s25 + $0x70] sm:$0x3]  ;;  %v3420_v32 = vld [vmem:[%s3343_s25 + $0x60] sm:$0xff]  ;;  %v486_v34 = vrot.slane %v3414_v30, 1  ;;  %s4561_s24 = scalar_lea.vmem %s6165_s1, %s3042_s17 }
  0x25   : > { %v3405_v25 = vsel %vm464_vm0, %v476_v18, %v478_v19  ;;  %v3410_v28 = vsel %vm464_vm0, %v475_v21, %v476_v18  ;;  %v488_v35 = vrot.slane %v3417_v31, 1  ;;  %v485_v37 = vrot.slane %v3420_v32, 1  ;;  %v3436_v38 = vld [vmem:[%s3343_s25 + $0x80] sm:$0xff]  ;;  %v3439_v39 = vld [vmem:[%s3343_s25 + $0x88] sm:$0x3]  ;;  %v3442_v40 = vld [vmem:[%s3343_s25 + $0x78] sm:$0xff] }
  0x26   : > { %v3427_v33 = vsel %vm464_vm0, %v481_v26, %v483_v27  ;;  %v3432_v36 = vsel %vm464_vm0, %v480_v29, %v481_v26  ;;  %v491_v42 = vrot.slane %v3436_v38, 1  ;;  %v493_v43 = vrot.slane %v3439_v39, 1  ;;  %v3458_v46 = vld [vmem:[%s3343_s25 + $0x98] sm:$0xff]  ;;  %v3461_v47 = vld [vmem:[%s3343_s25 + $0xa0] sm:$0x3]  ;;  %v3464_v48 = vld [vmem:[%s3343_s25 + $0x90] sm:$0xff] }
  0x27   : > { %551 = vrot.lane.b32.xlu1 %v3386_v17, %s3226_s26  ;;  %5961 = vst [vmem:[#allocation8_spill] sm:$0xff] %v3432_v36  ;;  %v3449_v41 = vsel %vm464_vm0, %v486_v34, %v488_v35  ;;  %v3454_v44 = vsel %vm464_vm0, %v485_v37, %v486_v34  ;;  %v490_v45 = vrot.slane %v3442_v40, 1  ;;  %v496_v50 = vrot.slane %v3458_v46, 1  ;;  %v3480_v54 = vld [vmem:[%s3343_s25 + $0xb0] sm:$0xff]  ;;  %v3483_v55 = vld [vmem:[%s3343_s25 + $0xb8] sm:$0x3] }
  0x28   : > { %547 = vrot.lane.b32.xlu0 %v469_v20, %s3226_s26  ;;  %5962 = vst [vmem:[#allocation9_spill] sm:$0xff] %v3449_v41  ;;  %5963 = vst [vmem:[#allocation10_spill] sm:$0xff] %v3454_v44  ;;  %v3471_v49 = vsel %vm464_vm0, %v491_v42, %v493_v43  ;;  %v498_v51 = vrot.slane %v3461_v47, 1  ;;  %v495_v53 = vrot.slane %v3464_v48, 1  ;;  %v3486_v56 = vld [vmem:[%s3343_s25 + $0xa8] sm:$0xff]  ;;  %v501_v58 = vrot.slane %v3480_v54, 1 }
  0x29   : > { %5964 = vst [vmem:[#allocation11_spill] sm:$0xff] %v3471_v49  ;;  %v3476_v52 = vsel %vm464_vm0, %v490_v45, %v491_v42  ;;  %v503_v59 = vrot.slane %v3483_v55, 1  ;;  %v500_v61 = vrot.slane %v3486_v56, 1  ;;  %v3502_v62 = vld [vmem:[%s3343_s25 + $0xc8] sm:$0xff]  ;;  %v3505_v63 = vld [vmem:[%s3343_s25 + $0xd0] sm:$0x3] }
  0x2a   : > { %5965 = vst [vmem:[#allocation12_spill] sm:$0xff] %v3476_v52  ;;  %v3493_v57 = vsel %vm464_vm0, %v496_v50, %v498_v51  ;;  %v3498_v60 = vsel %vm464_vm0, %v495_v53, %v496_v50  ;;  %v3508_v3 = vld [vmem:[%s3343_s25 + $0xc0] sm:$0xff]  ;;  %v506_v6 = vrot.slane %v3502_v62, 1  ;;  %v508_v8 = vrot.slane %v3505_v63, 1  ;;  %v3527_v18 = vld [vmem:[%s3343_s25 + $0xe8] sm:$0x3] }
  0x2b   : > { %555 = vrot.lane.b32.xlu1 %v3405_v25, %s3226_s26  ;;  %5966 = vst [vmem:[#allocation13_spill] sm:$0xff] %v3493_v57  ;;  %5967 = vst [vmem:[#allocation14_spill] sm:$0xff] %v3498_v60  ;;  %v3515_v4 = vsel %vm464_vm0, %v501_v58, %v503_v59  ;;  %v3520_v9 = vsel %vm464_vm0, %v500_v61, %v501_v58  ;;  %v505_v13 = vrot.slane %v3508_v3, 1  ;;  %v3524_v16 = vld [vmem:[%s3343_s25 + $0xe0] sm:$0xff]  ;;  %v3530_v19 = vld [vmem:[%s3343_s25 + $0xd8] sm:$0xff]  ;;  %v513_v26 = vrot.slane %v3527_v18, 1 }
  0x2c   : > { %553 = vrot.lane.b32.xlu0 %v3410_v28, %s3226_s26  ;;  %5968 = vst [vmem:[#allocation15_spill] sm:$0xff] %v3515_v4  ;;  %5969 = vst [vmem:[#allocation16_spill] sm:$0xff] %v3520_v9  ;;  %v3537_v20 = vsel %vm464_vm0, %v506_v6, %v508_v8  ;;  %v511_v21 = vrot.slane %v3524_v16, 1  ;;  %v510_v29 = vrot.slane %v3530_v19, 1  ;;  %v3546_v34 = vld [vmem:[%s3343_s25 + $0xf8] sm:$0xff]  ;;  %v3552_v37 = vld [vmem:[%s3343_s25 + $0xf0] sm:$0xff] }
  0x2d   : > { %5970 = vst [vmem:[#allocation17_spill] sm:$0xff] %v3537_v20  ;;  %v3542_v27 = vsel %vm464_vm0, %v505_v13, %v506_v6  ;;  %v3549_v35 = vld [vmem:[%s3343_s25 + $0x100] sm:$0x3]  ;;  %v516_v43 = vrot.slane %v3546_v34, 1  ;;  %v515_v51 = vrot.slane %v3552_v37, 1  ;;  %v3568_v53 = vld [vmem:[%s3343_s25 + $0x110] sm:$0xff] }
  0x2e   : > { %5971 = vst [vmem:[#allocation18_spill] sm:$0xff] %v3542_v27  ;;  %v3559_v42 = vsel %vm464_vm0, %v511_v21, %v513_v26  ;;  %v518_v45 = vrot.slane %v3549_v35, 1  ;;  %v3564_v50 = vsel %vm464_vm0, %v510_v29, %v511_v21  ;;  %v3571_v58 = vld [vmem:[%s3343_s25 + $0x118] sm:$0x3]  ;;  %v3574_v59 = vld [vmem:[%s3343_s25 + $0x108] sm:$0xff]  ;;  %v521_v6 = vrot.slane %v3568_v53, 1 }
  0x2f   : > { %559 = vrot.lane.b32.xlu1 %v3427_v33, %s3226_s26  ;;  %5972 = vst [vmem:[#allocation19_spill] sm:$0xff] %v3559_v42  ;;  %5973 = vst [vmem:[#allocation20_spill] sm:$0xff] %v3564_v50  ;;  %v523_v8 = vrot.slane %v3571_v58, 1  ;;  %v3586_v13 = vsel %vm464_vm0, %v515_v51, %v516_v43  ;;  %v520_v21 = vrot.slane %v3574_v59, 1  ;;  %v3590_v26 = vld [vmem:[%s3343_s25 + $0x128] sm:$0xff]  ;;  %s6194_s17 = smov 20  }
  0x30   : > { %557 = vrot.lane.b32.xlu0 %v3432_v36, %s3226_s26  ;;  %v3581_v61 = vsel %vm464_vm0, %v516_v43, %v518_v45  ;;  %5975 = vst [vmem:[#allocation22_spill] sm:$0xff] %v3586_v13  ;;  %v3593_v29 = vld [vmem:[%s3343_s25 + $0x130] sm:$0x3]  ;;  %v526_v43 = vrot.slane %v3590_v26, 1 }
  0x31   : > { %5974 = vst [vmem:[#allocation21_spill] sm:$0xff] %v3581_v61  ;;  %v3603_v45 = vsel %vm464_vm0, %v521_v6, %v523_v8  ;;  %v528_v51 = vrot.slane %v3593_v29, 1 }
  0x32   : > { %5976 = vst [vmem:[#allocation23_spill] sm:$0xff] %v3603_v45 }
  0x33   : > { %563 = vrot.lane.b32.xlu1 %v3449_v41, %s3226_s26  ;;  %v3625_v8 = vsel %vm464_vm0, %v526_v43, %v528_v51 }
  0x34   : > { %561 = vrot.lane.b32.xlu0 %v3454_v44, %s3226_s26  ;;  %5978 = vst [vmem:[#allocation25_spill] sm:$0xff] %v3625_v8  ;;  %v3659_v44 = vld [vmem:[%s3343_s25 + $0x178] sm:$0x3] }
  0x37   : > { %567 = vrot.lane.b32.xlu1 %v3471_v49, %s3226_s26  ;;  %v3656_v49 = vld [vmem:[%s3343_s25 + $0x170] sm:$0xff] }
  0x38   : > { %565 = vrot.lane.b32.xlu0 %v3476_v52, %s3226_s26 }
  0x3b   : > { %571 = vrot.lane.b32.xlu1 %v3493_v57, %s3226_s26 }
  0x3c   : > { %569 = vrot.lane.b32.xlu0 %v3498_v60, %s3226_s26  ;;  %v3634_v60 = vld [vmem:[%s3343_s25 + $0x158] sm:$0xff] }
  0x3f   : > { %575 = vrot.lane.b32.xlu1 %v3515_v4, %s3226_s26 }
  0x40   : > { %573 = vrot.lane.b32.xlu0 %v3520_v9, %s3226_s26 }
  0x43   : > { %579 = vrot.lane.b32.xlu1 %v3537_v20, %s3226_s26  ;;  %v3612_v20 = vld [vmem:[%s3343_s25 + $0x140] sm:$0xff] }
  0x44   : > { %577 = vrot.lane.b32.xlu0 %v3542_v27, %s3226_s26 }
  0x47   : > { %583 = vrot.lane.b32.xlu1 %v3559_v42, %s3226_s26  ;;  %v3608_v42 = vsel %vm464_vm0, %v520_v21, %v521_v6  ;;  %v531_v6 = vrot.slane %v3612_v20, 1 }
  0x48   : > { %581 = vrot.lane.b32.xlu0 %v3564_v50, %s3226_s26  ;;  %v3596_v50 = vld [vmem:[%s3343_s25 + $0x120] sm:$0xff]  ;;  %5977 = vst [vmem:[#allocation24_spill] sm:$0xff] %v3608_v42 }
  0x49   : > { %v525_v27 = vrot.slane %v3596_v50, 1 }
  0x4b   : > { %587 = vrot.lane.b32.xlu1 %v3581_v61, %s3226_s26  ;;  %v3615_v61 = vld [vmem:[%s3343_s25 + $0x148] sm:$0x3]  ;;  %v3630_v9 = vsel %vm464_vm0, %v525_v27, %v526_v43  ;;  %v536_v27 = vrot.slane %v3634_v60, 1 }
  0x4c   : > { %585 = vrot.lane.b32.xlu0 %v3586_v13, %s3226_s26  ;;  %v3618_v13 = vld [vmem:[%s3343_s25 + $0x138] sm:$0xff]  ;;  %v533_v21 = vrot.slane %v3615_v61, 1  ;;  %5979 = vst [vmem:[#allocation26_spill] sm:$0xff] %v3630_v9 }
  0x4d   : > { %v530_v4 = vrot.slane %v3618_v13, 1 }
  0x4e   : > { %v3647_v51 = vsel %vm464_vm0, %v531_v6, %v533_v21 }
  0x4f   : > { %591 = vrot.lane.b32.xlu1 %v3603_v45, %s3226_s26  ;;  %v3637_v45 = vld [vmem:[%s3343_s25 + $0x160] sm:$0x3]  ;;  %5980 = vst [vmem:[#allocation27_spill] sm:$0xff] %v3647_v51  ;;  %v3652_v57 = vsel %vm464_vm0, %v530_v4, %v531_v6  ;;  %v541_v4 = vrot.slane %v3656_v49, 1  ;;  %v543_v6 = vrot.slane %v3659_v44, 1 }
  0x50   : > { %589 = vrot.lane.b32.xlu0 %v3608_v42, %s3226_s26  ;;  %v3640_v42 = vld [vmem:[%s3343_s25 + $0x150] sm:$0xff]  ;;  %v538_v43 = vrot.slane %v3637_v45, 1  ;;  %5981 = vst [vmem:[#allocation28_spill] sm:$0xff] %v3652_v57 }
  0x51   : > { %v535_v52 = vrot.slane %v3640_v42, 1 }
  0x52   : > { %v3669_v21 = vsel %vm464_vm0, %v536_v27, %v538_v43  ;;  %v643_v43 = vrot.slane %v3357_v5, 2  ;;  %v650_v5 = vrot.slane %v3361_v7, 2  ;;  %v652_v7 = vrot.slane %v3379_v15, 2 }
  0x53   : > { %595 = vrot.lane.b32.xlu1 %v3625_v8, %s3226_s26  ;;  %v3662_v8 = vld [vmem:[%s3343_s25 + $0x168] sm:$0xff] }
  0x54   : > { %593 = vrot.lane.b32.xlu0 %v3630_v9, %s3226_s26  ;;  %v3674_v9 = vsel %vm464_vm0, %v535_v52, %v536_v27  ;;  %v540_v41 = vrot.slane %v3662_v8, 1  ;;  %v642_v52 = vrot.slane %v3352_v2, 2 }
  0x56   : > { %v3687_v36 = vsel %vm464_vm0, %v540_v41, %v541_v4  ;;  %v647_v41 = vrot.slane %v3346_v0, 2 }
  0x57   : > { %599 = vrot.lane.b32.xlu1 %v3647_v51, %s3226_s26  ;;  %v645_v51 = vrot.slane %v3366_v10, 2  ;;  %5982 = vst [vmem:[#allocation29_spill] sm:$0xff] %v3687_v36  ;;  %v644_v10 = vsel %vm641_vm1, %v642_v52, %v643_v43  ;;  %v658_v52 = vrot.slane %v3393_v22, 2 }
  0x58   : > { %597 = vrot.lane.b32.xlu0 %v3652_v57, %s3226_s26  ;;  %v3682_v57 = vsel %vm464_vm0, %v541_v4, %v543_v6  ;;  %v648_v6 = vrot.slane %v3349_v1, 2  ;;  %v653_v4 = vrot.slane %v3369_v11, 2 }
  0x59   : > { %v646_v27 = vsel %vm641_vm1, %v643_v43, %v645_v51  ;;  %v655_v51 = vrot.slane %v3376_v14, 2 }
  0x5a   : > { %v3702_v2 = vsel %vm641_vm1, %v648_v6, %v650_v5  ;;  %v3720_v14 = vsel %vm641_vm1, %v652_v7, %v653_v4  ;;  %v668_v7 = vrot.slane %v3436_v38, 2 }
  0x5b   : > { %603 = vrot.lane.b32.xlu1 %v3669_v21, %s3226_s26  ;;  %v3715_v43 = vsel %vm641_vm1, %v653_v4, %v655_v51  ;;  %v662_v4 = vrot.slane %v3420_v32, 2 }
  0x5c   : > { %601 = vrot.lane.b32.xlu0 %v3674_v9, %s3226_s26 }
  0x5f   : > { %607 = vrot.lane.b32.xlu1 %v3682_v57, %s3226_s26 }
  0x60   : > { %605 = vrot.lane.b32.xlu0 %v3687_v36, %s3226_s26  ;;  %v3707_v36 = vsel %vm641_vm1, %v647_v41, %v648_v6  ;;  %v657_v6 = vrot.slane %v3399_v24, 2  ;;  %v665_v41 = vrot.slane %v3417_v31, 2 }
  0x63   : > { %724 = vrot.lane.b32.xlu1 %v646_v27, %s5954_s27  ;;  %v660_v27 = vrot.slane %v3396_v23, 2  ;;  %v3733_v23 = vsel %vm641_vm1, %v657_v6, %v658_v52 }
  0x64   : > { %722 = vrot.lane.b32.xlu0 %v644_v10, %s5954_s27  ;;  %v663_v10 = vrot.slane %v3414_v30, 2  ;;  %5983 = vst [vmem:[#allocation30_spill] sm:$0xff] %v3733_v23 }
  0x65   : > { %v3728_v5 = vsel %vm641_vm1, %v658_v52, %v660_v27  ;;  %v670_v27 = vrot.slane %v3439_v39, 2  ;;  %v667_v52 = vrot.slane %v3442_v40, 2 }
  0x66   : > { %v3741_v51 = vsel %vm641_vm1, %v663_v10, %v665_v41  ;;  %v3746_v31 = vsel %vm641_vm1, %v662_v4, %v663_v10  ;;  %v673_v41 = vrot.slane %v3458_v46, 2  ;;  %v672_v10 = vrot.slane %v3464_v48, 2 }
  0x67   : > { %728 = vrot.lane.b32.xlu1 %v3702_v2, %s5954_s27  ;;  %5984 = vst [vmem:[#allocation31_spill] sm:$0xff] %v3746_v31  ;;  %v3754_v6 = vsel %vm641_vm1, %v668_v7, %v670_v27  ;;  %v3759_v39 = vsel %vm641_vm1, %v667_v52, %v668_v7  ;;  %v678_v27 = vrot.slane %v3480_v54, 2  ;;  %v677_v7 = vrot.slane %v3486_v56, 2 }
  0x68   : > { %726 = vrot.lane.b32.xlu0 %v3707_v36, %s5954_s27  ;;  %5985 = vst [vmem:[#allocation32_spill] sm:$0xff] %v3759_v39 }
  0x6b   : > { %732 = vrot.lane.b32.xlu1 %v3715_v43, %s5954_s27 }
  0x6c   : > { %730 = vrot.lane.b32.xlu0 %v3720_v14, %s5954_s27 }
  0x6f   : > { %736 = vrot.lane.b32.xlu1 %v3728_v5, %s5954_s27 }
  0x70   : > { %734 = vrot.lane.b32.xlu0 %v3733_v23, %s5954_s27  ;;  %v675_v23 = vrot.slane %v3461_v47, 2  ;;  %v3772_v47 = vsel %vm641_vm1, %v672_v10, %v673_v41 }
  0x71   : > { %5987 = vst [vmem:[#allocation34_spill] sm:$0xff] %v3772_v47 }
  0x72   : > { %v3767_v4 = vsel %vm641_vm1, %v673_v41, %v675_v23  ;;  %v683_v23 = vrot.slane %v3502_v62, 2  ;;  %v682_v41 = vrot.slane %v3508_v3, 2 }
  0x73   : > { %740 = vrot.lane.b32.xlu1 %v3741_v51, %s5954_s27  ;;  %5986 = vst [vmem:[#allocation33_spill] sm:$0xff] %v3767_v4 }
  0x74   : > { %738 = vrot.lane.b32.xlu0 %v3746_v31, %s5954_s27  ;;  %v680_v31 = vrot.slane %v3483_v55, 2  ;;  %v3785_v55 = vsel %vm641_vm1, %v677_v7, %v678_v27 }
  0x75   : > { %5989 = vst [vmem:[#allocation36_spill] sm:$0xff] %v3785_v55 }
  0x76   : > { %v3780_v52 = vsel %vm641_vm1, %v678_v27, %v680_v31  ;;  %v688_v31 = vrot.slane %v3524_v16, 2  ;;  %v687_v27 = vrot.slane %v3530_v19, 2 }
  0x77   : > { %744 = vrot.lane.b32.xlu1 %v3754_v6, %s5954_s27  ;;  %5988 = vst [vmem:[#allocation35_spill] sm:$0xff] %v3780_v52 }
  0x78   : > { %742 = vrot.lane.b32.xlu0 %v3759_v39, %s5954_s27  ;;  %v685_v39 = vrot.slane %v3505_v63, 2  ;;  %v3798_v63 = vsel %vm641_vm1, %v682_v41, %v683_v23 }
  0x79   : > { %5991 = vst [vmem:[#allocation38_spill] sm:$0xff] %v3798_v63 }
  0x7a   : > { %v3793_v10 = vsel %vm641_vm1, %v683_v23, %v685_v39  ;;  %v693_v39 = vrot.slane %v3546_v34, 2  ;;  %v692_v23 = vrot.slane %v3552_v37, 2 }
  0x7b   : > { %748 = vrot.lane.b32.xlu1 %v3767_v4, %s5954_s27  ;;  %5990 = vst [vmem:[#allocation37_spill] sm:$0xff] %v3793_v10 }
  0x7c   : > { %746 = vrot.lane.b32.xlu0 %v3772_v47, %s5954_s27  ;;  %v690_v47 = vrot.slane %v3527_v18, 2  ;;  %v3811_v18 = vsel %vm641_vm1, %v687_v27, %v688_v31 }
  0x7d   : > { %5993 = vst [vmem:[#allocation40_spill] sm:$0xff] %v3811_v18 }
  0x7e   : > { %v3806_v7 = vsel %vm641_vm1, %v688_v31, %v690_v47  ;;  %v698_v47 = vrot.slane %v3568_v53, 2  ;;  %v697_v31 = vrot.slane %v3574_v59, 2 }
  0x7f   : > { %752 = vrot.lane.b32.xlu1 %v3780_v52, %s5954_s27  ;;  %5992 = vst [vmem:[#allocation39_spill] sm:$0xff] %v3806_v7 }
  0x80   : > { %750 = vrot.lane.b32.xlu0 %v3785_v55, %s5954_s27  ;;  %v695_v55 = vrot.slane %v3549_v35, 2  ;;  %v3824_v35 = vsel %vm641_vm1, %v692_v23, %v693_v39 }
  0x81   : > { %5995 = vst [vmem:[#allocation42_spill] sm:$0xff] %v3824_v35 }
  0x82   : > { %v3819_v41 = vsel %vm641_vm1, %v693_v39, %v695_v55  ;;  %v703_v55 = vrot.slane %v3590_v26, 2  ;;  %v702_v39 = vrot.slane %v3596_v50, 2 }
  0x83   : > { %756 = vrot.lane.b32.xlu1 %v3793_v10, %s5954_s27  ;;  %5994 = vst [vmem:[#allocation41_spill] sm:$0xff] %v3819_v41 }
  0x84   : > { %754 = vrot.lane.b32.xlu0 %v3798_v63, %s5954_s27  ;;  %v700_v63 = vrot.slane %v3571_v58, 2  ;;  %v3837_v58 = vsel %vm641_vm1, %v697_v31, %v698_v47 }
  0x85   : > { %5997 = vst [vmem:[#allocation44_spill] sm:$0xff] %v3837_v58 }
  0x86   : > { %v3832_v27 = vsel %vm641_vm1, %v698_v47, %v700_v63  ;;  %v708_v63 = vrot.slane %v3612_v20, 2  ;;  %v707_v47 = vrot.slane %v3618_v13, 2 }
  0x87   : > { %760 = vrot.lane.b32.xlu1 %v3806_v7, %s5954_s27  ;;  %5996 = vst [vmem:[#allocation43_spill] sm:$0xff] %v3832_v27 }
  0x88   : > { %758 = vrot.lane.b32.xlu0 %v3811_v18, %s5954_s27  ;;  %v705_v18 = vrot.slane %v3593_v29, 2  ;;  %v3850_v29 = vsel %vm641_vm1, %v702_v39, %v703_v55 }
  0x89   : > { %5998 = vst [vmem:[#allocation45_spill] sm:$0xff] %v3850_v29 }
  0x8a   : > { %v3845_v23 = vsel %vm641_vm1, %v703_v55, %v705_v18  ;;  %v713_v18 = vrot.slane %v3634_v60, 2  ;;  %v712_v55 = vrot.slane %v3640_v42, 2 }
  0x8b   : > { %764 = vrot.lane.b32.xlu1 %v3819_v41, %s5954_s27 }
  0x8c   : > { %762 = vrot.lane.b32.xlu0 %v3824_v35, %s5954_s27  ;;  %v710_v35 = vrot.slane %v3615_v61, 2  ;;  %v3865_v61 = vsel %vm641_vm1, %v707_v47, %v708_v63  ;;  %v717_v47 = vrot.slane %v3662_v8, 2 }
  0x8d   : > { %6000 = vst [vmem:[#allocation47_spill] sm:$0xff] %v3865_v61 }
  0x8e   : > { %v3858_v31 = vsel %vm641_vm1, %v708_v63, %v710_v35  ;;  %v3882_v63 = vsel %vm641_vm1, %v712_v55, %v713_v18 }
  0x8f   : > { %768 = vrot.lane.b32.xlu1 %v3832_v27, %s5954_s27 }
  0x90   : > { %766 = vrot.lane.b32.xlu0 %v3837_v58, %s5954_s27  ;;  %v715_v58 = vrot.slane %v3637_v45, 2  ;;  %v718_v45 = vrot.slane %v3656_v49, 2 }
  0x92   : > { %v3875_v35 = vsel %vm641_vm1, %v713_v18, %v715_v58 }
  0x93   : > { %772 = vrot.lane.b32.xlu1 %v3845_v23, %s5954_s27 }
  0x94   : > { %770 = vrot.lane.b32.xlu0 %v3850_v29, %s5954_s27 }
  0x95   : > { %v3862_v27 = vpop.permute.xlu1 %549 }
  0x96   : > { %5999 = vst [vmem:[#allocation46_spill] sm:$0xff] %v3862_v27  ;;  %v3868_v39 = vpop.permute.xlu0 %545  ;;  %v720_v27 = vrot.slane %v3659_v44, 2  ;;  %v3897_v44 = vsel %vm641_vm1, %v717_v47, %v718_v45 }
  0x97   : > { %6001 = vst [vmem:[#allocation48_spill] sm:$0xff] %v3868_v39  ;;  %776 = vrot.lane.b32.xlu1 %v3858_v31, %s5954_s27 }
  0x98   : > { %774 = vrot.lane.b32.xlu0 %v3865_v61, %s5954_s27  ;;  %v3892_v58 = vsel %vm641_vm1, %v718_v45, %v720_v27 }
  0x99   : > { %v3879_v29 = vpop.permute.xlu1 %551 }
  0x9a   : > { %6002 = vst [vmem:[#allocation49_spill] sm:$0xff] %v3879_v29  ;;  %v3885_v39 = vpop.permute.xlu0 %547 }
  0x9b   : > { %6003 = vst [vmem:[#allocation50_spill] sm:$0xff] %v3885_v39  ;;  %780 = vrot.lane.b32.xlu1 %v3875_v35, %s5954_s27 }
  0x9c   : > { %778 = vrot.lane.b32.xlu0 %v3882_v63, %s5954_s27 }
  0x9d   : > { %v3894_v61 = vpop.permute.xlu1 %555 }
  0x9e   : > { %6004 = vst [vmem:[#allocation51_spill] sm:$0xff] %v3894_v61  ;;  %v3899_v18 = vpop.permute.xlu0 %553 }
  0x9f   : > { %6005 = vst [vmem:[#allocation52_spill] sm:$0xff] %v3899_v18  ;;  %784 = vrot.lane.b32.xlu1 %v3892_v58, %s5954_s27 }
  0xa0   : > { %782 = vrot.lane.b32.xlu0 %v3897_v44, %s5954_s27 }
  0xa1   : > { %v3905_v55 = vpop.permute.xlu1 %559 }
  0xa2   : > { %6006 = vst [vmem:[#allocation53_spill] sm:$0xff] %v3905_v55  ;;  %v3907_v29 = vpop.permute.xlu0 %557 }
  0xa3   : > { %6007 = vst [vmem:[#allocation54_spill] sm:$0xff] %v3907_v29  ;;  %822 = vrot.lane.b32.xlu1 %v3349_v1, %s3228_s28 }
  0xa4   : > { %820 = vrot.lane.b32.xlu0 %v3346_v0, %s3228_s28 }
  0xa5   : > { %v3913_v27 = vpop.permute.xlu1 %563 }
  0xa6   : > { %6008 = vst [vmem:[#allocation55_spill] sm:$0xff] %v3913_v27  ;;  %v3915_v45 = vpop.permute.xlu0 %561 }
  0xa7   : > { %6009 = vst [vmem:[#allocation56_spill] sm:$0xff] %v3915_v45  ;;  %826 = vrot.lane.b32.xlu1 %v3369_v11, %s3228_s28  ;;  %v4031_v45 = vld [vmem:[%s3343_s25 + $0x180] sm:$0xff] }
  0xa8   : > { %824 = vrot.lane.b32.xlu0 %v3379_v15, %s3228_s28 }
  0xa9   : > { %v3921_v47 = vpop.permute.xlu1 %567 }
  0xaa   : > { %6010 = vst [vmem:[#allocation57_spill] sm:$0xff] %v3921_v47  ;;  %v3923_v55 = vpop.permute.xlu0 %565 }
  0xab   : > { %6011 = vst [vmem:[#allocation58_spill] sm:$0xff] %v3923_v55  ;;  %830 = vrot.lane.b32.xlu1 %v3393_v22, %s3228_s28 }
  0xac   : > { %828 = vrot.lane.b32.xlu0 %v3399_v24, %s3228_s28 }
  0xad   : > { %v3929_v0 = vpop.permute.xlu1 %571 }
  0xae   : > { %6012 = vst [vmem:[#allocation59_spill] sm:$0xff] %v3929_v0  ;;  %v3931_v1 = vpop.permute.xlu0 %569 }
  0xaf   : > { %6013 = vst [vmem:[#allocation60_spill] sm:$0xff] %v3931_v1  ;;  %834 = vrot.lane.b32.xlu1 %v3414_v30, %s3228_s28 }
  0xb0   : > { %832 = vrot.lane.b32.xlu0 %v3420_v32, %s3228_s28 }
  0xb1   : > { %v3937_v27 = vpop.permute.xlu1 %575 }
  0xb2   : > { %6014 = vst [vmem:[#allocation61_spill] sm:$0xff] %v3937_v27  ;;  %v3939_v47 = vpop.permute.xlu0 %573 }
  0xb3   : > { %6015 = vst [vmem:[#allocation62_spill] sm:$0xff] %v3939_v47  ;;  %838 = vrot.lane.b32.xlu1 %v3436_v38, %s3228_s28 }
  0xb4   : > { %836 = vrot.lane.b32.xlu0 %v3442_v40, %s3228_s28 }
  0xb5   : > { %v3945_v55 = vpop.permute.xlu1 %579 }
  0xb6   : > { %6016 = vst [vmem:[#allocation63_spill] sm:$0xff] %v3945_v55  ;;  %v3947_v0 = vpop.permute.xlu0 %577 }
  0xb7   : > { %6017 = vst [vmem:[#allocation64_spill] sm:$0xff] %v3947_v0  ;;  %842 = vrot.lane.b32.xlu1 %v3458_v46, %s3228_s28 }
  0xb8   : > { %840 = vrot.lane.b32.xlu0 %v3464_v48, %s3228_s28 }
  0xb9   : > { %v3953_v1 = vpop.permute.xlu1 %583 }
  0xba   : > { %6018 = vst [vmem:[#allocation65_spill] sm:$0xff] %v3953_v1  ;;  %v3955_v27 = vpop.permute.xlu0 %581 }
  0xbb   : > { %6019 = vst [vmem:[#allocation66_spill] sm:$0xff] %v3955_v27  ;;  %846 = vrot.lane.b32.xlu1 %v3480_v54, %s3228_s28 }
  0xbc   : > { %844 = vrot.lane.b32.xlu0 %v3486_v56, %s3228_s28 }
  0xbd   : > { %v3961_v47 = vpop.permute.xlu1 %587 }
  0xbe   : > { %6020 = vst [vmem:[#allocation67_spill] sm:$0xff] %v3961_v47  ;;  %v3963_v55 = vpop.permute.xlu0 %585 }
  0xbf   : > { %6021 = vst [vmem:[#allocation68_spill] sm:$0xff] %v3963_v55  ;;  %850 = vrot.lane.b32.xlu1 %v3502_v62, %s3228_s28 }
  0xc0   : > { %848 = vrot.lane.b32.xlu0 %v3508_v3, %s3228_s28 }
  0xc1   : > { %v3969_v0 = vpop.permute.xlu1 %591 }
  0xc2   : > { %6022 = vst [vmem:[#allocation69_spill] sm:$0xff] %v3969_v0  ;;  %v3971_v1 = vpop.permute.xlu0 %589  ;;  %v6060_v0 = vld [vmem:[#allocation16_spill] sm:$0xff] }
  0xc3   : > { %6023 = vst [vmem:[#allocation70_spill] sm:$0xff] %v3971_v1  ;;  %854 = vrot.lane.b32.xlu1 %v3524_v16, %s3228_s28  ;;  %v6064_v1 = vld [vmem:[#allocation18_spill] sm:$0xff] }
  0xc4   : > { %852 = vrot.lane.b32.xlu0 %v3530_v19, %s3228_s28 }
  0xc5   : > { %v3977_v54 = vpop.permute.xlu1 %595 }
  0xc6   : > { %6024 = vst [vmem:[#allocation71_spill] sm:$0xff] %v3977_v54  ;;  %v3979_v56 = vpop.permute.xlu0 %593  ;;  %v6048_v54 = vld [vmem:[#allocation10_spill] sm:$0xff] }
  0xc7   : > { %6025 = vst [vmem:[#allocation72_spill] sm:$0xff] %v3979_v56  ;;  %858 = vrot.lane.b32.xlu1 %v3546_v34, %s3228_s28  ;;  %v6056_v56 = vld [vmem:[#allocation14_spill] sm:$0xff] }
  0xc8   : > { %856 = vrot.lane.b32.xlu0 %v3552_v37, %s3228_s28 }
  0xc9   : > { %v3985_v62 = vpop.permute.xlu1 %599 }
  0xca   : > { %6026 = vst [vmem:[#allocation73_spill] sm:$0xff] %v3985_v62  ;;  %v3987_v3 = vpop.permute.xlu0 %597 }
  0xcb   : > { %6027 = vst [vmem:[#allocation74_spill] sm:$0xff] %v3987_v3  ;;  %862 = vrot.lane.b32.xlu1 %v3568_v53, %s3228_s28 }
  0xcc   : > { %860 = vrot.lane.b32.xlu0 %v3574_v59, %s3228_s28 }
  0xcd   : > { %v3993_v16 = vpop.permute.xlu1 %603 }
  0xce   : > { %6028 = vst [vmem:[#allocation75_spill] sm:$0xff] %v3993_v16  ;;  %v3995_v19 = vpop.permute.xlu0 %601 }
  0xcf   : > { %6029 = vst [vmem:[#allocation76_spill] sm:$0xff] %v3995_v19  ;;  %866 = vrot.lane.b32.xlu1 %v3590_v26, %s3228_s28 }
  0xd0   : > { %864 = vrot.lane.b32.xlu0 %v3596_v50, %s3228_s28 }
  0xd1   : > { %v4001_v34 = vpop.permute.xlu1 %607 }
  0xd2   : > { %6030 = vst [vmem:[#allocation77_spill] sm:$0xff] %v4001_v34  ;;  %v4003_v37 = vpop.permute.xlu0 %605 }
  0xd3   : > { %6031 = vst [vmem:[#allocation78_spill] sm:$0xff] %v4003_v37  ;;  %870 = vrot.lane.b32.xlu1 %v3612_v20, %s3228_s28  ;;  %v4026_v37 = vld [vmem:[%s3343_s25 + $0x188] sm:$0xff] }
  0xd4   : > { %868 = vrot.lane.b32.xlu0 %v3618_v13, %s3228_s28  ;;  %v918_v55 = vrot.slane %v4026_v37, 1 }
  0xd5   : > { %v4009_v53 = vpop.permute.xlu1 %724 }
  0xd6   : > { %6032 = vst [vmem:[#allocation79_spill] sm:$0xff] %v4009_v53  ;;  %v4011_v59 = vpop.permute.xlu0 %722 }
  0xd7   : > { %6033 = vst [vmem:[#allocation80_spill] sm:$0xff] %v4011_v59  ;;  %874 = vrot.lane.b32.xlu1 %v3634_v60, %s3228_s28  ;;  %v6068_v59 = vld [vmem:[#allocation20_spill] sm:$0xff] }
  0xd8   : > { %872 = vrot.lane.b32.xlu0 %v3640_v42, %s3228_s28 }
  0xd9   : > { %v4017_v27 = vpop.permute.xlu1 %728 }
  0xda   : > { %6034 = vst [vmem:[#allocation81_spill] sm:$0xff] %v4017_v27  ;;  %v4019_v34 = vpop.permute.xlu0 %726 }
  0xdb   : > { %6035 = vst [vmem:[#allocation82_spill] sm:$0xff] %v4019_v34  ;;  %878 = vrot.lane.b32.xlu1 %v3656_v49, %s3228_s28 }
  0xdc   : > { %876 = vrot.lane.b32.xlu0 %v3662_v8, %s3228_s28 }
  0xdd   : > { %v4028_v16 = vpop.permute.xlu1 %732 }
  0xde   : > { %6036 = vst [vmem:[#allocation83_spill] sm:$0xff] %v4028_v16  ;;  %v4033_v19 = vpop.permute.xlu0 %730 }
  0xdf   : > { %6037 = vst [vmem:[#allocation84_spill] sm:$0xff] %v4033_v19  ;;  %882 = vrot.lane.b32.xlu1 %v4026_v37, %s3228_s28  ;;  %v6052_v19 = vld [vmem:[#allocation12_spill] sm:$0xff] }
  0xe0   : > { %880 = vrot.lane.b32.xlu0 %v4031_v45, %s3228_s28 }
  0xe1   : > { %v4039_v62 = vpop.permute.xlu1 %736 }
  0xe2   : > { %6038 = vst [vmem:[#allocation85_spill] sm:$0xff] %v4039_v62  ;;  %v4041_v3 = vpop.permute.xlu0 %734 }
  0xe3   : > { %6039 = vst [vmem:[#allocation86_spill] sm:$0xff] %v4041_v3  ;;  %924 = vrot.lane.b32.xlu1 %v3386_v17, %s5950_s29  ;;  %v6044_v17 = vld [vmem:[#allocation8_spill] sm:$0xff] }
  0xe4   : > { %922 = vrot.lane.b32.xlu0 %v3372_v12, %s5950_s29 }
  0xe5   : > { %v4047_v29 = vpop.permute.xlu1 %740 }
  0xe6   : > { %6040 = vst [vmem:[#allocation87_spill] sm:$0xff] %v4047_v29  ;;  %v4049_v16 = vpop.permute.xlu0 %738 }
  0xe7   : > { %6041 = vst [vmem:[#allocation88_spill] sm:$0xff] %v4049_v16  ;;  %928 = vrot.lane.b32.xlu1 %v3405_v25, %s5950_s29  ;;  %v6047_v16 = vld [vmem:[#allocation9_spill] sm:$0xff] }
  0xe8   : > { %926 = vrot.lane.b32.xlu0 %v3410_v28, %s5950_s29 }
  0xe9   : > { %v4055_v62 = vpop.permute.xlu1 %744 }
  0xea   : > { %6042 = vst [vmem:[#allocation89_spill] sm:$0xff] %v4055_v62  ;;  %v4057_v3 = vpop.permute.xlu0 %742 }
  0xeb   : > { %6043 = vst [vmem:[#allocation90_spill] sm:$0xff] %v4057_v3  ;;  %932 = vrot.lane.b32.xlu1 %v3427_v33, %s5950_s29  ;;  %v6051_v3 = vld [vmem:[#allocation11_spill] sm:$0xff] }
  0xec   : > { %930 = vrot.lane.b32.xlu0 %v6044_v17, %s5950_s29 }
  0xed   : > { %v4063_v12 = vpop.permute.xlu1 %748 }
  0xee   : > { %6045 = vst [vmem:[#allocation8_spill] sm:$0xff] %v4063_v12  ;;  %v4065_v29 = vpop.permute.xlu0 %746 }
  0xef   : > { %6046 = vst [vmem:[#allocation91_spill] sm:$0xff] %v4065_v29  ;;  %936 = vrot.lane.b32.xlu1 %v6047_v16, %s5950_s29  ;;  %v6055_v29 = vld [vmem:[#allocation13_spill] sm:$0xff] }
  0xf0   : > { %934 = vrot.lane.b32.xlu0 %v6048_v54, %s5950_s29 }
  0xf1   : > { %v4071_v61 = vpop.permute.xlu1 %752 }
  0xf2   : > { %6049 = vst [vmem:[#allocation9_spill] sm:$0xff] %v4071_v61  ;;  %v4073_v62 = vpop.permute.xlu0 %750 }
  0xf3   : > { %6050 = vst [vmem:[#allocation10_spill] sm:$0xff] %v4073_v62  ;;  %940 = vrot.lane.b32.xlu1 %v6051_v3, %s5950_s29  ;;  %v6059_v62 = vld [vmem:[#allocation15_spill] sm:$0xff] }
  0xf4   : > { %938 = vrot.lane.b32.xlu0 %v6052_v19, %s5950_s29 }
  0xf5   : > { %v4079_v18 = vpop.permute.xlu1 %756 }
  0xf6   : > { %6053 = vst [vmem:[#allocation11_spill] sm:$0xff] %v4079_v18  ;;  %v4081_v12 = vpop.permute.xlu0 %754 }
  0xf7   : > { %6054 = vst [vmem:[#allocation12_spill] sm:$0xff] %v4081_v12  ;;  %944 = vrot.lane.b32.xlu1 %v6055_v29, %s5950_s29  ;;  %v6063_v12 = vld [vmem:[#allocation17_spill] sm:$0xff] }
  0xf8   : > { %942 = vrot.lane.b32.xlu0 %v6056_v56, %s5950_s29 }
  0xf9   : > { %v4087_v27 = vpop.permute.xlu1 %760 }
  0xfa   : > { %6057 = vst [vmem:[#allocation92_spill] sm:$0xff] %v4087_v27  ;;  %v4089_v61 = vpop.permute.xlu0 %758 }
  0xfb   : > { %6058 = vst [vmem:[#allocation93_spill] sm:$0xff] %v4089_v61  ;;  %948 = vrot.lane.b32.xlu1 %v6059_v62, %s5950_s29  ;;  %v6067_v61 = vld [vmem:[#allocation19_spill] sm:$0xff] }
  0xfc   : > { %946 = vrot.lane.b32.xlu0 %v6060_v0, %s5950_s29 }
  0xfd   : > { %v4095_v34 = vpop.permute.xlu1 %764 }
  0xfe   : > { %6061 = vst [vmem:[#allocation94_spill] sm:$0xff] %v4095_v34  ;;  %v4097_v18 = vpop.permute.xlu0 %762 }
  0xff   : > { %6062 = vst [vmem:[#allocation95_spill] sm:$0xff] %v4097_v18  ;;  %952 = vrot.lane.b32.xlu1 %v6063_v12, %s5950_s29  ;;  %v6071_v18 = vld [vmem:[#allocation21_spill] sm:$0xff]  ;;  %v6072_v12 = vld [vmem:[#allocation22_spill] sm:$0xff] }
 0x100   : > { %950 = vrot.lane.b32.xlu0 %v6064_v1, %s5950_s29 }
 0x101   : > { %v4103_v53 = vpop.permute.xlu1 %768 }
 0x102   : > { %6065 = vst [vmem:[#allocation96_spill] sm:$0xff] %v4103_v53  ;;  %v4105_v27 = vpop.permute.xlu0 %766 }
 0x103   : > { %6066 = vst [vmem:[#allocation97_spill] sm:$0xff] %v4105_v27  ;;  %956 = vrot.lane.b32.xlu1 %v6067_v61, %s5950_s29  ;;  %v6075_v61 = vld [vmem:[#allocation23_spill] sm:$0xff]  ;;  %v6079_v27 = vld [vmem:[#allocation25_spill] sm:$0xff] }
 0x104   : > { %954 = vrot.lane.b32.xlu0 %v6068_v59, %s5950_s29  ;;  %v6076_v59 = vld [vmem:[#allocation24_spill] sm:$0xff] }
 0x105   : > { %v4111_v62 = vpop.permute.xlu1 %772 }
 0x106   : > { %6069 = vst [vmem:[#allocation98_spill] sm:$0xff] %v4111_v62  ;;  %v4113_v34 = vpop.permute.xlu0 %770 }
 0x107   : > { %6070 = vst [vmem:[#allocation99_spill] sm:$0xff] %v4113_v34  ;;  %960 = vrot.lane.b32.xlu1 %v6071_v18, %s5950_s29  ;;  %v6080_v18 = vld [vmem:[#allocation26_spill] sm:$0xff] }
 0x108   : > { %958 = vrot.lane.b32.xlu0 %v6072_v12, %s5950_s29 }
 0x109   : > { %v4119_v1 = vpop.permute.xlu1 %776 }
 0x10a   : > { %6073 = vst [vmem:[#allocation100_spill] sm:$0xff] %v4119_v1  ;;  %v4121_v53 = vpop.permute.xlu0 %774 }
 0x10b   : > { %6074 = vst [vmem:[#allocation101_spill] sm:$0xff] %v4121_v53  ;;  %964 = vrot.lane.b32.xlu1 %v6075_v61, %s5950_s29  ;;  %v6083_v53 = vld [vmem:[#allocation27_spill] sm:$0xff]  ;;  %v6084_v61 = vld [vmem:[#allocation28_spill] sm:$0xff] }
 0x10c   : > { %962 = vrot.lane.b32.xlu0 %v6076_v59, %s5950_s29 }
 0x10d   : > { %v4127_v62 = vpop.permute.xlu1 %780 }
 0x10e   : > { %6077 = vst [vmem:[#allocation102_spill] sm:$0xff] %v4127_v62  ;;  %v4129_v34 = vpop.permute.xlu0 %778  ;;  %v4146_v62 = vld [vmem:[%s3343_s25 + $0x190] sm:$0x3] }
 0x10f   : > { %6078 = vst [vmem:[#allocation103_spill] sm:$0xff] %v4129_v34  ;;  %968 = vrot.lane.b32.xlu1 %v6079_v27, %s5950_s29 }
 0x110   : > { %966 = vrot.lane.b32.xlu0 %v6080_v18, %s5950_s29 }
 0x111   : > { %v4135_v12 = vpop.permute.xlu1 %784 }
 0x112   : > { %6081 = vst [vmem:[#allocation25_spill] sm:$0xff] %v4135_v12  ;;  %v4137_v1 = vpop.permute.xlu0 %782  ;;  %v920_v12 = vrot.slane %v4146_v62, 1 }
 0x113   : > { %6082 = vst [vmem:[#allocation26_spill] sm:$0xff] %v4137_v1  ;;  %972 = vrot.lane.b32.xlu1 %v6083_v53, %s5950_s29  ;;  %v917_v1 = vrot.slane %v4031_v45, 1 }
 0x114   : > { %970 = vrot.lane.b32.xlu0 %v6084_v61, %s5950_s29 }
 0x115   : > { %v4143_v59 = vpop.permute.xlu1 %822  ;;  %v4171_v29 = vsel %vm464_vm0, %v917_v1, %v918_v55 }
 0x116   : > { %6085 = vst [vmem:[#allocation27_spill] sm:$0xff] %v4143_v59  ;;  %v4148_v34 = vpop.permute.xlu0 %820  ;;  %v6089_v59 = vld [vmem:[#allocation29_spill] sm:$0xff] }
 0x117   : > { %6086 = vst [vmem:[#allocation28_spill] sm:$0xff] %v4148_v34  ;;  %976 = vrot.lane.b32.xlu1 %v3669_v21, %s5950_s29  ;;  %v4166_v34 = vsel %vm464_vm0, %v918_v55, %v920_v12 }
 0x118   : > { %974 = vrot.lane.b32.xlu0 %v3674_v9, %s5950_s29  ;;  %6090 = vst [vmem:[#allocation29_spill] sm:$0xff] %v4166_v34 }
 0x119   : > { %v4157_v47 = vpop.permute.xlu1 %826 }
 0x11a   : > { %6087 = vst [vmem:[#allocation104_spill] sm:$0xff] %v4157_v47  ;;  %v4159_v39 = vpop.permute.xlu0 %824 }
 0x11b   : > { %6088 = vst [vmem:[#allocation105_spill] sm:$0xff] %v4159_v39  ;;  %980 = vrot.lane.b32.xlu1 %v3682_v57, %s5950_s29 }
 0x11c   : > { %978 = vrot.lane.b32.xlu0 %v6089_v59, %s5950_s29 }
 0x11d   : > { %v4168_v0 = vpop.permute.xlu1 %830 }
 0x11e   : > { %6091 = vst [vmem:[#allocation106_spill] sm:$0xff] %v4168_v0  ;;  %v4173_v56 = vpop.permute.xlu0 %828 }
 0x11f   : > { %6092 = vst [vmem:[#allocation107_spill] sm:$0xff] %v4173_v56  ;;  %984 = vrot.lane.b32.xlu1 %v4166_v34, %s5950_s29 }
 0x120   : > { %982 = vrot.lane.b32.xlu0 %v4171_v29, %s5950_s29  ;;  %s3232_s29 = smov 28  }
 0x121   : > { %v4179_v47 = vpop.permute.xlu1 %834 }
 0x122   : > { %6093 = vst [vmem:[#allocation108_spill] sm:$0xff] %v4179_v47  ;;  %v4181_v39 = vpop.permute.xlu0 %832 }
 0x123   : > { %6094 = vst [vmem:[#allocation109_spill] sm:$0xff] %v4181_v39  ;;  %1025 = vrot.lane.b32.xlu1 %v3702_v2, %s5948_s14  ;;  %v6099_v2 = vld [vmem:[#allocation30_spill] sm:$0xff] }
 0x124   : > { %1023 = vrot.lane.b32.xlu0 %v3707_v36, %s5948_s14 }
 0x125   : > { %v4187_v55 = vpop.permute.xlu1 %838 }
 0x126   : > { %6095 = vst [vmem:[#allocation110_spill] sm:$0xff] %v4187_v55  ;;  %v4189_v1 = vpop.permute.xlu0 %836 }
 0x127   : > { %6096 = vst [vmem:[#allocation111_spill] sm:$0xff] %v4189_v1  ;;  %1029 = vrot.lane.b32.xlu1 %v3715_v43, %s5948_s14  ;;  %v6102_v1 = vld [vmem:[#allocation31_spill] sm:$0xff] }
 0x128   : > { %1027 = vrot.lane.b32.xlu0 %v3720_v14, %s5948_s14 }
 0x129   : > { %v4195_v12 = vpop.permute.xlu1 %842 }
 0x12a   : > { %6097 = vst [vmem:[#allocation112_spill] sm:$0xff] %v4195_v12  ;;  %v4197_v47 = vpop.permute.xlu0 %840 }
 0x12b   : > { %6098 = vst [vmem:[#allocation113_spill] sm:$0xff] %v4197_v47  ;;  %1033 = vrot.lane.b32.xlu1 %v3728_v5, %s5948_s14  ;;  %v6105_v47 = vld [vmem:[#allocation32_spill] sm:$0xff] }
 0x12c   : > { %1031 = vrot.lane.b32.xlu0 %v6099_v2, %s5948_s14 }
 0x12d   : > { %v4203_v36 = vpop.permute.xlu1 %846 }
 0x12e   : > { %6100 = vst [vmem:[#allocation30_spill] sm:$0xff] %v4203_v36  ;;  %v4205_v55 = vpop.permute.xlu0 %844 }
 0x12f   : > { %6101 = vst [vmem:[#allocation114_spill] sm:$0xff] %v4205_v55  ;;  %1037 = vrot.lane.b32.xlu1 %v3741_v51, %s5948_s14  ;;  %v6108_v55 = vld [vmem:[#allocation34_spill] sm:$0xff] }
 0x130   : > { %1035 = vrot.lane.b32.xlu0 %v6102_v1, %s5948_s14 }
 0x131   : > { %v4211_v39 = vpop.permute.xlu1 %850 }
 0x132   : > { %6103 = vst [vmem:[#allocation31_spill] sm:$0xff] %v4211_v39  ;;  %v4213_v12 = vpop.permute.xlu0 %848 }
 0x133   : > { %6104 = vst [vmem:[#allocation115_spill] sm:$0xff] %v4213_v12  ;;  %1041 = vrot.lane.b32.xlu1 %v3754_v6, %s5948_s14  ;;  %v6111_v12 = vld [vmem:[#allocation36_spill] sm:$0xff] }
 0x134   : > { %1039 = vrot.lane.b32.xlu0 %v6105_v47, %s5948_s14 }
 0x135   : > { %v4219_v0 = vpop.permute.xlu1 %854 }
 0x136   : > { %6106 = vst [vmem:[#allocation32_spill] sm:$0xff] %v4219_v0  ;;  %v4221_v36 = vpop.permute.xlu0 %852 }
 0x137   : > { %6107 = vst [vmem:[#allocation116_spill] sm:$0xff] %v4221_v36  ;;  %1045 = vrot.lane.b32.xlu1 %v3767_v4, %s5948_s14  ;;  %v6113_v36 = vld [vmem:[#allocation38_spill] sm:$0xff] }
 0x138   : > { %1043 = vrot.lane.b32.xlu0 %v6108_v55, %s5948_s14 }
 0x139   : > { %v4227_v56 = vpop.permute.xlu1 %858 }
 0x13a   : > { %6109 = vst [vmem:[#allocation34_spill] sm:$0xff] %v4227_v56  ;;  %v4229_v39 = vpop.permute.xlu0 %856 }
 0x13b   : > { %6110 = vst [vmem:[#allocation117_spill] sm:$0xff] %v4229_v39  ;;  %1049 = vrot.lane.b32.xlu1 %v3780_v52, %s5948_s14  ;;  %v6116_v39 = vld [vmem:[#allocation40_spill] sm:$0xff] }
 0x13c   : > { %1047 = vrot.lane.b32.xlu0 %v6111_v12, %s5948_s14 }
 0x13d   : > { %v4235_v34 = vpop.permute.xlu1 %862 }
 0x13e   : > { %6112 = vst [vmem:[#allocation118_spill] sm:$0xff] %v4235_v34  ;;  %v4237_v0 = vpop.permute.xlu0 %860 }
 0x13f   : > { %1053 = vrot.lane.b32.xlu1 %v3793_v10, %s5948_s14  ;;  %v6119_v10 = vld [vmem:[#allocation42_spill] sm:$0xff] }
 0x140   : > { %1051 = vrot.lane.b32.xlu0 %v6113_v36, %s5948_s14 }
 0x141   : > { %v4243_v4 = vpop.permute.xlu1 %866 }
 0x142   : > { %6114 = vst [vmem:[#allocation119_spill] sm:$0xff] %v4243_v4  ;;  %v4245_v56 = vpop.permute.xlu0 %864 }
 0x143   : > { %6115 = vst [vmem:[#allocation120_spill] sm:$0xff] %v4245_v56  ;;  %1057 = vrot.lane.b32.xlu1 %v3806_v7, %s5948_s14  ;;  %v6122_v56 = vld [vmem:[#allocation43_spill] sm:$0xff]  ;;  %v6123_v7 = vld [vmem:[#allocation44_spill] sm:$0xff] }
 0x144   : > { %1055 = vrot.lane.b32.xlu0 %v6116_v39, %s5948_s14 }
 0x145   : > { %v4251_v52 = vpop.permute.xlu1 %870 }
 0x146   : > { %6117 = vst [vmem:[#allocation121_spill] sm:$0xff] %v4251_v52  ;;  %v4253_v34 = vpop.permute.xlu0 %868 }
 0x147   : > { %6118 = vst [vmem:[#allocation122_spill] sm:$0xff] %v4253_v34  ;;  %1061 = vrot.lane.b32.xlu1 %v3819_v41, %s5948_s14  ;;  %v6126_v41 = vld [vmem:[#allocation45_spill] sm:$0xff] }
 0x148   : > { %1059 = vrot.lane.b32.xlu0 %v6119_v10, %s5948_s14 }
 0x149   : > { %v4259_v36 = vpop.permute.xlu1 %874 }
 0x14a   : > { %6120 = vst [vmem:[#allocation123_spill] sm:$0xff] %v4259_v36  ;;  %v4261_v4 = vpop.permute.xlu0 %872 }
 0x14b   : > { %6121 = vst [vmem:[#allocation124_spill] sm:$0xff] %v4261_v4  ;;  %1065 = vrot.lane.b32.xlu1 %v6122_v56, %s5948_s14  ;;  %v6129_v56 = vld [vmem:[#allocation47_spill] sm:$0xff] }
 0x14c   : > { %1063 = vrot.lane.b32.xlu0 %v6123_v7, %s5948_s14 }
 0x14d   : > { %v4267_v39 = vpop.permute.xlu1 %878 }
 0x14e   : > { %6124 = vst [vmem:[#allocation125_spill] sm:$0xff] %v4267_v39  ;;  %v4269_v52 = vpop.permute.xlu0 %876 }
 0x14f   : > { %6125 = vst [vmem:[#allocation126_spill] sm:$0xff] %v4269_v52  ;;  %1069 = vrot.lane.b32.xlu1 %v3845_v23, %s5948_s14  ;;  %v1019_v52 = vrot.slane %v4026_v37, 2 }
 0x150   : > { %1067 = vrot.lane.b32.xlu0 %v6126_v41, %s5948_s14 }
 0x151   : > { %v4275_v10 = vpop.permute.xlu1 %882 }
 0x152   : > { %6127 = vst [vmem:[#allocation45_spill] sm:$0xff] %v4275_v10  ;;  %v4277_v36 = vpop.permute.xlu0 %880  ;;  %v1021_v10 = vrot.slane %v4146_v62, 2 }
 0x153   : > { %6128 = vst [vmem:[#allocation127_spill] sm:$0xff] %v4277_v36  ;;  %1073 = vrot.lane.b32.xlu1 %v3858_v31, %s5948_s14  ;;  %v1018_v36 = vrot.slane %v4031_v45, 2 }
 0x154   : > { %1071 = vrot.lane.b32.xlu0 %v6129_v56, %s5948_s14 }
 0x155   : > { %v4283_v7 = vpop.permute.xlu1 %924 }
 0x156   : > { %6130 = vst [vmem:[#allocation47_spill] sm:$0xff] %v4283_v7  ;;  %v4285_v39 = vpop.permute.xlu0 %922  ;;  %v4303_v7 = vsel %vm641_vm1, %v1019_v52, %v1021_v10 }
 0x157   : > { %6131 = vst [vmem:[#allocation128_spill] sm:$0xff] %v4285_v39  ;;  %1077 = vrot.lane.b32.xlu1 %v3875_v35, %s5948_s14  ;;  %v4308_v39 = vsel %vm641_vm1, %v1018_v36, %v1019_v52 }
 0x158   : > { %1075 = vrot.lane.b32.xlu0 %v3882_v63, %s5948_s14 }
 0x159   : > { %v4294_v4 = vpop.permute.xlu1 %928 }
 0x15a   : > { %6132 = vst [vmem:[#allocation129_spill] sm:$0xff] %v4294_v4  ;;  %v4296_v34 = vpop.permute.xlu0 %926 }
 0x15b   : > { %6133 = vst [vmem:[#allocation130_spill] sm:$0xff] %v4296_v34  ;;  %1081 = vrot.lane.b32.xlu1 %v3892_v58, %s5948_s14 }
 0x15c   : > { %1079 = vrot.lane.b32.xlu0 %v3897_v44, %s5948_s14 }
 0x15d   : > { %v4305_v12 = vpop.permute.xlu1 %932 }
 0x15e   : > { %v4310_v62 = vpop.permute.xlu0 %930 }
 0x15f   : > { %1085 = vrot.lane.b32.xlu1 %v4303_v7, %s5948_s14 }
 0x160   : > { %1083 = vrot.lane.b32.xlu0 %v4308_v39, %s5948_s14  ;;  %s3233_s14 = smov 32  }
 0x161   : > { %v4316_v4 = vpop.permute.xlu1 %936 }
 0x162   : > { %6134 = vst [vmem:[#allocation131_spill] sm:$0xff] %v4316_v4  ;;  %v4318_v34 = vpop.permute.xlu0 %934 }
 0x163   : > { %1123 = vrot.lane.b32.xlu1 %v3369_v11, %s3231_s16 }
 0x164   : > { %1121 = vrot.lane.b32.xlu0 %v3379_v15, %s3231_s16 }
 0x165   : > { %v4324_v52 = vpop.permute.xlu1 %940 }
 0x166   : > { %6135 = vst [vmem:[#allocation132_spill] sm:$0xff] %v4324_v52  ;;  %v4326_v10 = vpop.permute.xlu0 %938  ;;  %v4654_v52 = vld [vmem:[%s3343_s25 + $0xf0] sm:$0xff] }
 0x167   : > { %1127 = vrot.lane.b32.xlu1 %v3393_v22, %s3231_s16  ;;  %v1688_v22 = vld [vmem:[%s5866_s2 + $0x20] sm:$0xf] }
 0x168   : > { %1125 = vrot.lane.b32.xlu0 %v3399_v24, %s3231_s16  ;;  %2951 = vmatprep.subr.msk.mxu0 %vm1786_vm2, %v1688_v22 }
 0x169   : > { %v4332_v36 = vpop.permute.xlu1 %944  ;;  %3031 = vmatprep.subr.msk.mxu1 %vm1786_vm2, %v1688_v22  ;;  %2952 = vmatpush3.msk.msra.mxu0 %vm1786_vm2, %v1688_v22 }
 0x16a   : > { %6136 = vst [vmem:[#allocation133_spill] sm:$0xff] %v4332_v36  ;;  %v4334_v4 = vpop.permute.xlu0 %942  ;;  %3036 = vmatpush3.msk.msra.mxu1 %vm1786_vm2, %v1688_v22  ;;  %v4635_v36 = vld [vmem:[%s3343_s25 + $0x1a8] sm:$0x3] }
 0x16b   : > { %6137 = vst [vmem:[#allocation134_spill] sm:$0xff] %v4334_v4  ;;  %1131 = vrot.lane.b32.xlu1 %v3414_v30, %s3231_s16  ;;  %v6174_v4 = vld [vmem:[#allocation50_spill] sm:$0xff] }
 0x16c   : > { %1129 = vrot.lane.b32.xlu0 %v3420_v32, %s3231_s16  ;;  %v1687_v32 = vld [vmem:[%s5866_s2 + $0x18] sm:$0xff] }
 0x16d   : > { %v4340_v11 = vpop.permute.xlu1 %948  ;;  %2953 = vmatprep.subr.mxu0 %v1687_v32  ;;  %3032 = vmatprep.subr.mxu1 %v1687_v32 }
 0x16e   : > { %6138 = vst [vmem:[#allocation135_spill] sm:$0xff] %v4340_v11  ;;  %v4342_v15 = vpop.permute.xlu0 %946  ;;  %2954 = vmatpush3.msra.mxu0 %v1687_v32  ;;  %3037 = vmatpush3.msra.mxu1 %v1687_v32  ;;  %v1684_v32 = vld [vmem:[%s5866_s2] sm:$0xff] }
 0x16f   : > { %6139 = vst [vmem:[#allocation136_spill] sm:$0xff] %v4342_v15  ;;  %1135 = vrot.lane.b32.xlu1 %v3436_v38, %s3231_s16  ;;  %v1686_v38 = vld [vmem:[%s5866_s2 + $0x10] sm:$0xff] }
 0x170   : > { %1133 = vrot.lane.b32.xlu0 %v3442_v40, %s3231_s16  ;;  %2955 = vmatprep.subr.mxu0 %v1686_v38 }
 0x171   : > { %v4351_v24 = vpop.permute.xlu1 %952  ;;  %3033 = vmatprep.subr.mxu1 %v1686_v38  ;;  %2956 = vmatpush3.msra.mxu0 %v1686_v38 }
 0x172   : > { %6140 = vst [vmem:[#allocation137_spill] sm:$0xff] %v4351_v24  ;;  %v4355_v30 = vpop.permute.xlu0 %950  ;;  %3038 = vmatpush3.msra.mxu1 %v1686_v38 }
 0x173   : > { %6141 = vst [vmem:[#allocation138_spill] sm:$0xff] %v4355_v30  ;;  %1139 = vrot.lane.b32.xlu1 %v3458_v46, %s3231_s16  ;;  %v1685_v46 = vld [vmem:[%s5866_s2 + $0x8] sm:$0xff] }
 0x174   : > { %1137 = vrot.lane.b32.xlu0 %v3464_v48, %s3231_s16  ;;  %2957 = vmatprep.subr.mxu0 %v1685_v46  ;;  %v3096_v30 = vld [vmem:[%s3343_s25 + $0xa8] sm:$0xff] }
 0x175   : > { %v4369_v40 = vpop.permute.xlu1 %956  ;;  %3034 = vmatprep.subr.mxu1 %v1685_v46  ;;  %2958 = vmatpush3.msra.mxu0 %v1685_v46 }
 0x176   : > { %6142 = vst [vmem:[#allocation139_spill] sm:$0xff] %v4369_v40  ;;  %v4371_v22 = vpop.permute.xlu0 %954  ;;  %3039 = vmatpush3.msra.mxu1 %v1685_v46  ;;  %2959 = vmatprep.subr.mxu0 %v1684_v32 }
 0x177   : > { %6143 = vst [vmem:[#allocation140_spill] sm:$0xff] %v4371_v22  ;;  %1163 = vrot.lane.b32.xlu1 %v3590_v26, %s3231_s16  ;;  %3035 = vmatprep.subr.mxu1 %v1684_v32  ;;  %v6169_v22 = vld [vmem:[#allocation33_spill] sm:$0xff] }
 0x178   : > { %1161 = vrot.lane.b32.xlu0 %v3596_v50, %s3231_s16  ;;  %2960 = vmatpush3.msra.mxu0 %v1684_v32 }
 0x179   : > { %v4380_v48 = vpop.permute.xlu1 %960  ;;  %3040 = vmatpush3.msra.mxu1 %v1684_v32 }
 0x17a   : > { %6144 = vst [vmem:[#allocation141_spill] sm:$0xff] %v4380_v48  ;;  %v4385_v40 = vpop.permute.xlu0 %958  ;;  %v2158_v48 = vld [vmem:[%s4561_s24 + $0x8] sm:$0x3] }
 0x17b   : > { %6145 = vst [vmem:[#allocation142_spill] sm:$0xff] %v4385_v40  ;;  %1263 = vrot.lane.b32.xlu1 %v6080_v18, %s3232_s29  ;;  %v2194_v40 = vrot.slane %v2158_v48, 1 }
 0x17c   : > { %1223 = vrot.lane.b32.xlu0 %v3410_v28, %s3232_s29 }
 0x17d   : > { %v4391_v50 = vpop.permute.xlu1 %964 }
 0x17e   : > { %v4393_v26 = vpop.permute.xlu0 %962 }
 0x17f   : > { %1265 = vrot.lane.b32.xlu1 %v6079_v27, %s3232_s29 }
 0x180   : > { %1225 = vrot.lane.b32.xlu0 %v3405_v25, %s3232_s29 }
 0x181   : > { %v4399_v38 = vpop.permute.xlu1 %968 }
 0x182   : > { %v4401_v18 = vpop.permute.xlu0 %966 }
 0x183   : > { %1364 = vrot.lane.b32.xlu1 %v6126_v41, %s3233_s14 }
 0x184   : > { %1324 = vrot.lane.b32.xlu0 %v3720_v14, %s3233_s14 }
 0x185   : > { %v4407_v28 = vpop.permute.xlu1 %972 }
 0x186   : > { %v4409_v46 = vpop.permute.xlu0 %970 }
 0x187   : > { %1366 = vrot.lane.b32.xlu1 %v3845_v23, %s3233_s14 }
 0x188   : > { %1326 = vrot.lane.b32.xlu0 %v3715_v43, %s3233_s14 }
 0x189   : > { %v4415_v25 = vpop.permute.xlu1 %976 }
 0x18a   : > { %v4417_v27 = vpop.permute.xlu0 %974 }
 0x18b   : > { %1167 = vrot.lane.b32.xlu1 %v3612_v20, %s3231_s16 }
 0x18c   : > { %1165 = vrot.lane.b32.xlu0 %v3618_v13, %s3231_s16 }
 0x18d   : > { %v4423_v14 = vpop.permute.xlu1 %980 }
 0x18e   : > { %6146 = vst [vmem:[#allocation143_spill] sm:$0xff] %v4423_v14  ;;  %v4425_v41 = vpop.permute.xlu0 %978  ;;  %v6178_v14 = vld [vmem:[#allocation68_spill] sm:$0xff] }
 0x18f   : > { %1267 = vrot.lane.b32.xlu1 %v6084_v61, %s3232_s29 }
 0x190   : > { %1227 = vrot.lane.b32.xlu0 %v6044_v17, %s3232_s29 }
 0x191   : > { %v4431_v43 = vpop.permute.xlu1 %984 }
 0x192   : > { %6147 = vst [vmem:[#allocation144_spill] sm:$0xff] %v4431_v43  ;;  %v4433_v23 = vpop.permute.xlu0 %982 }
 0x193   : > { %6148 = vst [vmem:[#allocation145_spill] sm:$0xff] %v4433_v23  ;;  %1269 = vrot.lane.b32.xlu1 %v6083_v53, %s3232_s29  ;;  %v6173_v23 = vld [vmem:[#allocation48_spill] sm:$0xff] }
 0x194   : > { %1229 = vrot.lane.b32.xlu0 %v3427_v33, %s3232_s29  ;;  %6177 = vst [vmem:[#allocation48_spill] sm:$0xff] %v4654_v52 }
 0x195   : > { %v4439_v20 = vpop.permute.xlu1 %1025 }
 0x196   : > { %v4441_v13 = vpop.permute.xlu0 %1023 }
 0x197   : > { %1368 = vrot.lane.b32.xlu1 %v6129_v56, %s3233_s14 }
 0x198   : > { %1328 = vrot.lane.b32.xlu0 %v6099_v2, %s3233_s14 }
 0x199   : > { %v4447_v61 = vpop.permute.xlu1 %1029 }
 0x19a   : > { %v4449_v17 = vpop.permute.xlu0 %1027 }
 0x19b   : > { %1370 = vrot.lane.b32.xlu1 %v3858_v31, %s3233_s14 }
 0x19c   : > { %1330 = vrot.lane.b32.xlu0 %v3728_v5, %s3233_s14 }
 0x19d   : > { %v4455_v33 = vpop.permute.xlu1 %1033 }
 0x19e   : > { %v4457_v53 = vpop.permute.xlu0 %1031 }
 0x19f   : > { %1171 = vrot.lane.b32.xlu1 %v3634_v60, %s3231_s16 }
 0x1a0   : > { %1169 = vrot.lane.b32.xlu0 %v3640_v42, %s3231_s16 }
 0x1a1   : > { %v4463_v56 = vpop.permute.xlu1 %1037 }
 0x1a2   : > { %v4465_v2 = vpop.permute.xlu0 %1035 }
 0x1a3   : > { %1271 = vrot.lane.b32.xlu1 %v3674_v9, %s3232_s29 }
 0x1a4   : > { %1231 = vrot.lane.b32.xlu0 %v6048_v54, %s3232_s29 }
 0x1a5   : > { %v4471_v5 = vpop.permute.xlu1 %1041 }
 0x1a6   : > { %6149 = vst [vmem:[#allocation146_spill] sm:$0xff] %v4471_v5  ;;  %v4473_v31 = vpop.permute.xlu0 %1039  ;;  %v4648_v5 = vld [vmem:[%s3343_s25 + $0xf8] sm:$0xff] }
 0x1a7   : > { %6150 = vst [vmem:[#allocation147_spill] sm:$0xff] %v4473_v31  ;;  %1273 = vrot.lane.b32.xlu1 %v3669_v21, %s3232_s29  ;;  %v6179_v31 = vld [vmem:[#allocation15_spill] sm:$0xff] }
 0x1a8   : > { %1233 = vrot.lane.b32.xlu0 %v6047_v16, %s3232_s29 }
 0x1a9   : > { %v4479_v60 = vpop.permute.xlu1 %1045 }
 0x1aa   : > { %6151 = vst [vmem:[#allocation148_spill] sm:$0xff] %v4479_v60  ;;  %v4481_v42 = vpop.permute.xlu0 %1043 }
 0x1ab   : > { %6152 = vst [vmem:[#allocation149_spill] sm:$0xff] %v4481_v42  ;;  %1372 = vrot.lane.b32.xlu1 %v3882_v63, %s3233_s14  ;;  %v3099_v42 = vld [vmem:[%s3343_s25 + $0x8] sm:$0xff] }
 0x1ac   : > { %1332 = vrot.lane.b32.xlu0 %v6102_v1, %s3233_s14 }
 0x1ad   : > { %v4487_v9 = vpop.permute.xlu1 %1049 }
 0x1ae   : > { %6153 = vst [vmem:[#allocation150_spill] sm:$0xff] %v4487_v9  ;;  %v4489_v54 = vpop.permute.xlu0 %1047 }
 0x1af   : > { %6154 = vst [vmem:[#allocation151_spill] sm:$0xff] %v4489_v54  ;;  %1374 = vrot.lane.b32.xlu1 %v3875_v35, %s3233_s14  ;;  %v2242_v54 = vrot.slane %v2158_v48, 2 }
 0x1b0   : > { %1334 = vrot.lane.b32.xlu0 %v3741_v51, %s3233_s14 }
 0x1b1   : > { %v4495_v21 = vpop.permute.xlu1 %1053 }
 0x1b2   : > { %6155 = vst [vmem:[#allocation152_spill] sm:$0xff] %v4495_v21  ;;  %v4497_v16 = vpop.permute.xlu0 %1051 }
 0x1b3   : > { %6156 = vst [vmem:[#allocation153_spill] sm:$0xff] %v4497_v16  ;;  %1175 = vrot.lane.b32.xlu1 %v3656_v49, %s3231_s16 }
 0x1b4   : > { %1173 = vrot.lane.b32.xlu0 %v3662_v8, %s3231_s16 }
 0x1b5   : > { %v4503_v63 = vpop.permute.xlu1 %1057 }
 0x1b6   : > { %6157 = vst [vmem:[#allocation154_spill] sm:$0xff] %v4503_v63  ;;  %v4505_v1 = vpop.permute.xlu0 %1055  ;;  %v2159_v63 = vld [vmem:[%s4561_s24 + $0x10] sm:$0xff] }
 0x1b7   : > { %6158 = vst [vmem:[#allocation155_spill] sm:$0xff] %v4505_v1  ;;  %1275 = vrot.lane.b32.xlu1 %v6089_v59, %s3232_s29  ;;  %v2196_v21 = vrot.slane %v2159_v63, 1  ;;  %v2244_v48 = vrot.slane %v2159_v63, 2 }
 0x1b8   : > { %1235 = vrot.lane.b32.xlu0 %v6052_v19, %s3232_s29 }
 0x1b9   : > { %v4511_v51 = vpop.permute.xlu1 %1061 }
 0x1ba   : > { %6159 = vst [vmem:[#allocation156_spill] sm:$0xff] %v4511_v51  ;;  %v4513_v35 = vpop.permute.xlu0 %1059  ;;  %v2157_v51 = vld [vmem:[%s4561_s24] sm:$0xff] }
 0x1bb   : > { %6160 = vst [vmem:[#allocation157_spill] sm:$0xff] %v4513_v35  ;;  %1277 = vrot.lane.b32.xlu1 %v3682_v57, %s3232_s29  ;;  %v2193_v35 = vrot.slane %v2157_v51, 1  ;;  %v2241_v11 = vrot.slane %v2157_v51, 2 }
 0x1bc   : > { %1237 = vrot.lane.b32.xlu0 %v6051_v3, %s3232_s29 }
 0x1bd   : > { %v4519_v49 = vpop.permute.xlu1 %1065 }
 0x1be   : > { %v4521_v8 = vpop.permute.xlu0 %1063 }
 0x1bf   : > { %1376 = vrot.lane.b32.xlu1 %v3897_v44, %s3233_s14 }
 0x1c0   : > { %1336 = vrot.lane.b32.xlu0 %v6105_v47, %s3233_s14 }
 0x1c1   : > { %v4527_v19 = vpop.permute.xlu1 %1069 }
 0x1c2   : > { %v4529_v59 = vpop.permute.xlu0 %1067 }
 0x1c3   : > { %1378 = vrot.lane.b32.xlu1 %v3892_v58, %s3233_s14 }
 0x1c4   : > { %1338 = vrot.lane.b32.xlu0 %v3754_v6, %s3233_s14  ;;  %v6161_v6 = vld [vmem:[#allocation14_spill] sm:$0xff] }
 0x1c5   : > { %v4535_v57 = vpop.permute.xlu1 %1073 }
 0x1c6   : > { %v4537_v3 = vpop.permute.xlu0 %1071 }
 0x1c7   : > { %1179 = vrot.lane.b32.xlu1 %v4026_v37, %s3231_s16  ;;  %v6164_v37 = vld [vmem:[#allocation29_spill] sm:$0xff] }
 0x1c8   : > { %1177 = vrot.lane.b32.xlu0 %v4031_v45, %s3231_s16  ;;  %v6166_v45 = vld [vmem:[#allocation13_spill] sm:$0xff] }
 0x1c9   : > { %v4543_v44 = vpop.permute.xlu1 %1077 }
 0x1ca   : > { %v4545_v47 = vpop.permute.xlu0 %1075 }
 0x1cb   : > { %1279 = vrot.lane.b32.xlu1 %v4171_v29, %s3232_s29 }
 0x1cc   : > { %1239 = vrot.lane.b32.xlu0 %v6161_v6, %s3232_s29 }
 0x1cd   : > { %v4552_v58 = vpop.permute.xlu1 %1081 }
 0x1ce   : > { %6162 = vst [vmem:[#allocation14_spill] sm:$0xff] %v4552_v58  ;;  %v4554_v32 = vpop.permute.xlu0 %1079  ;;  %v6176_v58 = vld [vmem:[#allocation67_spill] sm:$0xff] }
 0x1cf   : > { %6163 = vst [vmem:[#allocation158_spill] sm:$0xff] %v4554_v32  ;;  %1281 = vrot.lane.b32.xlu1 %v6164_v37, %s3232_s29  ;;  %v6181_v32 = vld [vmem:[#allocation95_spill] sm:$0xff] }
 0x1d0   : > { %1241 = vrot.lane.b32.xlu0 %v6166_v45, %s3232_s29  ;;  %v2160_v45 = vld [vmem:[%s4561_s24 + $0x18] sm:$0x3] }
 0x1d1   : > { %v4565_v29 = vpop.permute.xlu1 %1085  ;;  %v2245_v51 = vrot.slane %v2160_v45, 2 }
 0x1d2   : > { %6167 = vst [vmem:[#allocation29_spill] sm:$0xff] %v4565_v29  ;;  %v4567_v6 = vpop.permute.xlu0 %1083 }
 0x1d3   : > { %6168 = vst [vmem:[#allocation13_spill] sm:$0xff] %v4567_v6  ;;  %1380 = vrot.lane.b32.xlu1 %v4308_v39, %s3233_s14  ;;  %v2197_v39 = vrot.slane %v2160_v45, 1  ;;  %v3098_v6 = vld [vmem:[%s3343_s25] sm:$0xff] }
 0x1d4   : > { %1340 = vrot.lane.b32.xlu0 %v6108_v55, %s3233_s14  ;;  %v2195_v55 = vsel %vm464_vm0, %v2193_v35, %v2194_v40  ;;  %v2243_v40 = vsel %vm641_vm1, %v2241_v11, %v2242_v54  ;;  %v4613_v35 = vld [vmem:[%s3343_s25 + $0x1a0] sm:$0xff]  ;;  %v4629_v54 = vsel %vm641_vm1, %v2244_v48, %v2245_v51  ;;  %v1221_v48 = vrot.slane %v4635_v36, 1 }
 0x1d5   : > { %v4575_v37 = vpop.permute.xlu1 %1123  ;;  %v1219_v43 = vrot.slane %v4613_v35, 1  ;;  %v6172_v11 = vld [vmem:[#allocation16_spill] sm:$0xff] }
 0x1d6   : > { %v4579_v1 = vpop.permute.xlu0 %1121  ;;  %6175 = vst [vmem:[#allocation16_spill] sm:$0xff] %v4648_v5 }
 0x1d7   : > { %1382 = vrot.lane.b32.xlu1 %v4303_v7, %s3233_s14  ;;  %v4594_v7 = vsel %vm464_vm0, %v2196_v21, %v2197_v39  ;;  %v3097_v39 = vld [vmem:[%s3343_s25 + $0xb0] sm:$0xff] }
 0x1d8   : > { %1342 = vrot.lane.b32.xlu0 %v6169_v22, %s3233_s14  ;;  %v4599_v22 = vld [vmem:[%s3343_s25 + $0x198] sm:$0xff] }
 0x1d9   : > { %v4585_v24 = vpop.permute.xlu1 %1127 }
 0x1da   : > { %v4588_v16 = vpop.permute.xlu0 %1125 }
 0x1db   : > { %1141 = vrot.lane.b32.xlu1 %v3096_v30, %s3231_s16 }
 0x1dc   : > { %2217 = vrot.lane.b32.xlu0 %v2195_v55, %s3226_s26  ;;  %v1218_v55 = vrot.slane %v4599_v22, 1 }
 0x1dd   : > { %v4596_v9 = vpop.permute.xlu1 %1131 }
 0x1de   : > { %v4601_v15 = vpop.permute.xlu0 %1129 }
 0x1df   : > { %2219 = vrot.lane.b32.xlu1 %v4594_v7, %s3226_s26 }
 0x1e0   : > { %1181 = vrot.lane.b32.xlu0 %v4599_v22, %s3231_s16 }
 0x1e1   : > { %v4607_v30 = vpop.permute.xlu1 %1135 }
 0x1e2   : > { %v4610_v21 = vpop.permute.xlu0 %1133 }
 0x1e3   : > { %1143 = vrot.lane.b32.xlu1 %v3097_v39, %s3231_s16 }
 0x1e4   : > { %2265 = vrot.lane.b32.xlu0 %v2243_v40, %s5954_s27  ;;  %v1220_v40 = vsel %vm464_vm0, %v1218_v55, %v1219_v43  ;;  %v1421_v55 = vsel %vm1420_vm3, %v3098_v6, %v6173_v23  ;;  %v6180_v23 = vld [vmem:[#allocation80_spill] sm:$0xff] }
 0x1e5   : > { %v4619_v29 = vpop.permute.xlu1 %1139  ;;  %v1454_v6 = vsel %vm1453_vm4, %v1421_v55, %v6180_v23  ;;  %v6184_v23 = vld [vmem:[#allocation128_spill] sm:$0xff] }
 0x1e6   : > { %6170 = vst [vmem:[#allocation33_spill] sm:$0xff] %v4619_v29  ;;  %v4622_v60 = vpop.permute.xlu0 %1137  ;;  %v1422_v29 = vsel %vm1420_vm3, %v3099_v42, %v6174_v4 }
 0x1e7   : > { %6171 = vst [vmem:[#allocation159_spill] sm:$0xff] %v4622_v60  ;;  %1243 = vrot.lane.b32.xlu1 %v6172_v11, %s3232_s29  ;;  %v1441_v60 = vsel %vm1420_vm3, %v4654_v52, %v6178_v14  ;;  %v1320_v14 = vrot.slane %v4613_v35, 2  ;;  %v6182_v52 = vld [vmem:[#allocation28_spill] sm:$0xff] }
 0x1e8   : > { %1183 = vrot.lane.b32.xlu0 %v4613_v35, %s3231_s16  ;;  %v1474_v4 = vsel %vm1453_vm4, %v1441_v60, %v6181_v32  ;;  %v1487_v55 = vsel %vm1486_vm5, %v1454_v6, %v6182_v52  ;;  %v6183_v32 = vld [vmem:[#allocation79_spill] sm:$0xff]  ;;  %v6186_v52 = vld [vmem:[#allocation94_spill] sm:$0xff] }
 0x1e9   : > { %v4631_v45 = vpop.permute.xlu1 %1163  ;;  %v1507_v42 = vsel %vm1486_vm5, %v1474_v4, %v4237_v0  ;;  %v1455_v0 = vsel %vm1453_vm4, %v1422_v29, %v6183_v32  ;;  %v4690_v29 = vld [vmem:[%s4561_s24 + $0x20] sm:$0xff]  ;;  %v6187_v4 = vld [vmem:[#allocation118_spill] sm:$0xff]  ;;  %v4699_v32 = vld [vmem:[%s4561_s24 + $0x28] sm:$0x3] }
 0x1ea   : > { %v1162_v39 = vpop.permute.xlu0 %1161  ;;  %v1540_v60 = vsel %vm1519_vm6, %v1507_v42, %v4393_v26 }
 0x1eb   : > { %2267 = vrot.lane.b32.xlu1 %v4629_v54, %s5954_s27  ;;  %v1573_v35 = vsel %vm1552_vm7, %v1540_v60, %v4521_v8 }
 0x1ec   : > { %1283 = vrot.lane.b32.xlu0 %v1220_v40, %s3232_s29  ;;  %v1442_v40 = vsel %vm1420_vm3, %v4648_v5, %v6176_v58  ;;  %v1319_v58 = vrot.slane %v4599_v22, 2  ;;  %v1520_v22 = vsel %vm1519_vm6, %v1487_v55, %v6184_v23  ;;  %v1606_v6 = vsel %vm1585_vm8, %v1573_v35, %v1162_v39 }
 0x1ed   : > { %v1264_v11 = vpop.permute.xlu1 %1263  ;;  %v1475_v26 = vsel %vm1453_vm4, %v1442_v40, %v6186_v52 }
 0x1ee   : > { %v1224_v51 = vpop.permute.xlu0 %1223  ;;  %v1508_v8 = vsel %vm1486_vm5, %v1475_v26, %v6187_v4  ;;  %v1639_v55 = vsel %vm1618_vm9, %v1606_v6, %v1264_v11  ;;  %v1321_v40 = vsel %vm641_vm1, %v1319_v58, %v1320_v14 }
 0x1ef   : > { %1245 = vrot.lane.b32.xlu1 %v6179_v31, %s3232_s29  ;;  %v1222_v31 = vsel %vm464_vm0, %v1219_v43, %v1221_v48  ;;  %v6185_v43 = vld [vmem:[#allocation36_spill] sm:$0xff]  ;;  %v1553_v48 = vsel %vm1552_vm7, %v1520_v22, %v4441_v13  ;;  %v6188_v13 = vld [vmem:[#allocation27_spill] sm:$0xff] }
 0x1f0   : > { %2290 = vrot.lane.b32.xlu0 %v2159_v63, %s3228_s28  ;;  %v1586_v42 = vsel %vm1585_vm8, %v1553_v48, %v4579_v1  ;;  %v1488_v39 = vsel %vm1486_vm5, %v1455_v0, %v6188_v13  ;;  %v2199_v0 = vrot.slane %v4690_v29, 1 }
 0x1f1   : > { %v1266_v5 = vpop.permute.xlu1 %1265  ;;  %v1619_v23 = vsel %vm1618_vm9, %v1586_v42, %v1224_v51  ;;  %v6190_v42 = vld [vmem:[#allocation35_spill] sm:$0xff] }
 0x1f2   : > { %v1226_v63 = vpop.permute.xlu0 %1225 }
 0x1f3   : > { %1344 = vrot.lane.b32.xlu1 %v6185_v43, %s3233_s14  ;;  %v6189_v43 = vld [vmem:[#allocation47_spill] sm:$0xff] }
 0x1f4   : > { %1285 = vrot.lane.b32.xlu0 %v1222_v31, %s3232_s29  ;;  %v1541_v31 = vsel %vm1519_vm6, %v1508_v8, %v4391_v50  ;;  %v1521_v1 = vsel %vm1519_vm6, %v1488_v39, %v6189_v43 }
 0x1f5   : > { %v1365_v60 = vpop.permute.xlu1 %1364  ;;  %v1574_v11 = vsel %vm1552_vm7, %v1541_v31, %v4519_v49  ;;  %v1554_v50 = vsel %vm1552_vm7, %v1521_v1, %v4439_v20  ;;  %v2200_v49 = vrot.slane %v4699_v32, 1  ;;  %v1322_v20 = vrot.slane %v4635_v36, 2  ;;  %v3102_v31 = vld [vmem:[%s3343_s25 + $0x18] sm:$0xff]  ;;  %v6195_v1 = vld [vmem:[#allocation97_spill] sm:$0xff] }
 0x1f6   : > { %v1325_v22 = vpop.permute.xlu0 %1324  ;;  %v1672_v35 = vsel %vm1651_vm10, %v1639_v55, %v1365_v60  ;;  %v1607_v51 = vsel %vm1585_vm8, %v1574_v11, %v4631_v45  ;;  %v1587_v52 = vsel %vm1585_vm8, %v1554_v50, %v4575_v37  ;;  %v4744_v55 = vld [vmem:[%s4561_s24 + $0x38] sm:$0x3]  ;;  %v2247_v50 = vrot.slane %v4690_v29, 2 }
 0x1f7   : > { %2292 = vrot.lane.b32.xlu1 %v4690_v29, %s3228_s28  ;;  %v1652_v58 = vsel %vm1651_vm10, %v1619_v23, %v1325_v22  ;;  %2991 = vmatprep.mubr.msk.f32.mxu1 %vm1689_vm11, %v1672_v35  ;;  %v1640_v26 = vsel %vm1618_vm9, %v1607_v51, %v1266_v5  ;;  %v1620_v45 = vsel %vm1618_vm9, %v1587_v52, %v1226_v63  ;;  %v4741_v63 = vld [vmem:[%s4561_s24 + $0x30] sm:$0xff]  ;;  %v4755_v22 = vld [vmem:[%s3343_s25 + $0x108] sm:$0xff]  ;;  %v2248_v51 = vrot.slane %v4699_v32, 2  ;;  %v6197_v52 = vld [vmem:[#allocation120_spill] sm:$0xff] }
 0x1f8   : > { %1384 = vrot.lane.b32.xlu0 %v1321_v40, %s3233_s14  ;;  %2961 = vmatprep.mubr.msk.f32.mxu0 %vm1689_vm11, %v1652_v58  ;;  %v4737_v36 = vsel %vm464_vm0, %v2199_v0, %v2200_v49  ;;  %v1323_v37 = vsel %vm641_vm1, %v1320_v14, %v1322_v20  ;;  %v2203_v40 = vrot.slane %v4744_v55, 1  ;;  %v6192_v23 = vld [vmem:[#allocation46_spill] sm:$0xff] }
 0x1f9   : > { %v1367_v48 = vpop.permute.xlu1 %1366  ;;  %v1423_v14 = vsel %vm1420_vm3, %v3102_v31, %v6192_v23  ;;  %v6193_v35 = vld [vmem:[#allocation70_spill] sm:$0xff] }
 0x1fa   : > { %v1673_v6 = vsel %vm1651_vm10, %v1640_v26, %v1367_v48  ;;  %v1327_v4 = vpop.permute.xlu0 %1326  ;;  %v1443_v43 = vsel %vm1420_vm3, %v4755_v22, %v6193_v35  ;;  %v6196_v0 = vld [vmem:[#allocation82_spill] sm:$0xff]  ;;  %v6198_v48 = vld [vmem:[#allocation105_spill] sm:$0xff] }
 0x1fb   : > { %v1653_v8 = vsel %vm1651_vm10, %v1620_v45, %v1327_v4  ;;  %1346 = vrot.lane.b32.xlu1 %v6190_v42, %s3233_s14  ;;  %2992 = vmatmul.mubr.msk.f32.vlgmr.msra.gmra.mxu1 %vm1689_vm11, %v1673_v6  ;;  %v1476_v11 = vsel %vm1453_vm4, %v1443_v43, %v6195_v1  ;;  %v1456_v49 = vsel %vm1453_vm4, %v1423_v14, %v6196_v0  ;;  %v3104_v4 = vld [vmem:[%s3343_s25 + $0x20] sm:$0xff]  ;;  %v4783_v32 = vld [vmem:[%s3343_s25 + $0x110] sm:$0xff]  ;;  %v6203_v0 = vld [vmem:[#allocation81_spill] sm:$0xff] }
 0x1fc   : > { %2318 = vrot.lane.b32.xlu0 %v4594_v7, %s6191_s21  ;;  %2962 = vmatmul.mubr.msk.f32.vlgmr.msra.gmra.mxu0 %vm1689_vm11, %v1653_v8  ;;  %v2202_v7 = vrot.slane %v4741_v63, 1  ;;  %v1489_v20 = vsel %vm1486_vm5, %v1456_v49, %v6198_v48  ;;  %v6199_v8 = vld [vmem:[#allocation49_spill] sm:$0xff]  ;;  %v3106_v1 = vld [vmem:[%s3343_s25 + $0xc0] sm:$0xff]  ;;  %v6204_v49 = vld [vmem:[#allocation119_spill] sm:$0xff] }
 0x1fd   : > { %v1168_v5 = vpop.permute.xlu1 %1167  ;;  %v1424_v42 = vsel %vm1420_vm3, %v3104_v4, %v6199_v8  ;;  %v6206_v8 = vld [vmem:[#allocation129_spill] sm:$0xff] }
 0x1fe   : > { %v1166_v60 = vpop.permute.xlu0 %1165  ;;  %v4767_v58 = vsel %vm464_vm0, %v2202_v7, %v2203_v40  ;;  %v6201_v40 = vld [vmem:[#allocation130_spill] sm:$0xff] }
 0x1ff   : > { %2221 = vrot.lane.b32.xlu1 %v4737_v36, %s3226_s26  ;;  %v1522_v31 = vsel %vm1519_vm6, %v1489_v20, %v6201_v40  ;;  %v6205_v20 = vld [vmem:[#allocation104_spill] sm:$0xff] }
 0x200   : > { %1386 = vrot.lane.b32.xlu0 %v1323_v37, %s3233_s14  ;;  %v6200_v37 = vld [vmem:[#allocation69_spill] sm:$0xff]  ;;  %v1555_v35 = vsel %vm1552_vm7, %v1522_v31, %v4449_v17 }
 0x201   : > { %v1268_v13 = vpop.permute.xlu1 %1267  ;;  %v1444_v7 = vsel %vm1420_vm3, %v4783_v32, %v6200_v37  ;;  %v2251_v37 = vrot.slane %v4744_v55, 2 }
 0x202   : > { %v1228_v39 = vpop.permute.xlu0 %1227 }
 0x203   : > { %2345 = vrot.lane.b32.xlu1 %v4629_v54, %s6194_s17  ;;  %v1509_v54 = vsel %vm1486_vm5, %v1476_v11, %v6197_v52  ;;  %v4802_v11 = vsel %vm641_vm1, %v2247_v50, %v2248_v51 }
 0x204   : > { %2320 = vrot.lane.b32.xlu0 %v4737_v36, %s6191_s21  ;;  %v1542_v45 = vsel %vm1519_vm6, %v1509_v54, %v4401_v18  ;;  %v6202_v18 = vld [vmem:[#allocation96_spill] sm:$0xff]  ;;  %v1588_v54 = vsel %vm1585_vm8, %v1555_v35, %v4588_v16 }
 0x205   : > { %v1270_v26 = vpop.permute.xlu1 %1269  ;;  %v1575_v23 = vsel %vm1552_vm7, %v1542_v45, %v4529_v59  ;;  %v1477_v14 = vsel %vm1453_vm4, %v1444_v7, %v6202_v18  ;;  %v1457_v59 = vsel %vm1453_vm4, %v1424_v42, %v6203_v0  ;;  %v1621_v50 = vsel %vm1618_vm9, %v1588_v54, %v1228_v39  ;;  %v6208_v0 = vld [vmem:[#allocation72_spill] sm:$0xff] }
 0x206   : > { %v1230_v6 = vpop.permute.xlu0 %1229  ;;  %v1608_v43 = vsel %vm1585_vm8, %v1575_v23, %v1166_v60  ;;  %v1510_v52 = vsel %vm1486_vm5, %v1477_v14, %v6204_v49  ;;  %v1490_v60 = vsel %vm1486_vm5, %v1457_v59, %v6205_v20  ;;  %v3107_v14 = vld [vmem:[%s3343_s25 + $0xc8] sm:$0xff]  ;;  %v3109_v49 = vld [vmem:[%s3343_s25 + $0x30] sm:$0xff]  ;;  %v2517_v20 = vld [vmem:[%s5867_s3 + $0x20] sm:$0xf] }
 0x207   : > { %2223 = vrot.lane.b32.xlu1 %v4767_v58, %s3226_s26  ;;  %v1641_v48 = vsel %vm1618_vm9, %v1608_v43, %v1268_v13  ;;  %v1543_v45 = vsel %vm1519_vm6, %v1510_v52, %v4399_v38  ;;  %v1523_v42 = vsel %vm1519_vm6, %v1490_v60, %v6206_v8  ;;  %v6209_v52 = vld [vmem:[#allocation52_spill] sm:$0xff]  ;;  %3009 = vmatprep.subr.msk.mxu1 %vm1786_vm2, %v2517_v20  ;;  %v6213_v8 = vld [vmem:[#allocation107_spill] sm:$0xff] }
 0x208   : > { %1145 = vrot.lane.b32.xlu0 %v3106_v1, %s3231_s16  ;;  %v1576_v16 = vsel %vm1552_vm7, %v1543_v45, %v4527_v19  ;;  %v1556_v38 = vsel %vm1552_vm7, %v1523_v42, %v4447_v61  ;;  %v2250_v19 = vrot.slane %v4741_v63, 2  ;;  %v3108_v1 = vld [vmem:[%s3343_s25 + $0x120] sm:$0xff]  ;;  %v1425_v54 = vsel %vm1420_vm3, %v3109_v49, %v6209_v52  ;;  %3010 = vmatpush3.msk.msra.mxu1 %vm1786_vm2, %v2517_v20 }
 0x209   : > { %v1369_v17 = vpop.permute.xlu1 %1368  ;;  %v1609_v39 = vsel %vm1585_vm8, %v1576_v16, %v1168_v5  ;;  %v1589_v7 = vsel %vm1585_vm8, %v1556_v38, %v4585_v24  ;;  %v1445_v59 = vsel %vm1420_vm3, %v3108_v1, %v6208_v0  ;;  %v6211_v60 = vld [vmem:[#allocation84_spill] sm:$0xff]  ;;  %v3110_v38 = vld [vmem:[%s3343_s25 + $0x38] sm:$0xff]  ;;  %v6219_v0 = vld [vmem:[#allocation121_spill] sm:$0xff] }
 0x20a   : > { %v1674_v51 = vsel %vm1651_vm10, %v1641_v48, %v1369_v17  ;;  %v1329_v4 = vpop.permute.xlu0 %1328  ;;  %v1642_v40 = vsel %vm1618_vm9, %v1609_v39, %v1270_v26  ;;  %v1622_v23 = vsel %vm1618_vm9, %v1589_v7, %v1230_v6  ;;  %v4846_v24 = vsel %vm641_vm1, %v2250_v19, %v2251_v37  ;;  %v6207_v6 = vld [vmem:[#allocation18_spill] sm:$0xff]  ;;  %v6210_v48 = vld [vmem:[#allocation99_spill] sm:$0xff]  ;;  %v3111_v37 = vld [vmem:[%s3343_s25 + $0x128] sm:$0xff] }
 0x20b   : > { %v1654_v13 = vsel %vm1651_vm10, %v1621_v50, %v1329_v4  ;;  %2347 = vrot.lane.b32.xlu1 %v4802_v11, %s6194_s17  ;;  %2994 = vmatprep.mubr.msk.f32.mxu1 %vm1689_vm11, %v1674_v51  ;;  %v1478_v17 = vsel %vm1453_vm4, %v1445_v59, %v6210_v48  ;;  %v1458_v45 = vsel %vm1453_vm4, %v1425_v54, %v6211_v60  ;;  %v6212_v50 = vld [vmem:[#allocation122_spill] sm:$0xff]  ;;  %v6214_v39 = vld [vmem:[#allocation51_spill] sm:$0xff] }
 0x20c   : > { %2269 = vrot.lane.b32.xlu0 %v4802_v11, %s5954_s27  ;;  %2964 = vmatprep.mubr.msk.f32.mxu0 %vm1689_vm11, %v1654_v13  ;;  %v1511_v51 = vsel %vm1486_vm5, %v1478_v17, %v6212_v50  ;;  %v1491_v42 = vsel %vm1486_vm5, %v1458_v45, %v6213_v8  ;;  %v1426_v19 = vsel %vm1420_vm3, %v3110_v38, %v6214_v39  ;;  %v6215_v7 = vld [vmem:[#allocation71_spill] sm:$0xff] }
 0x20d   : > { %v1371_v31 = vpop.permute.xlu1 %1370  ;;  %v1544_v16 = vsel %vm1519_vm6, %v1511_v51, %v4409_v46  ;;  %v2516_v46 = vld [vmem:[%s5867_s3 + $0x18] sm:$0xff] }
 0x20e   : > { %v1675_v61 = vsel %vm1651_vm10, %v1642_v40, %v1371_v31  ;;  %v1331_v5 = vpop.permute.xlu0 %1330  ;;  %v1446_v40 = vsel %vm1420_vm3, %v3111_v37, %v6215_v7  ;;  %v1524_v31 = vsel %vm1519_vm6, %v1491_v42, %v4310_v62  ;;  %v4900_v62 = vld [vmem:[%s4561_s24 + $0x40] sm:$0xff]  ;;  %3011 = vmatprep.subr.mxu1 %v2516_v46  ;;  %v4939_v42 = vld [vmem:[%s4561_s24 + $0x48] sm:$0x3] }
 0x20f   : > { %v1655_v18 = vsel %vm1651_vm10, %v1622_v23, %v1331_v5  ;;  %1147 = vrot.lane.b32.xlu1 %v3107_v14, %s3231_s16  ;;  %2995 = vmatmul.mubr.msk.f32.gmra.mxu1 %vm1689_vm11, %v1675_v61  ;;  %v1577_v23 = vsel %vm1552_vm7, %v1544_v16, %v4537_v3  ;;  %v6216_v61 = vld [vmem:[#allocation17_spill] sm:$0xff]  ;;  %v6217_v5 = vld [vmem:[#allocation98_spill] sm:$0xff]  ;;  %v1557_v14 = vsel %vm1552_vm7, %v1524_v31, %v4457_v53  ;;  %v6218_v3 = vld [vmem:[#allocation83_spill] sm:$0xff] }
 0x210   : > { %2370 = vrot.lane.b32.xlu0 %v4690_v29, %s3231_s16  ;;  %2965 = vmatmul.mubr.msk.f32.gmra.mxu0 %vm1689_vm11, %v1655_v18  ;;  %v1479_v18 = vsel %vm1453_vm4, %v1446_v40, %v6217_v5  ;;  %v1459_v1 = vsel %vm1453_vm4, %v1426_v19, %v6218_v3  ;;  %v1590_v49 = vsel %vm1585_vm8, %v1557_v14, %v4601_v15  ;;  %v6222_v37 = vld [vmem:[#allocation37_spill] sm:$0xff]  ;;  %v4963_v40 = vld [vmem:[%s4561_s24 + $0x50] sm:$0xff]  ;;  %v4966_v31 = vld [vmem:[%s4561_s24 + $0x58] sm:$0x3] }
 0x211   : > { %v1172_v55 = vpop.permute.xlu1 %1171  ;;  %v1512_v59 = vsel %vm1486_vm5, %v1479_v18, %v6219_v0  ;;  %3012 = vmatpush3.msra.mxu1 %v2516_v46  ;;  %v6223_v46 = vld [vmem:[#allocation54_spill] sm:$0xff]  ;;  %v3113_v18 = vld [vmem:[%s3343_s25 + $0x138] sm:$0xff] }
 0x212   : > { %v1170_v26 = vpop.permute.xlu0 %1169  ;;  %v1545_v48 = vsel %vm1519_vm6, %v1512_v59, %v4407_v28  ;;  %v2514_v28 = vld [vmem:[%s5867_s3 + $0x8] sm:$0xff]  ;;  %v6224_v14 = vld [vmem:[#allocation74_spill] sm:$0xff]  ;;  %v2208_v59 = vrot.slane %v4963_v40, 1 }
 0x213   : > { %2271 = vrot.lane.b32.xlu1 %v4846_v24, %s5954_s27  ;;  %v1578_v60 = vsel %vm1552_vm7, %v1545_v48, %v4535_v57  ;;  %v3114_v48 = vld [vmem:[%s3343_s25 + $0x140] sm:$0xff] }
 0x214   : > { %1247 = vrot.lane.b32.xlu0 %v6207_v6, %s3232_s29  ;;  %v1610_v6 = vsel %vm1585_vm8, %v1577_v23, %v1170_v26  ;;  %v6220_v26 = vld [vmem:[#allocation106_spill] sm:$0xff]  ;;  %v1611_v50 = vsel %vm1585_vm8, %v1578_v60, %v1172_v55 }
 0x215   : > { %v1272_v35 = vpop.permute.xlu1 %1271  ;;  %v1492_v54 = vsel %vm1486_vm5, %v1459_v1, %v6220_v26  ;;  %v6226_v1 = vld [vmem:[#allocation101_spill] sm:$0xff] }
 0x216   : > { %v1232_v43 = vpop.permute.xlu0 %1231  ;;  %v1643_v52 = vsel %vm1618_vm9, %v1610_v6, %v1272_v35  ;;  %v1525_v35 = vsel %vm1519_vm6, %v1492_v54, %v4305_v12  ;;  %v6221_v12 = vld [vmem:[#allocation38_spill] sm:$0xff]  ;;  %v1447_v6 = vsel %vm1420_vm3, %v3113_v18, %v6224_v14  ;;  %v5039_v18 = vld [vmem:[%s3343_s25 + $0xd8] sm:$0xff] }
 0x217   : > { %2372 = vrot.lane.b32.xlu1 %v4741_v63, %s3231_s16  ;;  %v1623_v17 = vsel %vm1618_vm9, %v1590_v49, %v1232_v43  ;;  %v1558_v43 = vsel %vm1552_vm7, %v1525_v35, %v4455_v33  ;;  %v1480_v0 = vsel %vm1453_vm4, %v1447_v6, %v6226_v1  ;;  %v2209_v49 = vrot.slane %v4966_v31, 1 }
 0x218   : > { %2294 = vrot.lane.b32.xlu0 %v4741_v63, %s3228_s28  ;;  %v1591_v57 = vsel %vm1585_vm8, %v1558_v43, %v4596_v9  ;;  %v2513_v9 = vld [vmem:[%s5867_s3] sm:$0xff] }
 0x219   : > { %v1274_v4 = vpop.permute.xlu1 %1273 }
 0x21a   : > { %v1234_v13 = vpop.permute.xlu0 %1233  ;;  %v1644_v51 = vsel %vm1618_vm9, %v1611_v50, %v1274_v4  ;;  %v2205_v4 = vrot.slane %v4900_v62, 1  ;;  %v6231_v50 = vld [vmem:[#allocation100_spill] sm:$0xff] }
 0x21b   : > { %1249 = vrot.lane.b32.xlu1 %v6216_v61, %s3232_s29  ;;  %v1624_v16 = vsel %vm1618_vm9, %v1591_v57, %v1234_v13  ;;  %v2206_v13 = vrot.slane %v4939_v42, 1  ;;  %v3112_v61 = vld [vmem:[%s3343_s25 + $0x48] sm:$0xff] }
 0x21c   : > { %2398 = vrot.lane.b32.xlu0 %v4737_v36, %s3232_s29  ;;  %v2515_v36 = vld [vmem:[%s5867_s3 + $0x10] sm:$0xff]  ;;  %v1427_v5 = vsel %vm1420_vm3, %v3112_v61, %v6223_v46  ;;  %v6235_v46 = vld [vmem:[#allocation131_spill] sm:$0xff] }
 0x21d   : > { %v1373_v53 = vpop.permute.xlu1 %1372  ;;  %3013 = vmatprep.subr.mxu1 %v2515_v36 }
 0x21e   : > { %v1676_v20 = vsel %vm1651_vm10, %v1643_v52, %v1373_v53  ;;  %v1333_v15 = vpop.permute.xlu0 %1332  ;;  %3014 = vmatpush3.msra.mxu1 %v2515_v36  ;;  %v6227_v52 = vld [vmem:[#allocation109_spill] sm:$0xff]  ;;  %v6228_v36 = vld [vmem:[#allocation124_spill] sm:$0xff] }
 0x21f   : > { %v1656_v45 = vsel %vm1651_vm10, %v1623_v17, %v1333_v15  ;;  %2296 = vrot.lane.b32.xlu1 %v4900_v62, %s3228_s28  ;;  %2997 = vmatprep.mubr.msk.f32.mxu1 %vm1689_vm11, %v1676_v20  ;;  %v1513_v26 = vsel %vm1486_vm5, %v1480_v0, %v6228_v36  ;;  %v6229_v17 = vld [vmem:[#allocation73_spill] sm:$0xff]  ;;  %v2257_v0 = vrot.slane %v4966_v31, 2 }
 0x220   : > { %1348 = vrot.lane.b32.xlu0 %v6221_v12, %s3233_s14  ;;  %2967 = vmatprep.mubr.msk.f32.mxu0 %vm1689_vm11, %v1656_v45  ;;  %v1448_v20 = vsel %vm1420_vm3, %v3114_v48, %v6229_v17  ;;  %v1546_v35 = vsel %vm1519_vm6, %v1513_v26, %v4417_v27  ;;  %v3115_v45 = vld [vmem:[%s3343_s25 + $0x50] sm:$0xff]  ;;  %v5010_v27 = vsel %vm464_vm0, %v2208_v59, %v2209_v49  ;;  %v6236_v48 = vld [vmem:[#allocation76_spill] sm:$0xff] }
 0x221   : > { %v1375_v8 = vpop.permute.xlu1 %1374  ;;  %3015 = vmatprep.subr.mxu1 %v2514_v28  ;;  %v1481_v12 = vsel %vm1453_vm4, %v1448_v20, %v6231_v50  ;;  %v3119_v17 = vld [vmem:[%s3343_s25 + $0x60] sm:$0xff]  ;;  %v6241_v50 = vld [vmem:[#allocation126_spill] sm:$0xff] }
 0x222   : > { %v1677_v33 = vsel %vm1651_vm10, %v1644_v51, %v1375_v8  ;;  %v1335_v38 = vpop.permute.xlu0 %1334  ;;  %3016 = vmatpush3.msra.mxu1 %v2514_v28  ;;  %v6230_v28 = vld [vmem:[#allocation53_spill] sm:$0xff]  ;;  %v1579_v51 = vsel %vm1552_vm7, %v1546_v35, %v4545_v47  ;;  %v2253_v8 = vrot.slane %v4900_v62, 2  ;;  %v6237_v20 = vld [vmem:[#allocation56_spill] sm:$0xff]  ;;  %v6238_v35 = vld [vmem:[#allocation103_spill] sm:$0xff] }
 0x223   : > { %v1657_v55 = vsel %vm1651_vm10, %v1624_v16, %v1335_v38  ;;  %2400 = vrot.lane.b32.xlu1 %v4767_v58, %s3232_s29  ;;  %2998 = vmatmul.mubr.msk.f32.gmra.mxu1 %vm1689_vm11, %v1677_v33  ;;  %v1428_v43 = vsel %vm1420_vm3, %v3115_v45, %v6230_v28  ;;  %v2254_v16 = vrot.slane %v4939_v42, 2  ;;  %v6232_v33 = vld [vmem:[#allocation85_spill] sm:$0xff]  ;;  %v6233_v38 = vld [vmem:[#allocation123_spill] sm:$0xff]  ;;  %v6239_v45 = vld [vmem:[#allocation20_spill] sm:$0xff] }
 0x224   : > { %2322 = vrot.lane.b32.xlu0 %v4767_v58, %s6191_s21  ;;  %2968 = vmatmul.mubr.msk.f32.gmra.mxu0 %vm1689_vm11, %v1657_v55  ;;  %v4960_v58 = vsel %vm464_vm0, %v2205_v4, %v2206_v13  ;;  %v1514_v47 = vsel %vm1486_vm5, %v1481_v12, %v6233_v38  ;;  %v6234_v4 = vld [vmem:[#allocation108_spill] sm:$0xff] }
 0x225   : > { %v1176_v39 = vpop.permute.xlu1 %1175  ;;  %3017 = vmatprep.subr.mxu1 %v2513_v9  ;;  %v6240_v28 = vld [vmem:[#allocation88_spill] sm:$0xff] }
 0x226   : > { %v1174_v19 = vpop.permute.xlu0 %1173  ;;  %3018 = vmatpush3.msra.mxu1 %v2513_v9 }
 0x227   : > { %1350 = vrot.lane.b32.xlu1 %v6222_v37, %s3233_s14 }
 0x228   : > { %2425 = vrot.lane.b32.xlu0 %v4802_v11, %s3233_s14  ;;  %v6225_v11 = vld [vmem:[#allocation86_spill] sm:$0xff] }
 0x229   : > { %v1276_v7 = vpop.permute.xlu1 %1275  ;;  %v1460_v3 = vsel %vm1453_vm4, %v1427_v5, %v6225_v11 }
 0x22a   : > { %v1236_v23 = vpop.permute.xlu0 %1235  ;;  %v1493_v53 = vsel %vm1486_vm5, %v1460_v3, %v6227_v52  ;;  %v5062_v52 = vld [vmem:[%s3343_s25 + $0xe0] sm:$0xff] }
 0x22b   : > { %2324 = vrot.lane.b32.xlu1 %v4960_v58, %s6191_s21  ;;  %v1526_v15 = vsel %vm1519_vm6, %v1493_v53, %v4318_v34  ;;  %v1612_v34 = vsel %vm1585_vm8, %v1579_v51, %v1174_v19  ;;  %v1547_v19 = vsel %vm1519_vm6, %v1514_v47, %v4415_v25  ;;  %v6242_v51 = vld [vmem:[#allocation111_spill] sm:$0xff] }
 0x22c   : > { %2225 = vrot.lane.b32.xlu0 %v4960_v58, %s3226_s26  ;;  %v1559_v57 = vsel %vm1552_vm7, %v1526_v15, %v4465_v2  ;;  %v1461_v2 = vsel %vm1453_vm4, %v1428_v43, %v6232_v33  ;;  %v1645_v9 = vsel %vm1618_vm9, %v1612_v34, %v1276_v7  ;;  %v1429_v15 = vsel %vm1420_vm3, %v3119_v17, %v6237_v20  ;;  %v3120_v33 = vld [vmem:[%s3343_s25 + $0x158] sm:$0xff]  ;;  %v6256_v17 = vld [vmem:[#allocation146_spill] sm:$0xff] }
 0x22d   : > { %v1278_v54 = vpop.permute.xlu1 %1277  ;;  %v1592_v55 = vsel %vm1585_vm8, %v1559_v57, %v4610_v21  ;;  %v1494_v13 = vsel %vm1486_vm5, %v1461_v2, %v6234_v4  ;;  %v1580_v21 = vsel %vm1552_vm7, %v1547_v19, %v4543_v44  ;;  %v5045_v44 = vsel %vm641_vm1, %v2253_v8, %v2254_v16  ;;  %v6243_v2 = vld [vmem:[#allocation75_spill] sm:$0xff]  ;;  %v6246_v19 = vld [vmem:[#allocation102_spill] sm:$0xff] }
 0x22e   : > { %v1238_v60 = vpop.permute.xlu0 %1237  ;;  %v1625_v42 = vsel %vm1618_vm9, %v1592_v55, %v1236_v23  ;;  %v1527_v5 = vsel %vm1519_vm6, %v1494_v13, %v6235_v46  ;;  %v1613_v23 = vsel %vm1585_vm8, %v1580_v21, %v1176_v39  ;;  %v1462_v43 = vsel %vm1453_vm4, %v1429_v15, %v6240_v28  ;;  %v6244_v55 = vld [vmem:[#allocation158_spill] sm:$0xff]  ;;  %v6245_v4 = vld [vmem:[#allocation55_spill] sm:$0xff]  ;;  %v5138_v15 = vld [vmem:[%s4561_s24 + $0x60] sm:$0xff] }
 0x22f   : > { %2427 = vrot.lane.b32.xlu1 %v4846_v24, %s3233_s14  ;;  %v1560_v25 = vsel %vm1552_vm7, %v1527_v5, %v4463_v56  ;;  %v1646_v6 = vsel %vm1618_vm9, %v1613_v23, %v1278_v54  ;;  %v3118_v54 = vld [vmem:[%s3343_s25 + $0x150] sm:$0xff]  ;;  %v1495_v34 = vsel %vm1486_vm5, %v1462_v43, %v6242_v51  ;;  %v1450_v38 = vsel %vm1420_vm3, %v3120_v33, %v6243_v2  ;;  %v6249_v5 = vld [vmem:[#allocation125_spill] sm:$0xff] }
 0x230   : > { %2349 = vrot.lane.b32.xlu0 %v4846_v24, %s6194_s17  ;;  %v1593_v14 = vsel %vm1585_vm8, %v1560_v25, %v4607_v30  ;;  %v2256_v30 = vrot.slane %v4963_v40, 2  ;;  %v1449_v31 = vsel %vm1420_vm3, %v3118_v54, %v6236_v48  ;;  %v1528_v47 = vsel %vm1519_vm6, %v1495_v34, %v4326_v10  ;;  %v6248_v10 = vld [vmem:[#allocation87_spill] sm:$0xff]  ;;  %v6254_v54 = vld [vmem:[#allocation14_spill] sm:$0xff]  ;;  %v2170_v51 = vld [vmem:[%s4561_s24 + $0x68] sm:$0x3] }
 0x231   : > { %v1377_v24 = vpop.permute.xlu1 %1376  ;;  %v1626_v56 = vsel %vm1618_vm9, %v1593_v14, %v1238_v60  ;;  %v1482_v60 = vsel %vm1453_vm4, %v1449_v31, %v6238_v35  ;;  %v6255_v31 = vld [vmem:[#allocation19_spill] sm:$0xff]  ;;  %v6257_v35 = vld [vmem:[#allocation33_spill] sm:$0xff] }
 0x232   : > { %v1678_v37 = vsel %vm1651_vm10, %v1645_v9, %v1377_v24  ;;  %v1337_v61 = vpop.permute.xlu0 %1336  ;;  %v5069_v53 = vsel %vm641_vm1, %v2256_v30, %v2257_v0  ;;  %v1515_v12 = vsel %vm1486_vm5, %v1482_v60, %v6241_v50  ;;  %v3121_v24 = vld [vmem:[%s3343_s25 + $0x68] sm:$0xff]  ;;  %v6253_v0 = vld [vmem:[#allocation132_spill] sm:$0xff] }
 0x233   : > { %v1658_v7 = vsel %vm1651_vm10, %v1625_v42, %v1337_v61  ;;  %2227 = vrot.lane.b32.xlu1 %v5010_v27, %s3226_s26  ;;  %3000 = vmatprep.mubr.msk.f32.mxu1 %vm1689_vm11, %v1678_v37  ;;  %v1548_v8 = vsel %vm1519_vm6, %v1515_v12, %v4425_v41  ;;  %v1430_v13 = vsel %vm1420_vm3, %v3121_v24, %v6245_v4  ;;  %v6247_v42 = vld [vmem:[#allocation147_spill] sm:$0xff] }
 0x234   : > { %1149 = vrot.lane.b32.xlu0 %v5039_v18, %s3231_s16  ;;  %2970 = vmatprep.mubr.msk.f32.mxu0 %vm1689_vm11, %v1658_v7  ;;  %v1581_v9 = vsel %vm1552_vm7, %v1548_v8, %v6244_v55  ;;  %v1483_v41 = vsel %vm1453_vm4, %v1450_v38, %v6246_v19  ;;  %v1561_v37 = vsel %vm1552_vm7, %v1528_v47, %v6247_v42  ;;  %v6250_v7 = vld [vmem:[#allocation159_spill] sm:$0xff]  ;;  %v2211_v8 = vrot.slane %v5138_v15, 1 }
 0x235   : > { %v1379_v11 = vpop.permute.xlu1 %1378  ;;  %v1463_v46 = vsel %vm1453_vm4, %v1430_v13, %v6248_v10  ;;  %v1516_v21 = vsel %vm1486_vm5, %v1483_v41, %v6249_v5  ;;  %v1594_v25 = vsel %vm1585_vm8, %v1561_v37, %v6250_v7  ;;  %v6259_v38 = vld [vmem:[#allocation39_spill] sm:$0xff]  ;;  %v2259_v42 = vrot.slane %v5138_v15, 2  ;;  %v6260_v5 = vld [vmem:[#allocation58_spill] sm:$0xff] }
 0x236   : > { %v1679_v39 = vsel %vm1651_vm10, %v1646_v6, %v1379_v11  ;;  %v1339_v3 = vpop.permute.xlu0 %1338  ;;  %v6251_v6 = vld [vmem:[#allocation110_spill] sm:$0xff]  ;;  %v2260_v37 = vrot.slane %v2170_v51, 2 }
 0x237   : > { %v1659_v1 = vsel %vm1651_vm10, %v1626_v56, %v1339_v3  ;;  %2351 = vrot.lane.b32.xlu1 %v5045_v44, %s6194_s17  ;;  %3001 = vmatmul.mubr.msk.f32.gmra.mxu1 %vm1689_vm11, %v1679_v39  ;;  %v1496_v11 = vsel %vm1486_vm5, %v1463_v46, %v6251_v6  ;;  %v6252_v56 = vld [vmem:[#allocation143_spill] sm:$0xff]  ;;  %v6261_v7 = vld [vmem:[#allocation90_spill] sm:$0xff] }
 0x238   : > { %2273 = vrot.lane.b32.xlu0 %v5045_v44, %s5954_s27  ;;  %2971 = vmatmul.mubr.msk.f32.gmra.mxu0 %vm1689_vm11, %v1659_v1  ;;  %v1549_v39 = vsel %vm1519_vm6, %v1516_v21, %v6252_v56  ;;  %v3122_v46 = vld [vmem:[%s3343_s25 + $0x78] sm:$0xff]  ;;  %v6264_v56 = vld [vmem:[#allocation134_spill] sm:$0xff] }
 0x239   : > { %v1180_v59 = vpop.permute.xlu1 %1179  ;;  %v1582_v48 = vsel %vm1552_vm7, %v1549_v39, %v6254_v54  ;;  %v1431_v21 = vsel %vm1420_vm3, %v3122_v46, %v6260_v5  ;;  %v6275_v46 = vld [vmem:[#allocation133_spill] sm:$0xff] }
 0x23a   : > { %v1178_v49 = vpop.permute.xlu0 %1177 }
 0x23b   : > { %1151 = vrot.lane.b32.xlu1 %v5062_v52, %s3231_s16  ;;  %v1614_v61 = vsel %vm1585_vm8, %v1581_v9, %v1178_v49  ;;  %v1529_v49 = vsel %vm1519_vm6, %v1496_v11, %v6253_v0  ;;  %v5170_v9 = vld [vmem:[%s4561_s24 + $0x70] sm:$0xff]  ;;  %v3123_v0 = vld [vmem:[%s3343_s25 + $0x168] sm:$0xff] }
 0x23c   : > { %2374 = vrot.lane.b32.xlu0 %v4900_v62, %s3231_s16  ;;  %v1562_v20 = vsel %vm1552_vm7, %v1529_v49, %v6256_v17  ;;  %v2214_v4 = vrot.slane %v5170_v9, 1  ;;  %v6266_v49 = vld [vmem:[#allocation78_spill] sm:$0xff] }
 0x23d   : > { %v1280_v36 = vpop.permute.xlu1 %1279  ;;  %v1595_v60 = vsel %vm1585_vm8, %v1562_v20, %v6257_v35  ;;  %v1451_v54 = vsel %vm1420_vm3, %v3123_v0, %v6266_v49  ;;  %v6267_v17 = vld [vmem:[#allocation26_spill] sm:$0xff] }
 0x23e   : > { %v1240_v26 = vpop.permute.xlu0 %1239  ;;  %v1647_v23 = vsel %vm1618_vm9, %v1614_v61, %v1280_v36  ;;  %v1484_v20 = vsel %vm1453_vm4, %v1451_v54, %v6267_v17  ;;  %v6280_v54 = vld [vmem:[#allocation45_spill] sm:$0xff] }
 0x23f   : > { %2275 = vrot.lane.b32.xlu1 %v5069_v53, %s5954_s27  ;;  %v1627_v3 = vsel %vm1618_vm9, %v1594_v25, %v1240_v26  ;;  %v1615_v26 = vsel %vm1585_vm8, %v1582_v48, %v1180_v59  ;;  %v6262_v25 = vld [vmem:[#allocation48_spill] sm:$0xff] }
 0x240   : > { %1251 = vrot.lane.b32.xlu0 %v6239_v45, %s3232_s29 }
 0x241   : > { %v1282_v57 = vpop.permute.xlu1 %1281 }
 0x242   : > { %v1242_v16 = vpop.permute.xlu0 %1241  ;;  %v1648_v45 = vsel %vm1618_vm9, %v1615_v26, %v1282_v57 }
 0x243   : > { %2376 = vrot.lane.b32.xlu1 %v4963_v40, %s3231_s16  ;;  %v1628_v43 = vsel %vm1618_vm9, %v1595_v60, %v1242_v16  ;;  %v2212_v16 = vrot.slane %v2170_v51, 1  ;;  %v6268_v60 = vld [vmem:[#allocation127_spill] sm:$0xff]  ;;  %v6271_v51 = vld [vmem:[#allocation16_spill] sm:$0xff] }
 0x244   : > { %2298 = vrot.lane.b32.xlu0 %v4963_v40, %s3228_s28 }
 0x245   : > { %v1381_v14 = vpop.permute.xlu1 %1380  ;;  %v5167_v47 = vsel %vm464_vm0, %v2211_v8, %v2212_v16  ;;  %v6272_v8 = vld [vmem:[#allocation89_spill] sm:$0xff] }
 0x246   : > { %v1680_v1 = vsel %vm1651_vm10, %v1647_v23, %v1381_v14  ;;  %v1341_v30 = vpop.permute.xlu0 %1340  ;;  %v5202_v23 = vsel %vm641_vm1, %v2259_v42, %v2260_v37  ;;  %v6263_v14 = vld [vmem:[#allocation113_spill] sm:$0xff] }
 0x247   : > { %v1660_v36 = vsel %vm1651_vm10, %v1627_v3, %v1341_v30  ;;  %1253 = vrot.lane.b32.xlu1 %v6255_v31, %s3232_s29  ;;  %3003 = vmatprep.mubr.msk.f32.mxu1 %vm1689_vm11, %v1680_v1  ;;  %v6265_v1 = vld [vmem:[#allocation149_spill] sm:$0xff] }
 0x248   : > { %2402 = vrot.lane.b32.xlu0 %v4960_v58, %s3232_s29  ;;  %2973 = vmatprep.mubr.msk.f32.mxu0 %vm1689_vm11, %v1660_v36  ;;  %v6258_v58 = vld [vmem:[#allocation40_spill] sm:$0xff]  ;;  %v2262_v36 = vrot.slane %v5170_v9, 2 }
 0x249   : > { %v1383_v28 = vpop.permute.xlu1 %1382 }
 0x24a   : > { %v1681_v50 = vsel %vm1651_vm10, %v1648_v45, %v1383_v28  ;;  %v1343_v12 = vpop.permute.xlu0 %1342  ;;  %v1517_v45 = vsel %vm1486_vm5, %v1484_v20, %v6268_v60  ;;  %v6282_v20 = vld [vmem:[#allocation29_spill] sm:$0xff] }
 0x24b   : > { %v1661_v59 = vsel %vm1651_vm10, %v1628_v43, %v1343_v12  ;;  %2300 = vrot.lane.b32.xlu1 %v5138_v15, %s3228_s28  ;;  %3004 = vmatmul.mubr.msk.f32.gmra.mxu1 %vm1689_vm11, %v1681_v50  ;;  %v3124_v50 = vld [vmem:[%s3343_s25 + $0x80] sm:$0xff]  ;;  %v6269_v12 = vld [vmem:[#allocation57_spill] sm:$0xff] }
 0x24c   : > { %1352 = vrot.lane.b32.xlu0 %v6258_v58, %s3233_s14  ;;  %2974 = vmatmul.mubr.msk.f32.gmra.mxu0 %vm1689_vm11, %v1661_v59  ;;  %v1432_v59 = vsel %vm1420_vm3, %v3124_v50, %v6269_v12  ;;  %v6270_v58 = vld [vmem:[#allocation145_spill] sm:$0xff]  ;;  %v2173_v12 = vld [vmem:[%s4561_s24 + $0x80] sm:$0xff] }
 0x24d   : > { %v1142_v57 = vpop.permute.xlu1 %1141  ;;  %v1465_v16 = vsel %vm1453_vm4, %v1432_v59, %v6272_v8  ;;  %v6283_v50 = vld [vmem:[#allocation21_spill] sm:$0xff] }
 0x24e   : > { %v5153_v34 = vpop.permute.xlu0 %2217 }
 0x24f   : > { %2404 = vrot.lane.b32.xlu1 %v5010_v27, %s3232_s29 }
 0x250   : > { %2326 = vrot.lane.b32.xlu0 %v5010_v27, %s6191_s21  ;;  %v2172_v27 = vld [vmem:[%s4561_s24 + $0x78] sm:$0x3] }
 0x251   : > { %v5160_v33 = vpop.permute.xlu1 %2219  ;;  %v2215_v13 = vrot.slane %v2172_v27, 1  ;;  %v2263_v31 = vrot.slane %v2172_v27, 2 }
 0x252   : > { %v1182_v2 = vpop.permute.xlu0 %1181 }
 0x253   : > { %1354 = vrot.lane.b32.xlu1 %v6259_v38, %s3233_s14  ;;  %v5187_v41 = vsel %vm464_vm0, %v2214_v4, %v2215_v13  ;;  %v6273_v38 = vld [vmem:[#allocation13_spill] sm:$0xff]  ;;  %v5242_v4 = vsel %vm641_vm1, %v2262_v36, %v2263_v31  ;;  %v6274_v13 = vld [vmem:[#allocation112_spill] sm:$0xff] }
 0x254   : > { %2429 = vrot.lane.b32.xlu0 %v5045_v44, %s3233_s14 }
 0x255   : > { %v1144_v55 = vpop.permute.xlu1 %1143 }
 0x256   : > { %v5173_v24 = vpop.permute.xlu0 %2265 }
 0x257   : > { %2328 = vrot.lane.b32.xlu1 %v5167_v47, %s6191_s21 }
 0x258   : > { %2229 = vrot.lane.b32.xlu0 %v5167_v47, %s3226_s26 }
 0x259   : > { %v1244_v44 = vpop.permute.xlu1 %1243 }
 0x25a   : > { %v5180_v19 = vpop.permute.xlu0 %1183 }
 0x25b   : > { %2431 = vrot.lane.b32.xlu1 %v5069_v53, %s3233_s14 }
 0x25c   : > { %2353 = vrot.lane.b32.xlu0 %v5069_v53, %s6194_s17  ;;  %v1464_v53 = vsel %vm1453_vm4, %v1431_v21, %v6261_v7 }
 0x25d   : > { %v5190_v61 = vpop.permute.xlu1 %2267  ;;  %v1497_v6 = vsel %vm1486_vm5, %v1464_v53, %v6263_v14  ;;  %v6276_v53 = vld [vmem:[#allocation148_spill] sm:$0xff] }
 0x25e   : > { %v1284_v10 = vpop.permute.xlu0 %1283  ;;  %v1530_v39 = vsel %vm1519_vm6, %v1497_v6, %v6264_v56  ;;  %v3125_v6 = vld [vmem:[%s3343_s25 + $0x170] sm:$0xff]  ;;  %v6277_v56 = vld [vmem:[#allocation77_spill] sm:$0xff] }
 0x25f   : > { %2231 = vrot.lane.b32.xlu1 %v5187_v41, %s3226_s26  ;;  %v1563_v30 = vsel %vm1552_vm7, %v1530_v39, %v6265_v1  ;;  %v6278_v1 = vld [vmem:[#allocation22_spill] sm:$0xff]  ;;  %s5444_s26 = sand.u32 1, %s3216_s10  }
 0x260   : > { %1153 = vrot.lane.b32.xlu0 %v6262_v25, %s3231_s16  ;;  %v1596_v48 = vsel %vm1585_vm8, %v1563_v30, %v1142_v57  ;;  %v1550_v57 = vsel %vm1519_vm6, %v1517_v45, %v6270_v58  ;;  %s2702_s0 = scalar_lea.sflag [#allocation5], %s5444_s26 }
 0x261   : > { %v1246_v11 = vpop.permute.xlu1 %1245  ;;  %v1629_v26 = vsel %vm1618_vm9, %v1596_v48, %v1244_v44  ;;  %v1583_v27 = vsel %vm1552_vm7, %v1550_v57, %v6273_v38  ;;  %v1498_v44 = vsel %vm1486_vm5, %v1465_v16, %v6274_v13 }
 0x262   : > { %v5208_v3 = vpop.permute.xlu0 %2290  ;;  %v1616_v42 = vsel %vm1585_vm8, %v1583_v27, %v1182_v2  ;;  %v1531_v5 = vsel %vm1519_vm6, %v1498_v44, %v6275_v46  ;;  %v1452_v2 = vsel %vm1420_vm3, %v3125_v6, %v6277_v56  ;;  %v6285_v44 = vld [vmem:[#allocation41_spill] sm:$0xff]  ;;  %v6286_v56 = vld [vmem:[#allocation60_spill] sm:$0xff] }
 0x263   : > { %2355 = vrot.lane.b32.xlu1 %v5202_v23, %s6194_s17  ;;  %v1649_v21 = vsel %vm1618_vm9, %v1616_v42, %v1284_v10  ;;  %v1564_v25 = vsel %vm1552_vm7, %v1531_v5, %v6276_v53  ;;  %v6279_v10 = vld [vmem:[#allocation25_spill] sm:$0xff] }
 0x264   : > { %2277 = vrot.lane.b32.xlu0 %v5202_v23, %s5954_s27  ;;  %v1597_v39 = vsel %vm1585_vm8, %v1564_v25, %v1144_v55  ;;  %v1485_v30 = vsel %vm1453_vm4, %v1452_v2, %v6279_v10  ;;  %v6281_v55 = vld [vmem:[#allocation144_spill] sm:$0xff] }
 0x265   : > { %v1345_v35 = vpop.permute.xlu1 %1344  ;;  %v1630_v0 = vsel %vm1618_vm9, %v1597_v39, %v1246_v11  ;;  %v1518_v48 = vsel %vm1486_vm5, %v1485_v30, %v6280_v54  ;;  %v6290_v54 = vld [vmem:[#allocation24_spill] sm:$0xff] }
 0x266   : > { %v1662_v28 = vsel %vm1651_vm10, %v1629_v26, %v1345_v35  ;;  %v1286_v43 = vpop.permute.xlu0 %1285  ;;  %v1551_v17 = vsel %vm1519_vm6, %v1518_v48, %v6281_v55  ;;  %v6291_v48 = vld [vmem:[#allocation151_spill] sm:$0xff] }
 0x267   : > { %1155 = vrot.lane.b32.xlu1 %v6271_v51, %s3231_s16  ;;  %2976 = vmatprep.mubr.msk.f32.mxu0 %vm1689_vm11, %v1662_v28  ;;  %v1584_v11 = vsel %vm1552_vm7, %v1551_v17, %v6282_v20  ;;  %v2174_v51 = vld [vmem:[%s4561_s24 + $0x88] sm:$0x3]  ;;  %v2175_v20 = vld [vmem:[%s4561_s24 + $0x90] sm:$0xff] }
 0x268   : > { %2378 = vrot.lane.b32.xlu0 %v5138_v15, %s3231_s16  ;;  %v1617_v26 = vsel %vm1585_vm8, %v1584_v11, %v5180_v19  ;;  %v6284_v19 = vld [vmem:[#allocation42_spill] sm:$0xff]  ;;  %v2316_v16 = vrot.slane %v2174_v51, 1 }
 0x269   : > { %v5247_v37 = vpop.permute.xlu1 %2292  ;;  %v1650_v60 = vsel %vm1618_vm9, %v1617_v26, %v1286_v43 }
 0x26a   : > { %v1385_v7 = vpop.permute.xlu0 %1384 }
 0x26b   : > { %v1682_v14 = vsel %vm1651_vm10, %v1649_v21, %v1385_v7  ;;  %2279 = vrot.lane.b32.xlu1 %v5242_v4, %s5954_s27  ;;  %v2343_v7 = vrot.slane %v2174_v51, 2 }
 0x26c   : > { %1255 = vrot.lane.b32.xlu0 %v6278_v1, %s3232_s29  ;;  %3006 = vmatprep.mubr.msk.f32.mxu1 %vm1689_vm11, %v1682_v14  ;;  %v6288_v1 = vld [vmem:[#allocation114_spill] sm:$0xff] }
 0x26d   : > { %v1347_v49 = vpop.permute.xlu1 %1346 }
 0x26e   : > { %v1663_v36 = vsel %vm1651_vm10, %v1630_v0, %v1347_v49  ;;  %v5270_v31 = vpop.permute.xlu0 %2318  ;;  %v6289_v0 = vld [vmem:[#allocation136_spill] sm:$0xff] }
 0x26f   : > { %2380 = vrot.lane.b32.xlu1 %v5170_v9, %s3231_s16  ;;  %2977 = vmatmul.mubr.msk.f32.gmra.mxu0 %vm1689_vm11, %v1663_v36 }
 0x270   : > { %2302 = vrot.lane.b32.xlu0 %v5170_v9, %s3228_s28 }
 0x271   : > { %v2222_v35 = vpop.permute.xlu1 %2221 }
 0x272   : > { %v1387_v45 = vpop.permute.xlu0 %1386  ;;  %v2451_v38 = vsel %vm1420_vm3, %v4690_v29, %v2222_v35  ;;  %v2342_v29 = vrot.slane %v2173_v12, 2  ;;  %v2176_v35 = vld [vmem:[%s4561_s24 + $0x98] sm:$0x3] }
 0x273   : > { %v1683_v28 = vsel %vm1651_vm10, %v1650_v60, %v1387_v45  ;;  %1257 = vrot.lane.b32.xlu1 %v6283_v50, %s3232_s29  ;;  %v3127_v60 = vld [vmem:[%s3343_s25 + $0x98] sm:$0xff] }
 0x274   : > { %2406 = vrot.lane.b32.xlu0 %v5167_v47, %s3232_s29  ;;  %3007 = vmatmul.mubr.msk.f32.gmra.mxu1 %vm1689_vm11, %v1683_v28  ;;  %v2315_v47 = vrot.slane %v2173_v12, 1  ;;  %v2344_v14 = vsel %vm641_vm1, %v2342_v29, %v2343_v7  ;;  %v6292_v45 = vld [vmem:[#allocation59_spill] sm:$0xff] }
 0x275   : > { %v5291_v59 = vpop.permute.xlu1 %2345  ;;  %v1434_v28 = vsel %vm1420_vm3, %v3127_v60, %v6292_v45 }
 0x276   : > { %v5293_v58 = vpop.permute.xlu0 %2320 }
 0x277   : > { %2304 = vrot.lane.b32.xlu1 %v2173_v12, %s3228_s28  ;;  %s2842_s28 = sshll.u32 %s5444_s26, 6 }
 0x278   : > { %1356 = vrot.lane.b32.xlu0 %v6284_v19, %s3233_s14  ;;  %v3128_v19 = vld [vmem:[%s4561_s24] sm:$0xff] }
 0x279   : > { %v2224_v43 = vpop.permute.xlu1 %2223 }
 0x27a   : > { %v1146_v57 = vpop.permute.xlu0 %1145  ;;  %v2452_v5 = vsel %vm1420_vm3, %v4741_v63, %v2224_v43  ;;  %v3126_v63 = vld [vmem:[%s3343_s25 + $0x90] sm:$0xff]  ;;  %v2449_v43 = vsel %vm1420_vm3, %v3128_v19, %v5153_v34 }
 0x27b   : > { %2408 = vrot.lane.b32.xlu1 %v5187_v41, %s3232_s29  ;;  %v1433_v2 = vsel %vm1420_vm3, %v3126_v63, %v6286_v56  ;;  %v2422_v56 = vrot.slane %v2175_v20, 2 }
 0x27c   : > { %2330 = vrot.lane.b32.xlu0 %v5187_v41, %s6191_s21  ;;  %v2317_v41 = vsel %vm464_vm0, %v2315_v47, %v2316_v16  ;;  %v2457_v47 = vsel %vm1453_vm4, %v2449_v43, %v5173_v24  ;;  %v2395_v16 = vrot.slane %v2175_v20, 1  ;;  %v6297_v24 = vld [vmem:[#allocation44_spill] sm:$0xff] }
 0x27d   : > { %v5303_v8 = vpop.permute.xlu1 %2347  ;;  %v2465_v29 = vsel %vm1486_vm5, %v2457_v47, %v5208_v3  ;;  %v6298_v3 = vld [vmem:[#allocation23_spill] sm:$0xff]  ;;  %v3130_v47 = vld [vmem:[%s3343_s25 + $0xa8] sm:$0xff] }
 0x27e   : > { %v2270_v27 = vpop.permute.xlu0 %2269  ;;  %v2473_v7 = vsel %vm1519_vm6, %v2465_v29, %v5270_v31 }
 0x27f   : > { %v5308_v13 = vsel %vm1453_vm4, %v2451_v38, %v2270_v27  ;;  %1358 = vrot.lane.b32.xlu1 %v6285_v44, %s3233_s14  ;;  %v2396_v27 = vrot.slane %v2176_v35, 1  ;;  %v6295_v44 = vld [vmem:[#allocation135_spill] sm:$0xff] }
 0x280   : > { %2433 = vrot.lane.b32.xlu0 %v5202_v23, %s3233_s14 }
 0x281   : > { %v1148_v42 = vpop.permute.xlu1 %1147  ;;  %v2397_v31 = vsel %vm464_vm0, %v2395_v16, %v2396_v27 }
 0x282   : > { %v2371_v46 = vpop.permute.xlu0 %2370 }
 0x283   : > { %2357 = vrot.lane.b32.xlu1 %v5242_v4, %s6194_s17 }
 0x284   : > { %2332 = vrot.lane.b32.xlu0 %v2317_v41, %s6191_s21 }
 0x285   : > { %v2272_v21 = vpop.permute.xlu1 %2271 }
 0x286   : > { %v5321_v53 = vsel %vm1453_vm4, %v2452_v5, %v2272_v21  ;;  %v1248_v23 = vpop.permute.xlu0 %1247  ;;  %v6296_v5 = vld [vmem:[#allocation150_spill] sm:$0xff] }
 0x287   : > { %1157 = vrot.lane.b32.xlu1 %v4755_v22, %s3231_s16  ;;  %v6287_v22 = vld [vmem:[#allocation91_spill] sm:$0xff] }
 0x288   : > { %2435 = vrot.lane.b32.xlu0 %v5242_v4, %s3233_s14  ;;  %v1466_v4 = vsel %vm1453_vm4, %v1433_v2, %v6287_v22  ;;  %v2423_v2 = vrot.slane %v2176_v35, 2 }
 0x289   : > { %v5327_v25 = vpop.permute.xlu1 %2372  ;;  %v1499_v10 = vsel %vm1486_vm5, %v1466_v4, %v6288_v1 }
 0x28a   : > { %v5330_v6 = vpop.permute.xlu0 %2294  ;;  %v1532_v49 = vsel %vm1519_vm6, %v1499_v10, %v6289_v0 }
 0x28b   : > { %2382 = vrot.lane.b32.xlu1 %v2173_v12, %s3231_s16  ;;  %v1565_v36 = vsel %vm1552_vm7, %v1532_v49, %v6291_v48  ;;  %v6293_v12 = vld [vmem:[#allocation8_spill] sm:$0xff] }
 0x28c   : > { %2359 = vrot.lane.b32.xlu0 %v2344_v14, %s6194_s17  ;;  %v1598_v55 = vsel %vm1585_vm8, %v1565_v36, %v1146_v57  ;;  %v6294_v57 = vld [vmem:[#allocation30_spill] sm:$0xff] }
 0x28d   : > { %v1250_v39 = vpop.permute.xlu1 %1249  ;;  %v1631_v11 = vsel %vm1618_vm9, %v1598_v55, %v1248_v23  ;;  %v2481_v23 = vsel %vm1552_vm7, %v2473_v7, %v5291_v59  ;;  %v3129_v59 = vld [vmem:[%s4561_s24 + $0x10] sm:$0xff]  ;;  %v6299_v55 = vld [vmem:[#allocation43_spill] sm:$0xff]  ;;  %s2841_s24 = sshll.u32 %s5444_s26, 8 }
 0x28e   : > { %v2399_v30 = vpop.permute.xlu0 %2398  ;;  %v2489_v22 = vsel %vm1585_vm8, %v2481_v23, %v2371_v46  ;;  %s5489_s21 = scalar_lea.vmem [#allocation2], %s2841_s24  ;;  %s2899_s24 = sshll.u32 %s3308_s13, 12 }
 0x28f   : > { %1259 = vrot.lane.b32.xlu1 %v6290_v54, %s3232_s29  ;;  %v2497_v10 = vsel %vm1618_vm9, %v2489_v22, %v2399_v30  ;;  %s5791_s27 = scalar_lea.hbm %s5872_s8, %s2899_s24 }
 0x290   : > { %1159 = vrot.lane.b32.xlu0 %v4783_v32, %s3231_s16  ;;  %v1467_v32 = vsel %vm1453_vm4, %v1434_v28, %v6293_v12 }
 0x291   : > { %v5350_v17 = vpop.permute.xlu1 %2296  ;;  %v1500_v51 = vsel %vm1486_vm5, %v1467_v32, %v6294_v57 }
 0x292   : > { %v1349_v26 = vpop.permute.xlu0 %1348 }
 0x293   : > { %v1664_v50 = vsel %vm1651_vm10, %v1631_v11, %v1349_v26  ;;  %2410 = vrot.lane.b32.xlu1 %v2317_v41, %s3232_s29  ;;  %v1533_v41 = vsel %vm1519_vm6, %v1500_v51, %v6295_v44 }
 0x294   : > { %2384 = vrot.lane.b32.xlu0 %v2175_v20, %s3231_s16  ;;  %2979 = vmatprep.mubr.msk.f32.mxu0 %vm1689_vm11, %v1664_v50  ;;  %v1566_v21 = vsel %vm1552_vm7, %v1533_v41, %v6296_v5  ;;  %v6302_v41 = vld [vmem:[#allocation115_spill] sm:$0xff]  ;;  %s5739_s16 = scalar_lea.vmem [#allocation4], %s2842_s28 }
 0x295   : > { %v2401_v38 = vpop.permute.xlu1 %2400  ;;  %v1599_v63 = vsel %vm1585_vm8, %v1566_v21, %v1148_v42  ;;  %v2450_v42 = vsel %vm1420_vm3, %v3129_v59, %v5160_v33  ;;  %v6303_v21 = vld [vmem:[#allocation138_spill] sm:$0xff] }
 0x296   : > { %v5375_v34 = vpop.permute.xlu0 %2322  ;;  %v1632_v4 = vsel %vm1618_vm9, %v1599_v63, %v1250_v39  ;;  %v2458_v46 = vsel %vm1453_vm4, %v2450_v42, %v5190_v61  ;;  %v2424_v39 = vsel %vm641_vm1, %v2422_v56, %v2423_v2  ;;  %v6304_v63 = vld [vmem:[#allocation153_spill] sm:$0xff] }
 0x297   : > { %1360 = vrot.lane.b32.xlu1 %v6297_v24, %s3233_s14  ;;  %v2466_v30 = vsel %vm1486_vm5, %v2458_v46, %v5247_v37  ;;  %v5458_v24 = vld [vmem:[%s5869_s5] ss:$0 sm:$0xff]  ;;  %v6305_v46 = vld [vmem:[#allocation61_spill] sm:$0xff] }
 0x298   : > { %1261 = vrot.lane.b32.xlu0 %v6298_v3, %s3232_s29  ;;  %v2474_v33 = vsel %vm1519_vm6, %v2466_v30, %v5293_v58 }
 0x299   : > { %v1351_v1 = vpop.permute.xlu1 %1350  ;;  %v2482_v36 = vsel %vm1552_vm7, %v2474_v33, %v5303_v8 }
 0x29a   : > { %v1665_v0 = vsel %vm1651_vm10, %v1632_v4, %v1351_v1  ;;  %v2426_v49 = vpop.permute.xlu0 %2425  ;;  %v2490_v61 = vsel %vm1585_vm8, %v2482_v36, %v5327_v25  ;;  %v6306_v36 = vld [vmem:[#allocation9_spill] sm:$0xff] }
 0x29b   : > { %v2505_v54 = vsel %vm1651_vm10, %v2497_v10, %v2426_v49  ;;  %2437 = vrot.lane.b32.xlu1 %v2344_v14, %s3233_s14  ;;  %2980 = vmatmul.mubr.msk.f32.gmra.mxu0 %vm1689_vm11, %v1665_v0  ;;  %v2498_v20 = vsel %vm1618_vm9, %v2490_v61, %v2401_v38  ;;  %v6301_v38 = vld [vmem:[#allocation10_spill] sm:$0xff] }
 0x29c   : > { %2412 = vrot.lane.b32.xlu0 %v2397_v31, %s3232_s29  ;;  %3019 = vmatprep.mubr.msk.f32.mxu1 %vm1689_vm11, %v2505_v54  ;;  %v3131_v54 = vld [vmem:[%s3343_s25 + $0xb0] sm:$0xff]  ;;  %s2900_s29 = sshll.u32 %s3308_s13, 10 }
 0x29d   : > { %v5406_v48 = vpop.permute.xlu1 %2324  ;;  %s5783_s23 = scalar_lea.hbm %s5873_s9, %s2900_s29  ;;  %s3234_s29 = smov [#allocation4]  }
 0x29e   : > { %v2226_v14 = vpop.permute.xlu0 %2225  ;;  %s3138_s22 = sshll.u32 %s3234_s29, 4  ;;  %s3139_s22 = int_to_ptr.vmem [resolvable:$false] %s3138_s22 }
 0x29f   : > { %2439 = vrot.lane.b32.xlu1 %v2424_v39, %s3233_s14  ;;  %v2453_v25 = vsel %vm1420_vm3, %v4900_v62, %v2226_v14  ;;  %v6300_v62 = vld [vmem:[#allocation62_spill] sm:$0xff]  ;;  %v1436_v39 = vsel %vm1420_vm3, %v3131_v54, %v6305_v46  ;;  %s3140_s1 = scalar_lea.vmem %s3139_s22, 2048 }
 0x2a0   : > { %1362 = vrot.lane.b32.xlu0 %v6299_v55, %s3233_s14  ;;  %v1435_v16 = vsel %vm1420_vm3, %v3130_v47, %v6300_v62  ;;  %v1469_v61 = vsel %vm1453_vm4, %v1436_v39, %v6306_v36  ;;  %v6309_v62 = vld [vmem:[#allocation152_spill] sm:$0xff]  ;;  %s2731_s14 = sshll.u32 %s5739_s16, 4  ;;  %s5785_s14 = int_to_ptr.vmem [resolvable:$true] %s2731_s14 }
 0x2a1   : > { %v2428_v37 = vpop.permute.xlu1 %2427  ;;  %v1468_v27 = vsel %vm1453_vm4, %v1435_v16, %v6301_v38  ;;  %s3134_s17 = scalar_lea.vmem %s5785_s14, 1024  ;;  %p3141_p0 = scmp.lt.s32.totalorder %s5785_s14, %s3139_s22 }
 0x2a2   : > { %v2506_v11 = vsel %vm1651_vm10, %v2498_v20, %v2428_v37  ;;  %v5419_v26 = vpop.permute.xlu0 %2349  ;;  %v1501_v29 = vsel %vm1486_vm5, %v1468_v27, %v6302_v41  ;;  %v6307_v37 = vld [vmem:[#allocation31_spill] sm:$0xff]  ;;  %p3135_p11 = scmp.ne.s32.totalorder %s5785_s14, %s3134_s17  ;;  %p3142_p1 = scmp.lt.s32.totalorder %s3140_s1, %s3134_s17 }
 0x2a3   : > { %3020 = vmatmul.mubr.msk.f32.vlgmr.msra.gmra.mxu1 %vm1689_vm11, %v2506_v11  ;;  %v1534_v7 = vsel %vm1519_vm6, %v1501_v29, %v6303_v21  ;;  %v1502_v11 = vsel %vm1486_vm5, %v1469_v61, %v6307_v37 }
 0x2a4   : > { %v1567_v56 = vsel %vm1552_vm7, %v1534_v7, %v6304_v63  ;;  %p3136_p12 = pnand %p3135_p11, %p3325_p5  ;;  %p3143_p2 = por %p3142_p1, %p3141_p0 }
 0x2a5   : > { %v2228_v58 = vpop.permute.xlu1 %2227 }
 0x2a6   : > { %v1150_v8 = vpop.permute.xlu0 %1149  ;;  %v2454_v12 = vsel %vm1420_vm3, %v4963_v40, %v2228_v58  ;;  %v5449_v40 = vld [vmem:[%s5868_s4] ss:$0 sm:$0xff]  ;;  %p3137_p13 = pneg %p3136_p12 }
 0x2a7   : > { %v1600_v22 = vsel %vm1585_vm8, %v1567_v56, %v1150_v8 }
 0x2a8   : > { %p3144_p3 = pnand %p3143_p2, %p3137_p13 }
 0x2a9   : > { %v5422_v35 = vpop.permute.xlu1 %2351 }
 0x2aa   : > { %v2274_v60 = vpop.permute.xlu0 %2273 }
 0x2ab   : > { %v5427_v45 = vsel %vm1453_vm4, %v2453_v25, %v2274_v60  ;;  %v6308_v60 = vld [vmem:[#allocation137_spill] sm:$0xff] }
 0x2ad   : > { %v1152_v28 = vpop.permute.xlu1 %1151 }
 0x2ae   : > { %v2375_v50 = vpop.permute.xlu0 %2374 }
 0x2b1   : > { %v2276_v32 = vpop.permute.xlu1 %2275 }
 0x2b2   : > { %v5432_v19 = vsel %vm1453_vm4, %v2454_v12, %v2276_v32  ;;  %v1252_v43 = vpop.permute.xlu0 %1251  ;;  %v1535_v12 = vsel %vm1519_vm6, %v1502_v11, %v6308_v60  ;;  %v2467_v32 = vsel %vm1486_vm5, %v5308_v13, %v5330_v6 }
 0x2b3   : > { %v1633_v10 = vsel %vm1618_vm9, %v1600_v22, %v1252_v43  ;;  %v1568_v16 = vsel %vm1552_vm7, %v1535_v12, %v6309_v62  ;;  %v2475_v38 = vsel %vm1519_vm6, %v2467_v32, %v5375_v34  ;;  %v3132_v12 = vld [vmem:[%s3343_s25 + $0xc0] sm:$0xff] }
 0x2b4   : > { %v2483_v13 = vsel %vm1552_vm7, %v2475_v38, %v5419_v26  ;;  %v1601_v6 = vsel %vm1585_vm8, %v1568_v16, %v1152_v28  ;;  %v2468_v26 = vsel %vm1486_vm5, %v5321_v53, %v5350_v17  ;;  %v6310_v32 = vld [vmem:[#allocation64_spill] sm:$0xff] }
 0x2b5   : > { %v5434_v57 = vpop.permute.xlu1 %2376  ;;  %v2491_v41 = vsel %vm1585_vm8, %v2483_v13, %v2375_v50  ;;  %v2476_v50 = vsel %vm1519_vm6, %v2468_v26, %v5406_v48  ;;  %v6311_v38 = vld [vmem:[#allocation12_spill] sm:$0xff] }
 0x2b6   : > { %v5436_v51 = vpop.permute.xlu0 %2298  ;;  %v6313_v26 = vld [vmem:[#allocation140_spill] sm:$0xff] }
 0x2b9   : > { %v1254_v44 = vpop.permute.xlu1 %1253 }
 0x2ba   : > { %v2403_v5 = vpop.permute.xlu0 %2402  ;;  %v1634_v29 = vsel %vm1618_vm9, %v1601_v6, %v1254_v44 }
 0x2bb   : > { %v2993_v23 = vpop.f32.mrf.mxu1  ;;  %v2499_v7 = vsel %vm1618_vm9, %v2491_v41, %v2403_v5  ;;  %v2484_v5 = vsel %vm1552_vm7, %v2476_v50, %v5422_v35 }
 0x2bc   : > { %v2963_v3 = vpop.f32.mrf.mxu0  ;;  %v2043_v2 = vmul.f32 %v2993_v23, %v5449_v40  ;;  %v2492_v56 = vsel %vm1585_vm8, %v2484_v5, %v5434_v57 }
 0x2bd   : > { %v2023_v4 = vmul.f32 %v2963_v3, %v5449_v40  ;;  %v5466_v1 = vpop.permute.xlu1 %2300  ;;  %v1956_v31 = vpop.f32.mrf.mxu1 }
 0x2be   : > { %v2082_v0 = vadd.f32 %v5458_v24, %v2043_v2  ;;  %v1856_v49 = vpop.f32.mrf.mxu0  ;;  %v2042_v59 = vmul.f32 %v5449_v40, %v1956_v31  ;;  %v1353_v42 = vpop.permute.xlu0 %1352 }
 0x2bf   : > { %v2062_v30 = vadd.f32 %v5458_v24, %v2023_v4  ;;  %v2022_v33 = vmul.f32 %v5449_v40, %v1856_v49  ;;  %v1666_v14 = vsel %vm1651_vm10, %v1633_v10, %v1353_v42 }
 0x2c0   : > { %v2114_v55 = vmax.f32 %v2082_v0, 0.0  ;;  %v2081_v20 = vadd.f32 %v5458_v24, %v2042_v59  ;;  %2982 = vmatprep.mubr.msk.f32.mxu0 %vm1689_vm11, %v1666_v14 }
 0x2c1   : > { %v2094_v58 = vmax.f32 %v2062_v30, 0.0  ;;  %v2061_v8 = vadd.f32 %v5458_v24, %v2022_v33  ;;  %v2405_v25 = vpop.permute.xlu1 %2404 }
 0x2c2   : > { %2146 = vst [vmem:[%s5489_s21 + $0xa8] sm:$0xff] %v2114_v55  ;;  %v2113_v43 = vmax.f32 %v2081_v20, 0.0  ;;  %v5492_v47 = vpop.permute.xlu0 %2326  ;;  %v2500_v3 = vsel %vm1618_vm9, %v2492_v56, %v2405_v25 }
 0x2c3   : > { %2126 = vst [vmem:[%s5489_s21 + $0x8] sm:$0xff] %v2094_v58  ;;  %v2093_v27 = vmax.f32 %v2061_v8, 0.0 }
 0x2c4   : > { %2145 = vst [vmem:[%s5489_s21 + $0xa0] sm:$0xff] %v2113_v43  ;;  %v1437_v43 = vsel %vm1420_vm3, %v3132_v12, %v6310_v32  ;;  %v2469_v32 = vsel %vm1486_vm5, %v5427_v45, %v5436_v51 }
 0x2c5   : > { %2125 = vst [vmem:[%s5489_s21] sm:$0xff] %v2093_v27  ;;  %v1355_v21 = vpop.permute.xlu1 %1354  ;;  %v1470_v27 = vsel %vm1453_vm4, %v1437_v43, %v6311_v38  ;;  %v2477_v38 = vsel %vm1519_vm6, %v2469_v32, %v5492_v47 }
 0x2c6   : > { %v1667_v23 = vsel %vm1651_vm10, %v1634_v29, %v1355_v21  ;;  %v2430_v63 = vpop.permute.xlu0 %2429  ;;  %v6312_v29 = vld [vmem:[#allocation116_spill] sm:$0xff] }
 0x2c7   : > { %v2507_v34 = vsel %vm1651_vm10, %v2499_v7, %v2430_v63  ;;  %2983 = vmatmul.mubr.msk.f32.gmra.mxu0 %vm1689_vm11, %v1667_v23  ;;  %v1503_v21 = vsel %vm1486_vm5, %v1470_v27, %v6312_v29 }
 0x2c8   : > { %3022 = vmatprep.mubr.msk.f32.mxu1 %vm1689_vm11, %v2507_v34  ;;  %v1536_v50 = vsel %vm1519_vm6, %v1503_v21, %v6313_v26 }
 0x2c9   : > { %v5514_v28 = vpop.permute.xlu1 %2328 }
 0x2ca   : > { %v5518_v44 = vpop.permute.xlu0 %2229 }
 0x2cd   : > { %v2432_v2 = vpop.permute.xlu1 %2431 }
 0x2ce   : > { %v2508_v22 = vsel %vm1651_vm10, %v2500_v3, %v2432_v2  ;;  %v5526_v4 = vpop.permute.xlu0 %2353  ;;  %v6314_v3 = vld [vmem:[#allocation155_spill] sm:$0xff] }
 0x2cf   : > { %v2996_v53 = vpop.f32.mrf.mxu1  ;;  %3023 = vmatmul.mubr.msk.f32.gmra.mxu1 %vm1689_vm11, %v2508_v22  ;;  %v1569_v2 = vsel %vm1552_vm7, %v1536_v50, %v6314_v3  ;;  %v2485_v27 = vsel %vm1552_vm7, %v2477_v38, %v5526_v4  ;;  %v2470_v4 = vsel %vm1486_vm5, %v5432_v19, %v5466_v1 }
 0x2d0   : > { %v2966_v17 = vpop.f32.mrf.mxu0  ;;  %v2045_v48 = vmul.f32 %v2996_v53, %v5449_v40 }
 0x2d1   : > { %v2025_v31 = vmul.f32 %v2966_v17, %v5449_v40  ;;  %v5531_v35 = vpop.permute.xlu1 %2231  ;;  %v1966_v57 = vpop.f32.mrf.mxu1 }
 0x2d2   : > { %v2084_v10 = vadd.f32 %v5458_v24, %v2045_v48  ;;  %v1866_v0 = vpop.f32.mrf.mxu0  ;;  %v2044_v49 = vmul.f32 %v5449_v40, %v1966_v57  ;;  %v1154_v59 = vpop.permute.xlu0 %1153 }
 0x2d3   : > { %v2064_v42 = vadd.f32 %v5458_v24, %v2025_v31  ;;  %v2024_v54 = vmul.f32 %v5449_v40, %v1866_v0  ;;  %v1602_v17 = vsel %vm1585_vm8, %v1569_v2, %v1154_v59  ;;  %v6316_v59 = vld [vmem:[#allocation11_spill] sm:$0xff] }
 0x2d4   : > { %v2116_v46 = vmax.f32 %v2084_v10, 0.0  ;;  %v2083_v39 = vadd.f32 %v5458_v24, %v2044_v49 }
 0x2d5   : > { %v2096_v30 = vmax.f32 %v2064_v42, 0.0  ;;  %v2063_v33 = vadd.f32 %v5458_v24, %v2024_v54  ;;  %v5539_v14 = vpop.permute.xlu1 %2355  ;;  %v3133_v42 = vld [vmem:[%s3343_s25 + $0xc8] sm:$0xff]  ;;  %v6315_v54 = vld [vmem:[#allocation63_spill] sm:$0xff]  ;;  %s2715_s25 = sshll.u32 %s5489_s21, 4  ;;  %s5793_s25 = int_to_ptr.vmem [resolvable:$true] %s2715_s25 }
 0x2d6   : > { %2148 = vst [vmem:[%s5489_s21 + $0xb8] sm:$0xff] %v2116_v46  ;;  %v2115_v36 = vmax.f32 %v2083_v39, 0.0  ;;  %v5542_v61 = vpop.permute.xlu0 %2277  ;;  %v1438_v46 = vsel %vm1420_vm3, %v3133_v42, %v6315_v54 }
 0x2d7   : > { %2128 = vst [vmem:[%s5489_s21 + $0x18] sm:$0xff] %v2096_v30  ;;  %v2095_v55 = vmax.f32 %v2063_v33, 0.0  ;;  %v1471_v33 = vsel %vm1453_vm4, %v1438_v46, %v6316_v59 }
 0x2d8   : > { %2147 = vst [vmem:[%s5489_s21 + $0xb0] sm:$0xff] %v2115_v36  ;;  %v6317_v36 = vld [vmem:[#allocation32_spill] sm:$0xff] }
 0x2d9   : > { %2127 = vst [vmem:[%s5489_s21 + $0x10] sm:$0xff] %v2095_v55  ;;  %v1156_v20 = vpop.permute.xlu1 %1155  ;;  %v1504_v55 = vsel %vm1486_vm5, %v1471_v33, %v6317_v36  ;;  %v6321_v33 = vld [vmem:[#allocation93_spill] sm:$0xff] }
 0x2da   : > { %v2379_v37 = vpop.permute.xlu0 %2378 }
 0x2dd   : > { %v5547_v11 = vpop.permute.xlu1 %2279 }
 0x2de   : > { %v1256_v58 = vpop.permute.xlu0 %1255 }
 0x2df   : > { %v1635_v10 = vsel %vm1618_vm9, %v1602_v17, %v1256_v58 }
 0x2e1   : > { %v5549_v8 = vpop.permute.xlu1 %2380 }
 0x2e2   : > { %v5551_v25 = vpop.permute.xlu0 %2302 }
 0x2e3   : > { %v2999_v60 = vpop.f32.mrf.mxu1 }
 0x2e4   : > { %v2969_v62 = vpop.f32.mrf.mxu0  ;;  %v2047_v16 = vmul.f32 %v2999_v60, %v5449_v40  ;;  %v6318_v60 = vld [vmem:[#allocation139_spill] sm:$0xff] }
 0x2e5   : > { %v2027_v13 = vmul.f32 %v2969_v62, %v5449_v40  ;;  %v1258_v6 = vpop.permute.xlu1 %1257  ;;  %v1976_v41 = vpop.f32.mrf.mxu1  ;;  %v1537_v12 = vsel %vm1519_vm6, %v1504_v55, %v6318_v60  ;;  %v6319_v62 = vld [vmem:[#allocation154_spill] sm:$0xff]  ;;  %v6322_v55 = vld [vmem:[#allocation117_spill] sm:$0xff] }
 0x2e6   : > { %v2086_v7 = vadd.f32 %v5458_v24, %v2047_v16  ;;  %v1876_v23 = vpop.f32.mrf.mxu0  ;;  %v2046_v63 = vmul.f32 %v5449_v40, %v1976_v41  ;;  %v2407_v34 = vpop.permute.xlu0 %2406  ;;  %v1570_v16 = vsel %vm1552_vm7, %v1537_v12, %v6319_v62  ;;  %v2493_v41 = vsel %vm1585_vm8, %v2485_v27, %v2379_v37  ;;  %v6323_v12 = vld [vmem:[#allocation142_spill] sm:$0xff] }
 0x2e7   : > { %v2066_v5 = vadd.f32 %v5458_v24, %v2027_v13  ;;  %v2026_v56 = vmul.f32 %v5449_v40, %v1876_v23  ;;  %v1603_v13 = vsel %vm1585_vm8, %v1570_v16, %v1156_v20  ;;  %v2501_v45 = vsel %vm1618_vm9, %v2493_v41, %v2407_v34  ;;  %v6324_v16 = vld [vmem:[#allocation157_spill] sm:$0xff] }
 0x2e8   : > { %v2118_v22 = vmax.f32 %v2086_v7, 0.0  ;;  %v2085_v53 = vadd.f32 %v5458_v24, %v2046_v63  ;;  %v1636_v29 = vsel %vm1618_vm9, %v1603_v13, %v1258_v6  ;;  %v2478_v37 = vsel %vm1519_vm6, %v2470_v4, %v5514_v28  ;;  %v6326_v4 = vld [vmem:[#allocation92_spill] sm:$0xff] }
 0x2e9   : > { %v2098_v48 = vmax.f32 %v2066_v5, 0.0  ;;  %v2065_v31 = vadd.f32 %v5458_v24, %v2026_v56  ;;  %v5573_v57 = vpop.permute.xlu1 %2304  ;;  %v2486_v63 = vsel %vm1552_vm7, %v2478_v37, %v5539_v14  ;;  %v2455_v27 = vsel %vm1420_vm3, %v5138_v15, %v5518_v44 }
 0x2ea   : > { %2150 = vst [vmem:[%s5489_s21 + $0xc8] sm:$0xff] %v2118_v22  ;;  %v2117_v0 = vmax.f32 %v2085_v53, 0.0  ;;  %v1357_v49 = vpop.permute.xlu0 %1356  ;;  %v2494_v50 = vsel %vm1585_vm8, %v2486_v63, %v5549_v8  ;;  %v2456_v44 = vsel %vm1420_vm3, %v5170_v9, %v5531_v35 }
 0x2eb   : > { %2130 = vst [vmem:[%s5489_s21 + $0x28] sm:$0xff] %v2098_v48  ;;  %v2097_v39 = vmax.f32 %v2065_v31, 0.0  ;;  %v1668_v30 = vsel %vm1651_vm10, %v1635_v10, %v1357_v49 }
 0x2ec   : > { %2149 = vst [vmem:[%s5489_s21 + $0xc0] sm:$0xff] %v2117_v0  ;;  %2985 = vmatprep.mubr.msk.f32.mxu0 %vm1689_vm11, %v1668_v30  ;;  %v6320_v30 = vld [vmem:[#allocation66_spill] sm:$0xff] }
 0x2ed   : > { %2129 = vst [vmem:[%s5489_s21 + $0x20] sm:$0xff] %v2097_v39  ;;  %v2409_v58 = vpop.permute.xlu1 %2408  ;;  %v1439_v59 = vsel %vm1420_vm3, %v5039_v18, %v6320_v30  ;;  %v2463_v18 = vsel %vm1453_vm4, %v2455_v27, %v5542_v61 }
 0x2ee   : > { %v5594_v43 = vpop.permute.xlu0 %2330  ;;  %v2502_v1 = vsel %vm1618_vm9, %v2494_v50, %v2409_v58  ;;  %v1472_v36 = vsel %vm1453_vm4, %v1439_v59, %v6321_v33  ;;  %v2471_v41 = vsel %vm1486_vm5, %v2463_v18, %v5551_v25 }
 0x2ef   : > { %v1505_v58 = vsel %vm1486_vm5, %v1472_v36, %v6322_v55 }
 0x2f0   : > { %v1538_v32 = vsel %vm1519_vm6, %v1505_v58, %v6323_v12 }
 0x2f1   : > { %v1359_v21 = vpop.permute.xlu1 %1358  ;;  %v1571_v38 = vsel %vm1552_vm7, %v1538_v32, %v6324_v16 }
 0x2f2   : > { %v1669_v51 = vsel %vm1651_vm10, %v1636_v29, %v1359_v21  ;;  %v2434_v7 = vpop.permute.xlu0 %2433 }
 0x2f3   : > { %v2509_v23 = vsel %vm1651_vm10, %v2501_v45, %v2434_v7  ;;  %2986 = vmatmul.mubr.msk.f32.gmra.mxu0 %vm1689_vm11, %v1669_v51  ;;  %v2479_v45 = vsel %vm1519_vm6, %v2471_v41, %v5594_v43  ;;  %v2464_v43 = vsel %vm1453_vm4, %v2456_v44, %v5547_v11 }
 0x2f4   : > { %3025 = vmatprep.mubr.msk.f32.mxu1 %vm1689_vm11, %v2509_v23  ;;  %v6325_v23 = vld [vmem:[#allocation65_spill] sm:$0xff]  ;;  %v2472_v9 = vsel %vm1486_vm5, %v2464_v43, %v5573_v57 }
 0x2f5   : > { %v2358_v47 = vpop.permute.xlu1 %2357  ;;  %v1440_v15 = vsel %vm1420_vm3, %v5062_v52, %v6325_v23 }
 0x2f6   : > { %v5613_v20 = vpop.permute.xlu0 %2332  ;;  %v2487_v61 = vsel %vm1552_vm7, %v2479_v45, %v2358_v47  ;;  %v1473_v37 = vsel %vm1453_vm4, %v1440_v15, %v6326_v4 }
 0x2f7   : > { %v3002_v6 = vpop.f32.mrf.mxu1  ;;  %v2480_v11 = vsel %vm1519_vm6, %v2472_v9, %v5613_v20  ;;  %v6329_v20 = vld [vmem:[#allocation156_spill] sm:$0xff] }
 0x2f8   : > { %v2972_v34 = vpop.f32.mrf.mxu0  ;;  %v2049_v26 = vmul.f32 %v3002_v6, %v5449_v40 }
 0x2f9   : > { %v2029_v5 = vmul.f32 %v2972_v34, %v5449_v40  ;;  %v1158_v56 = vpop.permute.xlu1 %1157  ;;  %v1986_v19 = vpop.f32.mrf.mxu1  ;;  %v6327_v34 = vld [vmem:[#allocation34_spill] sm:$0xff] }
 0x2fa   : > { %v2088_v3 = vadd.f32 %v5458_v24, %v2049_v26  ;;  %v1886_v28 = vpop.f32.mrf.mxu0  ;;  %v2048_v2 = vmul.f32 %v5449_v40, %v1986_v19  ;;  %v2436_v14 = vpop.permute.xlu0 %2435  ;;  %v1604_v13 = vsel %vm1585_vm8, %v1571_v38, %v1158_v56  ;;  %v1506_v26 = vsel %vm1486_vm5, %v1473_v37, %v6327_v34  ;;  %v5725_v37 = vld [vmem:[%s5870_s6] ss:$0 sm:$0xff] }
 0x2fb   : > { %v2068_v22 = vadd.f32 %v5458_v24, %v2029_v5  ;;  %v2028_v8 = vmul.f32 %v5449_v40, %v1886_v28  ;;  %v2510_v53 = vsel %vm1651_vm10, %v2502_v1, %v2436_v14 }
 0x2fc   : > { %v2120_v17 = vmax.f32 %v2088_v3, 0.0  ;;  %v2087_v48 = vadd.f32 %v5458_v24, %v2048_v2  ;;  %3026 = vmatmul.mubr.msk.f32.gmra.mxu1 %vm1689_vm11, %v2510_v53  ;;  %v6328_v2 = vld [vmem:[#allocation141_spill] sm:$0xff] }
 0x2fd   : > { %v2100_v31 = vmax.f32 %v2068_v22, 0.0  ;;  %v2067_v10 = vadd.f32 %v5458_v24, %v2028_v8  ;;  %v2383_v0 = vpop.permute.xlu1 %2382  ;;  %v1539_v57 = vsel %vm1519_vm6, %v1506_v26, %v6328_v2 }
 0x2fe   : > { %2152 = vst [vmem:[%s5489_s21 + $0xd8] sm:$0xff] %v2120_v17  ;;  %v2119_v49 = vmax.f32 %v2087_v48, 0.0  ;;  %v2360_v42 = vpop.permute.xlu0 %2359  ;;  %v2495_v6 = vsel %vm1585_vm8, %v2487_v61, %v2383_v0  ;;  %v1572_v53 = vsel %vm1552_vm7, %v1539_v57, %v6329_v20 }
 0x2ff   : > { %2132 = vst [vmem:[%s5489_s21 + $0x38] sm:$0xff] %v2100_v31  ;;  %v2099_v54 = vmax.f32 %v2067_v10, 0.0  ;;  %v2488_v14 = vsel %vm1552_vm7, %v2480_v11, %v2360_v42 }
 0x300   : > { %2151 = vst [vmem:[%s5489_s21 + $0xd0] sm:$0xff] %v2119_v49 }
 0x301   : > { %2131 = vst [vmem:[%s5489_s21 + $0x30] sm:$0xff] %v2099_v54  ;;  %v1260_v46 = vpop.permute.xlu1 %1259 }
 0x302   : > { %v1160_v39 = vpop.permute.xlu0 %1159  ;;  %v1637_v29 = vsel %vm1618_vm9, %v1604_v13, %v1260_v46 }
 0x303   : > { %v1605_v10 = vsel %vm1585_vm8, %v1572_v53, %v1160_v39 }
 0x305   : > { %v2411_v60 = vpop.permute.xlu1 %2410 }
 0x306   : > { %v2385_v62 = vpop.permute.xlu0 %2384  ;;  %v2503_v35 = vsel %vm1618_vm9, %v2495_v6, %v2411_v60 }
 0x307   : > { %v2496_v17 = vsel %vm1585_vm8, %v2488_v14, %v2385_v62 }
 0x309   : > { %v1361_v21 = vpop.permute.xlu1 %1360 }
 0x30a   : > { %v1670_v51 = vsel %vm1651_vm10, %v1637_v29, %v1361_v21  ;;  %v1262_v7 = vpop.permute.xlu0 %1261 }
 0x30b   : > { %2988 = vmatprep.mubr.msk.f32.mxu0 %vm1689_vm11, %v1670_v51  ;;  %v3005_v25 = vpop.f32.mrf.mxu1  ;;  %v1638_v46 = vsel %vm1618_vm9, %v1605_v10, %v1262_v7 }
 0x30c   : > { %v2975_v63 = vpop.f32.mrf.mxu0  ;;  %v2051_v52 = vmul.f32 %v3005_v25, %v5449_v40 }
 0x30d   : > { %v2031_v47 = vmul.f32 %v2975_v63, %v5449_v40  ;;  %v2438_v50 = vpop.permute.xlu1 %2437  ;;  %v1996_v5 = vpop.f32.mrf.mxu1  ;;  %v5731_v63 = vld [vmem:[%s5871_s7] ss:$0 sm:$0xff] }
 0x30e   : > { %v2090_v56 = vadd.f32 %v5458_v24, %v2051_v52  ;;  %v2511_v19 = vsel %vm1651_vm10, %v2503_v35, %v2438_v50  ;;  %v1896_v1 = vpop.f32.mrf.mxu0  ;;  %v2050_v3 = vmul.f32 %v5449_v40, %v1996_v5  ;;  %v2413_v28 = vpop.permute.xlu0 %2412 }
 0x30f   : > { %v2070_v22 = vadd.f32 %v5458_v24, %v2031_v47  ;;  %v2030_v8 = vmul.f32 %v5449_v40, %v1896_v1  ;;  %3028 = vmatprep.mubr.msk.f32.mxu1 %vm1689_vm11, %v2511_v19  ;;  %v2504_v42 = vsel %vm1618_vm9, %v2496_v17, %v2413_v28 }
 0x310   : > { %v2122_v48 = vmax.f32 %v2090_v56, 0.0  ;;  %v2089_v31 = vadd.f32 %v5458_v24, %v2050_v3 }
 0x311   : > { %v2102_v0 = vmax.f32 %v2070_v22, 0.0  ;;  %v2069_v49 = vadd.f32 %v5458_v24, %v2030_v8  ;;  %v2440_v54 = vpop.permute.xlu1 %2439 }
 0x312   : > { %2154 = vst [vmem:[%s5489_s21 + $0xe8] sm:$0xff] %v2122_v48  ;;  %v2121_v30 = vmax.f32 %v2089_v31, 0.0  ;;  %v2512_v59 = vsel %vm1651_vm10, %v2504_v42, %v2440_v54  ;;  %v1363_v33 = vpop.permute.xlu0 %1362 }
 0x313   : > { %2134 = vst [vmem:[%s5489_s21 + $0x48] sm:$0xff] %v2102_v0  ;;  %v2101_v36 = vmax.f32 %v2069_v49, 0.0  ;;  %v1671_v55 = vsel %vm1651_vm10, %v1638_v46, %v1363_v33  ;;  %3029 = vmatmul.mubr.msk.f32.gmra.mxu1 %vm1689_vm11, %v2512_v59 }
 0x314   : > { %2153 = vst [vmem:[%s5489_s21 + $0xe0] sm:$0xff] %v2121_v30  ;;  %2989 = vmatmul.mubr.msk.f32.gmra.mxu0 %vm1689_vm11, %v1671_v55 }
 0x315   : > { %2133 = vst [vmem:[%s5489_s21 + $0x40] sm:$0xff] %v2101_v36 }
 0x32f   : > { %v2978_v39 = vpop.f32.mrf.mxu0 }
 0x330   : > { %v2033_v58 = vmul.f32 %v2978_v39, %v5449_v40 }
 0x331   : > { %v1906_v60 = vpop.f32.mrf.mxu0 }
 0x332   : > { %v2072_v12 = vadd.f32 %v5458_v24, %v2033_v58  ;;  %v2032_v32 = vmul.f32 %v5449_v40, %v1906_v60 }
 0x334   : > { %v2104_v62 = vmax.f32 %v2072_v12, 0.0  ;;  %v2071_v16 = vadd.f32 %v5458_v24, %v2032_v32  ;;  %v3008_v38 = vpop.f32.mrf.mxu1 }
 0x335   : > { %v2053_v27 = vmul.f32 %v3008_v38, %v5449_v40 }
 0x336   : > { %2136 = vst [vmem:[%s5489_s21 + $0x58] sm:$0xff] %v2104_v62  ;;  %v2103_v18 = vmax.f32 %v2071_v16, 0.0  ;;  %v2006_v13 = vpop.f32.mrf.mxu1 }
 0x337   : > { %v2092_v41 = vadd.f32 %v5458_v24, %v2053_v27  ;;  %v2052_v29 = vmul.f32 %v5449_v40, %v2006_v13 }
 0x338   : > { %2135 = vst [vmem:[%s5489_s21 + $0x50] sm:$0xff] %v2103_v18 }
 0x339   : > { %v2124_v21 = vmax.f32 %v2092_v41, 0.0  ;;  %v2091_v45 = vadd.f32 %v5458_v24, %v2052_v29 }
 0x33b   : > { %2156 = vst [vmem:[%s5489_s21 + $0xf8] sm:$0xff] %v2124_v21  ;;  %v2123_v51 = vmax.f32 %v2091_v45, 0.0 }
 0x33d   : > { %2155 = vst [vmem:[%s5489_s21 + $0xf0] sm:$0xff] %v2123_v51 }
 0x35b   : > { %v2981_v7 = vpop.f32.mrf.mxu0 }
 0x35c   : > { %v2035_v23 = vmul.f32 %v2981_v7, %v5449_v40 }
 0x35d   : > { %v1916_v15 = vpop.f32.mrf.mxu0 }
 0x35e   : > { %v2074_v44 = vadd.f32 %v5458_v24, %v2035_v23  ;;  %v2034_v61 = vmul.f32 %v5449_v40, %v1916_v15 }
 0x360   : > { %v2106_v25 = vmax.f32 %v2074_v44, 0.0  ;;  %v2073_v4 = vadd.f32 %v5458_v24, %v2034_v61 }
 0x362   : > { %2138 = vst [vmem:[%s5489_s21 + $0x68] sm:$0xff] %v2106_v25  ;;  %v2105_v43 = vmax.f32 %v2073_v4, 0.0 }
 0x363   : > { %v3021_v6 = vpop.f32.mrf.mxu1 }
 0x364   : > { %2137 = vst [vmem:[%s5489_s21 + $0x60] sm:$0xff] %v2105_v43  ;;  %v2658_v52 = vmul.f32 %v3021_v6, %v5725_v37 }
 0x365   : > { %v2611_v34 = vpop.f32.mrf.mxu1 }
 0x366   : > { %v2673_v26 = vadd.f32 %v5731_v63, %v2658_v52  ;;  %v2657_v9 = vmul.f32 %v5725_v37, %v2611_v34 }
 0x368   : > { %v2681_v35 = vmax.f32 %v2673_v26, 0.0  ;;  %v2672_v47 = vadd.f32 %v5731_v63, %v2657_v9 }
 0x36a   : > { %2689 = vst [vmem:[%s5739_s16 + $0x8] sm:$0xff] %v2681_v35  ;;  %v2680_v50 = vmax.f32 %v2672_v47, 0.0 }
 0x36c   : > { %2688 = vst [vmem:[%s5739_s16] sm:$0xff] %v2680_v50 }
 0x387   : > { %v2984_v5 = vpop.f32.mrf.mxu0 }
 0x388   : > { %v2037_v11 = vmul.f32 %v2984_v5, %v5449_v40 }
 0x389   : > { %v1926_v56 = vpop.f32.mrf.mxu0 }
 0x38a   : > { %v2076_v19 = vadd.f32 %v5458_v24, %v2037_v11  ;;  %v2036_v1 = vmul.f32 %v5449_v40, %v1926_v56 }
 0x38c   : > { %v2108_v3 = vmax.f32 %v2076_v19, 0.0  ;;  %v2075_v28 = vadd.f32 %v5458_v24, %v2036_v1 }
 0x38e   : > { %2140 = vst [vmem:[%s5489_s21 + $0x78] sm:$0xff] %v2108_v3  ;;  %v2107_v2 = vmax.f32 %v2075_v28, 0.0 }
 0x38f   : > { %v3024_v57 = vpop.f32.mrf.mxu1 }
 0x390   : > { %2139 = vst [vmem:[%s5489_s21 + $0x70] sm:$0xff] %v2107_v2  ;;  %v2660_v14 = vmul.f32 %v3024_v57, %v5725_v37 }
 0x391   : > { %v2621_v22 = vpop.f32.mrf.mxu1 }
 0x392   : > { %v2675_v8 = vadd.f32 %v5731_v63, %v2660_v14  ;;  %v2659_v20 = vmul.f32 %v5725_v37, %v2621_v22 }
 0x394   : > { %v2683_v53 = vmax.f32 %v2675_v8, 0.0  ;;  %v2674_v17 = vadd.f32 %v5731_v63, %v2659_v20 }
 0x396   : > { %2691 = vst [vmem:[%s5739_s16 + $0x18] sm:$0xff] %v2683_v53  ;;  %v2682_v48 = vmax.f32 %v2674_v17, 0.0 }
 0x398   : > { %2690 = vst [vmem:[%s5739_s16 + $0x10] sm:$0xff] %v2682_v48 }
 0x3b3   : > { %v2987_v31 = vpop.f32.mrf.mxu0 }
 0x3b4   : > { %v2039_v10 = vmul.f32 %v2987_v31, %v5449_v40 }
 0x3b5   : > { %v1936_v0 = vpop.f32.mrf.mxu0 }
 0x3b6   : > { %v2078_v49 = vadd.f32 %v5458_v24, %v2039_v10  ;;  %v2038_v42 = vmul.f32 %v5449_v40, %v1936_v0 }
 0x3b8   : > { %v2110_v54 = vmax.f32 %v2078_v49, 0.0  ;;  %v2077_v46 = vadd.f32 %v5458_v24, %v2038_v42 }
 0x3ba   : > { %2142 = vst [vmem:[%s5489_s21 + $0x88] sm:$0xff] %v2110_v54  ;;  %v2109_v30 = vmax.f32 %v2077_v46, 0.0 }
 0x3bc   : > { %2141 = vst [vmem:[%s5489_s21 + $0x80] sm:$0xff] %v2109_v30  ;;  %v3027_v59 = vpop.f32.mrf.mxu1 }
 0x3bd   : > { %v2662_v33 = vmul.f32 %v3027_v59, %v5725_v37 }
 0x3be   : > { %v2631_v36 = vpop.f32.mrf.mxu1 }
 0x3bf   : > { %v2677_v55 = vadd.f32 %v5731_v63, %v2662_v33  ;;  %v2661_v39 = vmul.f32 %v5725_v37, %v2631_v36 }
 0x3c1   : > { %v2685_v58 = vmax.f32 %v2677_v55, 0.0  ;;  %v2676_v60 = vadd.f32 %v5731_v63, %v2661_v39 }
 0x3c3   : > { %2693 = vst [vmem:[%s5739_s16 + $0x28] sm:$0xff] %v2685_v58  ;;  %v2684_v12 = vmax.f32 %v2676_v60, 0.0 }
 0x3c5   : > { %2692 = vst [vmem:[%s5739_s16 + $0x20] sm:$0xff] %v2684_v12 }
 0x3d3   : > { %v3030_v32 = vpop.f32.mrf.mxu1 }
 0x3d4   : > { %v2990_v62 = vpop.f32.mrf.mxu0  ;;  %v2664_v16 = vmul.f32 %v3030_v32, %v5725_v37 }
 0x3d5   : > { %v2041_v38 = vmul.f32 %v2990_v62, %v5449_v40  ;;  %v2641_v27 = vpop.f32.mrf.mxu1 }
 0x3d6   : > { %v2679_v18 = vadd.f32 %v5731_v63, %v2664_v16  ;;  %v1946_v13 = vpop.f32.mrf.mxu0  ;;  %v2663_v41 = vmul.f32 %v5725_v37, %v2641_v27 }
 0x3d7   : > { %v2080_v29 = vadd.f32 %v5458_v24, %v2041_v38  ;;  %v2040_v21 = vmul.f32 %v5449_v40, %v1946_v13 }
 0x3d8   : > { %v2687_v45 = vmax.f32 %v2679_v18, 0.0  ;;  %v2678_v51 = vadd.f32 %v5731_v63, %v2663_v41 }
 0x3d9   : > { %v2112_v7 = vmax.f32 %v2080_v29, 0.0  ;;  %v2079_v23 = vadd.f32 %v5458_v24, %v2040_v21 }
 0x3da   : > { %2695 = vst [vmem:[%s5739_s16 + $0x38] sm:$0xff] %v2687_v45  ;;  %v2686_v15 = vmax.f32 %v2678_v51, 0.0 }
 0x3db   : > { %2144 = vst [vmem:[%s5489_s21 + $0x98] sm:$0xff] %v2112_v7  ;;  %v2111_v40 = vmax.f32 %v2079_v23, 0.0 }
 0x3dc   : > { %2694 = vst [vmem:[%s5739_s16 + $0x30] sm:$0xff] %v2686_v15 }
 0x3dd   : > { %2143 = vst [vmem:[%s5489_s21 + $0x90] sm:$0xff] %v2111_v40 }
 0x3de   : > { %3147 = shalt.err (!%p3144_p3)
}
 0x3df   : > { %s3148_s21 = scalar_lea.hbm %s5783_s23, 1024  ;;  %s3152_s13 = scalar_lea.hbm %s5873_s9, 2048 }
 0x3e0   : > { %p3149_p4 = scmp.ne.s32.totalorder %s5783_s23, %s3148_s21  ;;  %p3153_p9 = scmp.lt.s32.totalorder %s5783_s23, %s5873_s9 }
 0x3e1   : > { %p3154_p10 = scmp.lt.s32.totalorder %s3152_s13, %s3148_s21 }
 0x3e2   : > { %p3150_p7 = pnand %p3149_p4, %p3325_p5 }
 0x3e3   : > { %p3155_p11 = por %p3154_p10, %p3153_p9 }
 0x3e4   : > { %p3151_p8 = pneg %p3150_p7 }
 0x3e6   : > { %p3156_p12 = pnand %p3155_p11, %p3151_p8 }
 0x3e8   : > { %3159 = shalt.err (!%p3156_p12)
}
 0x3e9   : > { %s3235_s1 = smov 128   ;;  %s6330_s17 = smov 8  }
 0x3ea   : > { %3044 = dma.vmem_to_hbm [thread:$0]  (%p3325_p5), %s5785_s14, 1024, %s5783_s23, %s2702_s0, %s3235_s1, %s3235_s1, %s6330_s17  }
 0x3eb   : > { %s2697_s22 = scalar_lea.sflag [#allocation3], %s5444_s26  ;;  %s3160_s21 = scalar_lea.vmem %s5793_s25, 4096 }
 0x3ec   : > { %p3161_p13 = scmp.ne.s32.totalorder %s5793_s25, %s3160_s21  ;;  %s3236_s16 = smov [#allocation2]  }
 0x3ed   : > { %s3164_s24 = sshll.u32 %s3236_s16, 4  ;;  %s3165_s24 = int_to_ptr.vmem [resolvable:$false] %s3164_s24 }
 0x3ee   : > { %p3162_p0 = pnand %p3161_p13, %p3325_p5  ;;  %s3166_s13 = scalar_lea.vmem %s3165_s24, 8192 }
 0x3ef   : > { %p3167_p2 = scmp.lt.s32.totalorder %s5793_s25, %s3165_s24  ;;  %p3168_p3 = scmp.lt.s32.totalorder %s3166_s13, %s3160_s21 }
 0x3f0   : > { %p3163_p1 = pneg %p3162_p0 }
 0x3f1   : > { %p3169_p4 = por %p3168_p3, %p3167_p2 }
 0x3f3   : > { %p3170_p7 = pnand %p3169_p4, %p3163_p1 }
 0x3f5   : > { %3173 = shalt.err (!%p3170_p7)
}
 0x3f6   : > { %s3174_s0 = scalar_lea.hbm %s5791_s27, 4096  ;;  %s3178_s23 = scalar_lea.hbm %s5872_s8, 8192 }
 0x3f7   : > { %p3175_p8 = scmp.ne.s32.totalorder %s5791_s27, %s3174_s0  ;;  %p3179_p11 = scmp.lt.s32.totalorder %s5791_s27, %s5872_s8 }
 0x3f8   : > { %p3180_p12 = scmp.lt.s32.totalorder %s3178_s23, %s3174_s0 }
 0x3f9   : > { %p3176_p9 = pnand %p3175_p8, %p3325_p5 }
 0x3fa   : > { %p3181_p13 = por %p3180_p12, %p3179_p11 }
 0x3fb   : > { %p3177_p10 = pneg %p3176_p9 }
 0x3fd   : > { %p3182_p0 = pnand %p3181_p13, %p3177_p10 }
 0x3ff   : > { %3185 = shalt.err (!%p3182_p0)
}
 0x400   : > { %3043 = dma.vmem_to_hbm [thread:$0]  (%p3325_p5), %s5793_s25, 4096, %s5791_s27, %s2697_s22, %s3235_s1, %s3235_s1, %s6330_s17  }
 0x401 PF: > { %p3054_p1 = scmp.ge.s32.totalorder %s3224_s12, 2  ;;  %s2746_s21 = sand.u32 1, %s3212_s30  }
 0x402   : > { %s2747_s16 = scalar_lea.sflag [#allocation3], %s2746_s21 }
 0x403   : > { %p3048_p2 = pnand %p3054_p1, %p3329_p6 }
 0x405   : > { %p3049_p3 = pneg %p3048_p2 }
 0x407   : > { %3203 = dma.done.wait (%p3049_p3), %s2747_s16, 4096  }
 0x408   : > { %3205 = vsyncadd (%p3049_p3), %s2747_s16, 4294963200  ;;  %s2756_s24 = scalar_lea.sflag [#allocation5], %s2746_s21 }
 0x409   : > { %3207 = dma.done.wait (%p3049_p3), %s2756_s24, 1024  }
 0x40a   : > { %3209 = vsyncadd (%p3049_p3), %s2756_s24, 4294966272  ;;  %p23_p5 = scmp.ge.s32.totalorder %s3312_s15, 4   ;;  %s6331_s30 = smov %s3216_s10 }
 0x40b   : > { %s6332_s10 = smov %s3220_s11  ;;  %s6333_s11 = smov %s3323_s18 }
 0x40c   : > { %s6334_s12 = smov %s3312_s15  ;;  %25 = sbr.rel (!%p23_p5) target bundleno = 8 (0x8), region = 107 }
 0x411   :  { %2761 = vsyncpa [#allocation3], 1 }
 0x412   :  { %2763 = vsyncpa [#allocation3 + $0x1], 1 }
 0x413   :  { %2764 = vsyncpa [#allocation5], 1 }
 0x414   :  { %2766 = vsyncpa [#allocation5 + $0x1], 1 }

</bundles_post_ra>
